<compile_context>
chip_gen: v7x
topology: tpu7x:2x2x1
jax: 0.10.0
libtpu: 0.0.40
codegen_flags: <defaults>
</compile_context>

<pallas_src>
import math
import functools

import jax
import jax.numpy as jnp
from jax.experimental import pallas as pl
from jax.experimental.pallas import tpu as pltpu


def _mha_kernel(x_ref, wqkv_ref, wp_ref, bqkv_ref, bp_ref, mask_ref, o_ref,
                *, n_head, head_size):
    T, C = x_ref.shape
    H, D = n_head, head_size

    x = x_ref[...]                                             # (T, C) bf16

    # ---- Fused QKV projection: one lane-dense (T,C)@(C,3C) MXU matmul ------------
    qkv = jnp.dot(x, wqkv_ref[...], preferred_element_type=jnp.float32)
    qkv = (qkv + bqkv_ref[...]).astype(jnp.bfloat16)           # (T, 3C), bias add in f32

    # Relayout to per-head (H, T, D) operands (data movement only; MXU stays dense).
    def split_heads(base):                                     # lane offset -> (H, T, D)
        return jnp.stack(
            [qkv[:, base + h * D: base + (h + 1) * D] for h in range(H)], axis=0)

    q = split_heads(0)
    k = split_heads(C)
    v = split_heads(2 * C)

    # ---- Causal attention, all heads batched (f32 accumulation) ------------------
    s = jnp.einsum('htd,hsd->hts', q, k,
                   preferred_element_type=jnp.float32)          # (H, T, T)
    s = s + mask_ref[...][None, :, :]                           # additive causal mask

    # Unnormalized softmax (f32 on VPU/EUP); normalization deferred past p@v.
    s = s - jnp.max(s, axis=-1, keepdims=True)
    p = jnp.exp(s)
    l = jnp.sum(p, axis=-1, keepdims=True)                      # (H, T, 1)

    o = jnp.einsum('hts,hsd->htd', p.astype(jnp.bfloat16), v,
                   preferred_element_type=jnp.float32)          # (H, T, D)
    o = o * pl.reciprocal(l, approx=True)                       # deferred norm (EUP)
    o = o.astype(jnp.bfloat16)

    # ---- Output projection: merge heads lane-wise, one K=C MXU matmul ------------
    o_m = jnp.concatenate([o[h] for h in range(H)], axis=-1)    # (T, C), head-major
    y = jnp.dot(o_m, wp_ref[...],
                preferred_element_type=jnp.float32) + bp_ref[...]
    o_ref[...] = y.astype(o_ref.dtype)                          # lane-dense (T, C) store


def multihead_attention(x, params, *, n_head):
    """x: (B, T, C) f32.  params: dict of PyTorch-layout Linear weights/biases."""
    B, T, C = x.shape
    H = n_head
    D = C // n_head
    scale = 1.0 / math.sqrt(D)

    # PyTorch nn.Linear weight is (out, in) → transpose to (in, out).  Concatenate
    # Q/K/V along the output dim into one lane-dense (C, 3C) bf16 matrix; fold the
    # SDPA scale into the Q columns and Q bias.
    wqkv = jnp.concatenate(
        [params["wq"].T * scale, params["wk"].T, params["wv"].T],
        axis=1).astype(jnp.bfloat16)                                    # (C, 3C)
    bqkv = jnp.concatenate(
        [params["bq"] * scale, params["bk"], params["bv"]]
    ).reshape(1, 3 * C).astype(jnp.float32)                             # (1, 3C)

    wp = params["wp"].T.astype(jnp.bfloat16)                            # (C, C) in->out
    bp = params["bp"].reshape(1, C).astype(jnp.float32)                 # (1, C)

    # Additive causal mask, built once (constant index_map → fetched once).
    row = jax.lax.broadcasted_iota(jnp.int32, (T, T), 0)
    col = jax.lax.broadcasted_iota(jnp.int32, (T, T), 1)
    mask = jnp.where(col <= row, 0.0, -1e30).astype(jnp.float32)        # (T, T)

    x_bf16 = x.astype(jnp.bfloat16)

    kernel = functools.partial(_mha_kernel, n_head=H, head_size=D)

    x_spec = pl.BlockSpec((None, T, C), lambda b: (b, 0, 0))            # squeezed batch
    wqkv_spec = pl.BlockSpec((C, 3 * C), lambda b: (0, 0))
    wp_spec = pl.BlockSpec((C, C), lambda b: (0, 0))
    bqkv_spec = pl.BlockSpec((1, 3 * C), lambda b: (0, 0))
    bp_spec = pl.BlockSpec((1, C), lambda b: (0, 0))
    mask_spec = pl.BlockSpec((T, T), lambda b: (0, 0))

    # Advisory cost estimate (helps XLA schedule neighbors around this tiny kernel).
    flops = B * (2 * T * C * (3 * C)      # fused QKV projection
                 + 4 * H * T * T * D      # q@k.T and p@v
                 + 2 * T * C * C)         # output projection
    transcendentals = B * H * T * (T + 1)  # exp + reciprocal
    bytes_accessed = (B * T * C * 2 + C * 3 * C * 2 + C * C * 2
                      + 3 * C * 4 + C * 4 + T * T * 4 + B * T * C * 4)

    return pl.pallas_call(
        kernel,
        out_shape=jax.ShapeDtypeStruct((B, T, C), x.dtype),
        grid_spec=pltpu.PrefetchScalarGridSpec(
            num_scalar_prefetch=0,
            grid=(B,),
            in_specs=[x_spec, wqkv_spec, wp_spec, bqkv_spec, bp_spec, mask_spec],
            out_specs=x_spec,
        ),
        compiler_params=pltpu.CompilerParams(
            dimension_semantics=("parallel",)),
        cost_estimate=pl.CostEstimate(flops=flops,
                                      transcendentals=transcendentals,
                                      bytes_accessed=bytes_accessed),
    )(x_bf16, wqkv, wp, bqkv, bp, mask)


def _reference(x, params, *, n_head):
    """Pure-JAX f32 reference mirroring the PyTorch forward (eval mode)."""
    B, T, C = x.shape
    D = C // n_head

    def lin(x, w, b):
        return x @ w.T + b

    q = lin(x, params["wq"], params["bq"]).reshape(B, T, n_head, D).transpose(0, 2, 1, 3)
    k = lin(x, params["wk"], params["bk"]).reshape(B, T, n_head, D).transpose(0, 2, 1, 3)
    v = lin(x, params["wv"], params["bv"]).reshape(B, T, n_head, D).transpose(0, 2, 1, 3)
    scores = jnp.einsum("bhqd,bhkd->bhqk", q, k) / math.sqrt(D)
    mask = jnp.tril(jnp.ones((T, T), dtype=bool))
    scores = jnp.where(mask, scores, -jnp.inf)
    attn = jax.nn.softmax(scores, axis=-1)
    out = jnp.einsum("bhqk,bhkd->bhqd", attn, v)
    out = out.transpose(0, 2, 1, 3).reshape(B, T, C)
    return lin(out, params["wp"], params["bp"])


if __name__ == "__main__":
    # Module config: n_embd=128, n_head=4, head_size=32, context_size=128, bias=True.
    B, T, C = 2, 128, 128
    N_HEAD = 4

    key = jax.random.PRNGKey(0)
    ks = jax.random.split(key, 9)
    scale = 1.0 / math.sqrt(C)
    params = {
        "wq": jax.random.uniform(ks[0], (C, C), jnp.float32, -scale, scale),
        "wk": jax.random.uniform(ks[1], (C, C), jnp.float32, -scale, scale),
        "wv": jax.random.uniform(ks[2], (C, C), jnp.float32, -scale, scale),
        "wp": jax.random.uniform(ks[3], (C, C), jnp.float32, -scale, scale),
        "bq": jax.random.uniform(ks[4], (C,), jnp.float32, -scale, scale),
        "bk": jax.random.uniform(ks[5], (C,), jnp.float32, -scale, scale),
        "bv": jax.random.uniform(ks[6], (C,), jnp.float32, -scale, scale),
        "bp": jax.random.uniform(ks[7], (C,), jnp.float32, -scale, scale),
    }
    x = jax.random.normal(ks[8], (B, T, C), jnp.float32)

    out = multihead_attention(x, params, n_head=N_HEAD)
    out = jax.block_until_ready(out)

    ref = _reference(x, params, n_head=N_HEAD)
    assert out.shape == (B, T, C)
    # Tolerance covers bf16 MXU operands + approx reciprocal normalization.
    assert jnp.allclose(out, ref, atol=3e-2, rtol=3e-2), (
        f"mismatch vs reference: max abs err {jnp.max(jnp.abs(out - ref))}")
    print("KERNEL_OK")
</pallas_src>

<mosaic_0001>
module attributes {stable_mosaic.version = 11 : i64} {
  func.func @_mha_kernel(%arg0: i32, %arg1: memref<1x128x128xbf16, #tpu.memory_space<vmem>>, %arg2: memref<128x384xbf16, #tpu.memory_space<vmem>>, %arg3: memref<128x128xbf16, #tpu.memory_space<vmem>>, %arg4: memref<1x384xf32, #tpu.memory_space<vmem>>, %arg5: memref<1x128xf32, #tpu.memory_space<vmem>>, %arg6: memref<128x128xf32, #tpu.memory_space<vmem>>, %arg7: memref<1x128x128xf32, #tpu.memory_space<vmem>>) attributes {dimension_semantics = [#tpu.dimension_semantics<parallel>], iteration_bounds = array<i64: 2>, scalar_prefetch = 0 : i64, scratch_operands = 0 : i64, tpu.core_type = #tpu.core_type<tc>, window_params = [{transform_indices = @transform_0, window_bounds = array<i64: 1, 128, 128>}, {pipeline_mode = #tpu.pipeline_mode<synchronous>, transform_indices = @transform_1, window_bounds = array<i64: 128, 384>}, {pipeline_mode = #tpu.pipeline_mode<synchronous>, transform_indices = @transform_2, window_bounds = array<i64: 128, 128>}, {pipeline_mode = #tpu.pipeline_mode<synchronous>, transform_indices = @transform_3, window_bounds = array<i64: 1, 384>}, {pipeline_mode = #tpu.pipeline_mode<synchronous>, transform_indices = @transform_4, window_bounds = array<i64: 1, 128>}, {pipeline_mode = #tpu.pipeline_mode<synchronous>, transform_indices = @transform_5, window_bounds = array<i64: 128, 128>}, {transform_indices = @transform_6, window_bounds = array<i64: 1, 128, 128>}]} {
    %c0 = arith.constant 0 : index
    %c0_0 = arith.constant 0 : index
    %c0_1 = arith.constant 0 : index
    %0 = vector.load %arg1[%c0, %c0_0, %c0_1] : memref<1x128x128xbf16, #tpu.memory_space<vmem>>, vector<1x128x128xbf16>
    %1 = vector.shape_cast %0 : vector<1x128x128xbf16> to vector<128x128xbf16>
    %c0_2 = arith.constant 0 : index
    %c0_3 = arith.constant 0 : index
    %2 = vector.load %arg2[%c0_2, %c0_3] : memref<128x384xbf16, #tpu.memory_space<vmem>>, vector<128x384xbf16>
    %cst = arith.constant dense<0.000000e+00> : vector<128x384xf32>
    %3 = tpu.matmul %1, %2, %cst {dimension_numbers = #tpu.dot_dimension_numbers<[1], [0], [0], [1], [0, 0, 1, 1], [], []>} : vector<128x128xbf16>, vector<128x384xbf16>, vector<128x384xf32> -> vector<128x384xf32>
    %c0_4 = arith.constant 0 : index
    %c0_5 = arith.constant 0 : index
    %4 = vector.load %arg4[%c0_4, %c0_5] : memref<1x384xf32, #tpu.memory_space<vmem>>, vector<1x384xf32>
    %5 = vector.broadcast %4 : vector<1x384xf32> to vector<128x384xf32>
    %6 = arith.addf %3, %5 : vector<128x384xf32>
    %7 = arith.truncf %6 : vector<128x384xf32> to vector<128x384xbf16>
    %8 = vector.extract_strided_slice %7 {offsets = [0, 0], sizes = [128, 32], strides = [1, 1]} : vector<128x384xbf16> to vector<128x32xbf16>
    %9 = vector.extract_strided_slice %7 {offsets = [0, 32], sizes = [128, 32], strides = [1, 1]} : vector<128x384xbf16> to vector<128x32xbf16>
    %10 = vector.extract_strided_slice %7 {offsets = [0, 64], sizes = [128, 32], strides = [1, 1]} : vector<128x384xbf16> to vector<128x32xbf16>
    %11 = vector.extract_strided_slice %7 {offsets = [0, 96], sizes = [128, 32], strides = [1, 1]} : vector<128x384xbf16> to vector<128x32xbf16>
    %12 = vector.shape_cast %8 : vector<128x32xbf16> to vector<1x128x32xbf16>
    %13 = vector.shape_cast %9 : vector<128x32xbf16> to vector<1x128x32xbf16>
    %14 = vector.shape_cast %10 : vector<128x32xbf16> to vector<1x128x32xbf16>
    %15 = vector.shape_cast %11 : vector<128x32xbf16> to vector<1x128x32xbf16>
    %16 = tpu.concatenate %12, %13, %14, %15 in 0 : vector<1x128x32xbf16>, vector<1x128x32xbf16>, vector<1x128x32xbf16>, vector<1x128x32xbf16> -> vector<4x128x32xbf16>
    %17 = vector.extract_strided_slice %7 {offsets = [0, 128], sizes = [128, 32], strides = [1, 1]} : vector<128x384xbf16> to vector<128x32xbf16>
    %18 = vector.extract_strided_slice %7 {offsets = [0, 160], sizes = [128, 32], strides = [1, 1]} : vector<128x384xbf16> to vector<128x32xbf16>
    %19 = vector.extract_strided_slice %7 {offsets = [0, 192], sizes = [128, 32], strides = [1, 1]} : vector<128x384xbf16> to vector<128x32xbf16>
    %20 = vector.extract_strided_slice %7 {offsets = [0, 224], sizes = [128, 32], strides = [1, 1]} : vector<128x384xbf16> to vector<128x32xbf16>
    %21 = vector.shape_cast %17 : vector<128x32xbf16> to vector<1x128x32xbf16>
    %22 = vector.shape_cast %18 : vector<128x32xbf16> to vector<1x128x32xbf16>
    %23 = vector.shape_cast %19 : vector<128x32xbf16> to vector<1x128x32xbf16>
    %24 = vector.shape_cast %20 : vector<128x32xbf16> to vector<1x128x32xbf16>
    %25 = tpu.concatenate %21, %22, %23, %24 in 0 : vector<1x128x32xbf16>, vector<1x128x32xbf16>, vector<1x128x32xbf16>, vector<1x128x32xbf16> -> vector<4x128x32xbf16>
    %26 = vector.extract_strided_slice %7 {offsets = [0, 256], sizes = [128, 32], strides = [1, 1]} : vector<128x384xbf16> to vector<128x32xbf16>
    %27 = vector.extract_strided_slice %7 {offsets = [0, 288], sizes = [128, 32], strides = [1, 1]} : vector<128x384xbf16> to vector<128x32xbf16>
    %28 = vector.extract_strided_slice %7 {offsets = [0, 320], sizes = [128, 32], strides = [1, 1]} : vector<128x384xbf16> to vector<128x32xbf16>
    %29 = vector.extract_strided_slice %7 {offsets = [0, 352], sizes = [128, 32], strides = [1, 1]} : vector<128x384xbf16> to vector<128x32xbf16>
    %30 = vector.shape_cast %26 : vector<128x32xbf16> to vector<1x128x32xbf16>
    %31 = vector.shape_cast %27 : vector<128x32xbf16> to vector<1x128x32xbf16>
    %32 = vector.shape_cast %28 : vector<128x32xbf16> to vector<1x128x32xbf16>
    %33 = vector.shape_cast %29 : vector<128x32xbf16> to vector<1x128x32xbf16>
    %34 = tpu.concatenate %30, %31, %32, %33 in 0 : vector<1x128x32xbf16>, vector<1x128x32xbf16>, vector<1x128x32xbf16>, vector<1x128x32xbf16> -> vector<4x128x32xbf16>
    "tpu.trace_start"() <{level = 10 : i32, message = "htd,hsd->hts"}> : () -> ()
    %cst_6 = arith.constant dense<0.000000e+00> : vector<4x128x128xf32>
    %35 = tpu.matmul %16, %25, %cst_6 {dimension_numbers = #tpu.dot_dimension_numbers<[2], [2], [1], [1], [0, 0, 0, 1, 1, 1], [0], [0]>} : vector<4x128x32xbf16>, vector<4x128x32xbf16>, vector<4x128x128xf32> -> vector<4x128x128xf32>
    "tpu.trace_stop"() : () -> ()
    %c0_7 = arith.constant 0 : index
    %c0_8 = arith.constant 0 : index
    %36 = vector.load %arg6[%c0_7, %c0_8] : memref<128x128xf32, #tpu.memory_space<vmem>>, vector<128x128xf32>
    %37 = vector.shape_cast %36 : vector<128x128xf32> to vector<1x128x128xf32>
    %38 = vector.broadcast %37 : vector<1x128x128xf32> to vector<4x128x128xf32>
    %39 = arith.addf %35, %38 : vector<4x128x128xf32>
    %cst_9 = arith.constant dense<0xFF800000> : vector<4x128xf32>
    %40 = vector.multi_reduction <maximumf>, %39, %cst_9 [2] : vector<4x128x128xf32> to vector<4x128xf32>
    %41 = vector.shape_cast %40 : vector<4x128xf32> to vector<4x128x1xf32>
    %42 = vector.broadcast %41 : vector<4x128x1xf32> to vector<4x128x128xf32>
    %43 = arith.subf %39, %42 : vector<4x128x128xf32>
    %44 = math.exp %43 : vector<4x128x128xf32>
    %cst_10 = arith.constant dense<0.000000e+00> : vector<4x128xf32>
    %45 = vector.multi_reduction <add>, %44, %cst_10 [2] : vector<4x128x128xf32> to vector<4x128xf32>
    %46 = vector.shape_cast %45 : vector<4x128xf32> to vector<4x128x1xf32>
    %47 = arith.truncf %44 : vector<4x128x128xf32> to vector<4x128x128xbf16>
    "tpu.trace_start"() <{level = 10 : i32, message = "hts,hsd->htd"}> : () -> ()
    %cst_11 = arith.constant dense<0.000000e+00> : vector<4x128x32xf32>
    %48 = tpu.matmul %47, %34, %cst_11 {dimension_numbers = #tpu.dot_dimension_numbers<[2], [1], [1], [2], [0, 0, 0, 1, 1, 2], [0], [0]>} : vector<4x128x128xbf16>, vector<4x128x32xbf16>, vector<4x128x32xf32> -> vector<4x128x32xf32>
    "tpu.trace_stop"() : () -> ()
    %49 = tpu.reciprocal %46 {approx = true} : vector<4x128x1xf32> -> vector<4x128x1xf32>
    %50 = vector.broadcast %49 : vector<4x128x1xf32> to vector<4x128x32xf32>
    %51 = arith.mulf %48, %50 : vector<4x128x32xf32>
    %52 = arith.truncf %51 : vector<4x128x32xf32> to vector<4x128x32xbf16>
    %53 = vector.extract_strided_slice %52 {offsets = [0, 0, 0], sizes = [1, 128, 32], strides = [1, 1, 1]} : vector<4x128x32xbf16> to vector<1x128x32xbf16>
    %54 = vector.shape_cast %53 : vector<1x128x32xbf16> to vector<128x32xbf16>
    %55 = vector.extract_strided_slice %52 {offsets = [1, 0, 0], sizes = [1, 128, 32], strides = [1, 1, 1]} : vector<4x128x32xbf16> to vector<1x128x32xbf16>
    %56 = vector.shape_cast %55 : vector<1x128x32xbf16> to vector<128x32xbf16>
    %57 = vector.extract_strided_slice %52 {offsets = [2, 0, 0], sizes = [1, 128, 32], strides = [1, 1, 1]} : vector<4x128x32xbf16> to vector<1x128x32xbf16>
    %58 = vector.shape_cast %57 : vector<1x128x32xbf16> to vector<128x32xbf16>
    %59 = vector.extract_strided_slice %52 {offsets = [3, 0, 0], sizes = [1, 128, 32], strides = [1, 1, 1]} : vector<4x128x32xbf16> to vector<1x128x32xbf16>
    %60 = vector.shape_cast %59 : vector<1x128x32xbf16> to vector<128x32xbf16>
    %61 = tpu.concatenate %54, %56, %58, %60 in 1 : vector<128x32xbf16>, vector<128x32xbf16>, vector<128x32xbf16>, vector<128x32xbf16> -> vector<128x128xbf16>
    %c0_12 = arith.constant 0 : index
    %c0_13 = arith.constant 0 : index
    %62 = vector.load %arg3[%c0_12, %c0_13] : memref<128x128xbf16, #tpu.memory_space<vmem>>, vector<128x128xbf16>
    %cst_14 = arith.constant dense<0.000000e+00> : vector<128x128xf32>
    %63 = tpu.matmul %61, %62, %cst_14 {dimension_numbers = #tpu.dot_dimension_numbers<[1], [0], [0], [1], [0, 0, 1, 1], [], []>} : vector<128x128xbf16>, vector<128x128xbf16>, vector<128x128xf32> -> vector<128x128xf32>
    %c0_15 = arith.constant 0 : index
    %c0_16 = arith.constant 0 : index
    %64 = vector.load %arg5[%c0_15, %c0_16] : memref<1x128xf32, #tpu.memory_space<vmem>>, vector<1x128xf32>
    %65 = vector.broadcast %64 : vector<1x128xf32> to vector<128x128xf32>
    %66 = arith.addf %63, %65 : vector<128x128xf32>
    %c0_17 = arith.constant 0 : index
    %c0_18 = arith.constant 0 : index
    %c0_19 = arith.constant 0 : index
    %67 = vector.load %arg7[%c0_17, %c0_18, %c0_19] : memref<1x128x128xf32, #tpu.memory_space<vmem>>, vector<1x128x128xf32>
    %68 = vector.shape_cast %67 : vector<1x128x128xf32> to vector<128x128xf32>
    %69 = vector.shape_cast %66 : vector<128x128xf32> to vector<1x128x128xf32>
    tpu.vector_store %arg7[%c0_17, %c0_18, %c0_19], %69 {strides = array<i32>} : memref<1x128x128xf32, #tpu.memory_space<vmem>>, vector<1x128x128xf32>,
    return
  }
  func.func @transform_0(%arg0: i32) -> (i32, i32, i32) {
    %c0_i32 = arith.constant 0 : i32
    %c0_i32_0 = arith.constant 0 : i32
    %c0_i32_1 = arith.constant 0 : i32
    return %arg0, %c0_i32, %c0_i32_0 : i32, i32, i32
  }
  func.func @transform_1(%arg0: i32) -> (i32, i32) {
    %c0_i32 = arith.constant 0 : i32
    %c0_i32_0 = arith.constant 0 : i32
    %c0_i32_1 = arith.constant 0 : i32
    return %c0_i32, %c0_i32_0 : i32, i32
  }
  func.func @transform_2(%arg0: i32) -> (i32, i32) {
    %c0_i32 = arith.constant 0 : i32
    %c0_i32_0 = arith.constant 0 : i32
    %c0_i32_1 = arith.constant 0 : i32
    return %c0_i32, %c0_i32_0 : i32, i32
  }
  func.func @transform_3(%arg0: i32) -> (i32, i32) {
    %c0_i32 = arith.constant 0 : i32
    %c0_i32_0 = arith.constant 0 : i32
    %c0_i32_1 = arith.constant 0 : i32
    return %c0_i32, %c0_i32_0 : i32, i32
  }
  func.func @transform_4(%arg0: i32) -> (i32, i32) {
    %c0_i32 = arith.constant 0 : i32
    %c0_i32_0 = arith.constant 0 : i32
    %c0_i32_1 = arith.constant 0 : i32
    return %c0_i32, %c0_i32_0 : i32, i32
  }
  func.func @transform_5(%arg0: i32) -> (i32, i32) {
    %c0_i32 = arith.constant 0 : i32
    %c0_i32_0 = arith.constant 0 : i32
    %c0_i32_1 = arith.constant 0 : i32
    return %c0_i32, %c0_i32_0 : i32, i32
  }
  func.func @transform_6(%arg0: i32) -> (i32, i32, i32) {
    %c0_i32 = arith.constant 0 : i32
    %c0_i32_0 = arith.constant 0 : i32
    %c0_i32_1 = arith.constant 0 : i32
    return %arg0, %c0_i32, %c0_i32_0 : i32, i32, i32
  }
}

</mosaic_0001>

<bundles_post_ra>
// kernel: tpu_custom_call.1
= control target key start
LH: loop header
LB: loop body
LE: loop exit
PB: predicated region body
PF: predicated region fallthrough
CT: control target
= control target key end

     0   :  { %11 = vsyncpa [#allocation3], 0  ;;  %s6015_s0 = inlined_call_operand.hbm [shape: bf16[2,128,128], index: 0, kind: input, shape index: {}]   ;;  %s6016_s1 = inlined_call_operand.hbm [shape: bf16[128,384], index: 1, kind: input, shape index: {}]   ;;  %s6017_s2 = inlined_call_operand.hbm [shape: bf16[128,128], index: 2, kind: input, shape index: {}]   ;;  %s6018_s3 = inlined_call_operand.vmem [shape: f32[1,384], index: 3, kind: input, shape index: {}]   ;;  %s6019_s4 = inlined_call_operand.vmem [shape: f32[1,128], index: 4, kind: input, shape index: {}]   ;;  %s6020_s5 = inlined_call_operand.hbm [shape: f32[128,128], index: 5, kind: input, shape index: {}]   ;;  %s6021_s6 = inlined_call_operand.hbm [shape: f32[2,128,128], index: 6, kind: output, shape index: {}]  }
   0x1   :  { %13 = vsyncpa [#allocation3 + $0x1], 0 }
   0x2   :  { %14 = vsyncpa [#allocation6], 0 }
   0x3   :  { %15 = vsyncpa [#allocation9], 0 }
   0x4   :  { %16 = vsyncpa [#allocation4], 0 }
   0x5   :  { %18 = vsyncpa [#allocation4 + $0x1], 0  ;;  %s4303_s21 = smov 0   ;;  %s4305_s22 = smov 0  }
   0x6   :  { %s4307_s23 = smov 0   ;;  %s4309_s24 = smov 0  }
   0x7 LB: > { %s4324_s25 = sadd.s32 4294967295, %s4249_s24   ;;  %s3045_s26 = sadd.s32 4294967294, %s4249_s24   ;;  %s4249_s24 = sphi %s4309_s24, %s6179_s24   ;;  %s4245_s23 = sphi %s4307_s23, %s6178_s23   ;;  %s4241_s22 = sphi %s4305_s22, %s6177_s22   ;;  %s4237_s21 = sphi %s4303_s21, %s6176_s21  }
   0x8   : > { %p44_p0 = scmp.ne.s32.totalorder %s4241_s22, %s4237_s21  ;;  %p6022_p1 = scmp.eq.s32.totalorder %s4324_s25, 0 }
   0x9   : > { %p179_p3 = scmp.eq.s32.totalorder %s3045_s26, 1  ;;  %p3046_p5 = scmp.ge.s32.totalorder %s4249_s24, 1 }
   0xa   : > { %p4333_p4 = por %p6022_p1, %p44_p0  ;;  %p186_p7 = scmp.lt.s32.totalorder %s4249_s24, 3 }
   0xb   : > { %p4338_p6 = por %p179_p3, %p44_p0  ;;  %s4251_s30 = smov [#allocation5]  }
   0xc   : > { %s6065_s27 = scalar_select %p4333_p4, 1, 0 }
   0xd   : > { %s6066_s28 = scalar_select %p4338_p6, 1, 0 }
   0xe   : > { %p4343_p8 = pnand %p3046_p5, %p186_p7  ;;  %s198_s7 = sshll.u32 %s4251_s30, 4  ;;  %s4347_s7 = int_to_ptr.vmem [resolvable:$true] %s198_s7 }
   0xf   : > { %s4252_s9 = smov [#allocation7]   ;;  %s4061_s13 = scalar_lea.hbm %s6016_s1, 3072 }
  0x10   : > { %s6067_s29 = scalar_select %p4343_p8, 1, 0 }
  0x11   : > { %p3684_p9 = pneg %p4343_p8  ;;  %s211_s10 = sshll.u32 %s4252_s9, 4  ;;  %s4358_s10 = int_to_ptr.vmem [resolvable:$true] %s211_s10 }
  0x12   : > { %p4062_p12 = scmp.ne.s32.totalorder %s6016_s1, %s4061_s13  ;;  %p4068_p5 = scmp.lt.u32.totalorder %s4061_s13, %s6016_s1 }
  0x13   : > { %p4354_p11 = pnand %p3684_p9, %p6022_p1 }
  0x15   : > { %p4368_p13 = pneg %p4354_p11 }
  0x17   : > { %p4064_p0 = pnand %p4368_p13, %p4062_p12 }
  0x19   : > { %p4065_p3 = pneg %p4064_p0 }
  0x1b   : > { %p4070_p7 = pnand %p4068_p5, %p4065_p3 }
  0x1d   : > { %4073 = shalt.err (!%p4070_p7)
}
  0x1e   : > { %s4074_s19 = scalar_lea.vmem %s4347_s7, 3072  ;;  %p4082_p2 = scmp.lt.s32.totalorder %s4347_s7, %s4347_s7 }
  0x1f   : > { %p4075_p9 = scmp.ne.s32.totalorder %s4347_s7, %s4074_s19  ;;  %p4083_p6 = scmp.lt.s32.totalorder %s4074_s19, %s4074_s19 }
  0x21   : > { %p4077_p10 = pnand %p4075_p9, %p4368_p13  ;;  %p4084_p12 = por %p4083_p6, %p4082_p2 }
  0x23   : > { %p4078_p1 = pneg %p4077_p10 }
  0x25   : > { %p4085_p0 = pnand %p4084_p12, %p4078_p1 }
  0x27   : > { %4088 = shalt.err (!%p4085_p0)
}
  0x28   : > { %s4253_s20 = smov 192   ;;  %s4254_s26 = smov 12  }
  0x29   : > { %3687 = dma.hbm_to_vmem [thread:$0]  (!%p4354_p11), %s6016_s1, 3072, %s4347_s7, [#allocation6], %s4253_s20, %s4253_s20, %s4254_s26  }
  0x2a   : > { %s4089_s13 = scalar_lea.hbm %s6017_s2, 1024 }
  0x2b   : > { %p4090_p2 = scmp.ne.s32.totalorder %s6017_s2, %s4089_s13  ;;  %p4096_p10 = scmp.lt.u32.totalorder %s4089_s13, %s6017_s2 }
  0x2d   : > { %p4092_p1 = pnand %p4090_p2, %p4368_p13 }
  0x2f   : > { %p4093_p6 = pneg %p4092_p1 }
  0x31   : > { %p4098_p3 = pnand %p4096_p10, %p4093_p6 }
  0x33   : > { %4101 = shalt.err (!%p4098_p3)
}
  0x34   : > { %s4102_s7 = scalar_lea.vmem %s4358_s10, 1024  ;;  %p4110_p12 = scmp.lt.s32.totalorder %s4358_s10, %s4358_s10 }
  0x35   : > { %p4103_p5 = scmp.ne.s32.totalorder %s4358_s10, %s4102_s7  ;;  %p4111_p0 = scmp.lt.s32.totalorder %s4102_s7, %s4102_s7 }
  0x37   : > { %p4105_p7 = pnand %p4103_p5, %p4368_p13  ;;  %p4112_p2 = por %p4111_p0, %p4110_p12 }
  0x39   : > { %p4106_p9 = pneg %p4105_p7 }
  0x3b   : > { %p4113_p1 = pnand %p4112_p2, %p4106_p9 }
  0x3d   : > { %4116 = shalt.err (!%p4113_p1)
}
  0x3e   : > { %s4255_s19 = smov 64   ;;  %s4256_s20 = smov 4  }
  0x3f   : > { %3690 = dma.hbm_to_vmem [thread:$0]  (!%p4354_p11), %s6017_s2, 1024, %s4358_s10, [#allocation6], %s4255_s19, %s4255_s19, %s4256_s20  }
  0x40   : > { %s4257_s9 = smov [#allocation8]   ;;  %s4117_s14 = scalar_lea.hbm %s6020_s5, 2048 }
  0x41   : > { %s230_s11 = sshll.u32 %s4257_s9, 4  ;;  %p4118_p6 = scmp.ne.s32.totalorder %s6020_s5, %s4117_s14  ;;  %s231_s11 = int_to_ptr.vmem [resolvable:$true] %s230_s11 }
  0x42   : > { %p4124_p5 = scmp.lt.u32.totalorder %s4117_s14, %s6020_s5 }
  0x43   : > { %p4120_p10 = pnand %p4118_p6, %p4368_p13 }
  0x45   : > { %p4121_p3 = pneg %p4120_p10 }
  0x47   : > { %p4126_p7 = pnand %p4124_p5, %p4121_p3 }
  0x49   : > { %4129 = shalt.err (!%p4126_p7)
}
  0x4a   : > { %s4130_s10 = scalar_lea.vmem %s231_s11, 2048  ;;  %p4138_p2 = scmp.lt.s32.totalorder %s231_s11, %s231_s11 }
  0x4b   : > { %p4131_p9 = scmp.ne.s32.totalorder %s231_s11, %s4130_s10  ;;  %p4139_p1 = scmp.lt.s32.totalorder %s4130_s10, %s4130_s10 }
  0x4d   : > { %p4133_p12 = pnand %p4131_p9, %p4368_p13  ;;  %p4140_p4 = por %p4139_p1, %p4138_p2 }
  0x4f   : > { %p4134_p0 = pneg %p4133_p12 }
  0x51   : > { %p4141_p8 = pnand %p4140_p4, %p4134_p0 }
  0x53   : > { %4144 = shalt.err (!%p4141_p8)
}
  0x54   : > { %s4258_s26 = smov 128   ;;  %s4259_s16 = smov 8  }
  0x55   : > { %3693 = dma.hbm_to_vmem [thread:$0]  (!%p4354_p11), %s6020_s5, 2048, %s231_s11, [#allocation9], %s4258_s26, %s4258_s26, %s4259_s16  }
  0x56   : > { %s4434_s12 = sadd.s32 1, %s4249_s24   ;;  %s31_s14 = sadd.s32 1, %s4245_s23 }
  0x57   : > { %s28_s13 = ssub.s32 %s4249_s24, %s4434_s12  ;;  %p38_p8 = scmp.ne.s32.totalorder %s4245_s23, %s4241_s22 }
  0x58   : > { %p29_p4 = scmp.eq.s32.totalorder %s28_s13, 0  ;;  %p39_p13 = scmp.eq.s32.totalorder %s4249_s24, 0 }
  0x59   : > { %p3705_p6 = scmp.lt.s32.totalorder %s4249_s24, 2  ;;  %p6070_p3 = scmp.eq.s32.totalorder %s4324_s25, 1 }
  0x5a   : > { %s4444_s15 = scalar_select %p29_p4, %s4245_s23, %s31_s14  }
  0x5b   : > { %p40_p10 = por %p39_p13, %p38_p8  ;;  %p4448_p5 = por %p6070_p3, %p38_p8 }
  0x5c   : > { %s244_s8 = sand.u32 1, %s4245_s23   ;;  %s3138_s18 = sshll.u32 %s4249_s24, 10 }
  0x5d   : > { %s3051_s11 = sshll.u32 %s244_s8, 6  ;;  %s4457_s26 = scalar_lea.hbm %s6015_s0, %s3138_s18 }
  0x5e   : > { %s248_s16 = scalar_lea.vmem [#allocation2], %s3051_s11  ;;  %p4459_p11 = pnand %p3705_p6, %p40_p10 }
  0x5f   : > { %s255_s30 = sshll.u32 %s248_s16, 4  ;;  %s4465_s13 = scalar_lea.sflag [#allocation3], %s244_s8  ;;  %s4463_s30 = int_to_ptr.vmem [resolvable:$true] %s255_s30 }
  0x60   : > { %s4145_s14 = scalar_lea.hbm %s4457_s26, 1024  ;;  %p4147_p9 = pneg %p4459_p11 }
  0x61   : > { %p4146_p7 = scmp.ne.s32.totalorder %s4457_s26, %s4145_s14  ;;  %s4150_s7 = scalar_lea.hbm %s6015_s0, 2048 }
  0x62   : > { %p4151_p2 = scmp.lt.u32.totalorder %s4457_s26, %s6015_s0  ;;  %p4152_p1 = scmp.lt.u32.totalorder %s4150_s7, %s4145_s14 }
  0x63   : > { %p4148_p12 = pnand %p4147_p9, %p4146_p7  ;;  %p4154_p8 = scmp.lt.u32.totalorder %s4145_s14, %s4457_s26 }
  0x64   : > { %p4153_p4 = por %p4152_p1, %p4151_p2 }
  0x65   : > { %p4149_p0 = pneg %p4148_p12 }
  0x66   : > { %p4155_p13 = por %p4154_p8, %p4153_p4 }
  0x68   : > { %p4156_p6 = pnand %p4155_p13, %p4149_p0 }
  0x6a   : > { %4159 = shalt.err (!%p4156_p6)
}
  0x6b   : > { %s4160_s8 = scalar_lea.vmem %s4463_s30, 1024  ;;  %s4260_s18 = smov [#allocation2]  }
  0x6c   : > { %p4161_p10 = scmp.ne.s32.totalorder %s4463_s30, %s4160_s8  ;;  %s4165_s11 = sshll.u32 %s4260_s18, 4  ;;  %s4166_s11 = int_to_ptr.vmem [resolvable:$false] %s4165_s11 }
  0x6d   : > { %s4167_s10 = scalar_lea.vmem %s4166_s11, 2048  ;;  %p4168_p12 = scmp.lt.s32.totalorder %s4463_s30, %s4166_s11 }
  0x6e   : > { %p4163_p3 = pnand %p4161_p10, %p4147_p9  ;;  %p4169_p2 = scmp.lt.s32.totalorder %s4167_s10, %s4160_s8 }
  0x70   : > { %p4164_p7 = pneg %p4163_p3  ;;  %p4170_p1 = por %p4169_p2, %p4168_p12 }
  0x72   : > { %p4171_p4 = pnand %p4170_p1, %p4164_p7 }
  0x74   : > { %4174 = shalt.err (!%p4171_p4)
}
  0x75   : > { %3697 = dma.hbm_to_vmem [thread:$0]  (!%p4459_p11), %s4457_s26, 1024, %s4463_s30, %s4465_s13, %s4255_s19, %s4255_s19, %s4256_s20  }
  0x76   : > { %p6073_p9 = scmp.ne.s32.totalorder %s6067_s29, 0 }
  0x78   : > { %267 = sbr.rel (%p6073_p9) target bundleno = 1705 (0x6a9), region = 44 }
  0x7f   : > { %s4499_s14 = sand.u32 1, %s4241_s22   ;;  %p6074_p0 = scmp.ne.s32.totalorder %s6065_s27, 0 }
  0x80   : > { %s3055_s7 = sshll.u32 %s4499_s14, 6  ;;  %s270_s16 = scalar_lea.sflag [#allocation3], %s4499_s14 }
  0x81   : > { %s4503_s8 = scalar_lea.vmem [#allocation2], %s3055_s7 }
  0x82   : > { %4220 = dma.done.wait (%p6074_p0), %s270_s16, 1024  }
  0x83   : > { %4222 = vsyncadd (%p6074_p0), %s270_s16, 4294966272  ;;  %p6075_p11 = scmp.eq.s32.totalorder %s4324_s25, 0 }
  0x85   : > { %4224 = dma.done.wait (%p6075_p11), [#allocation6], 4096   ;;  %p6076_p8 = pmov %p6075_p11 }
  0x87   : > { %4226 = vsyncadd (%p6076_p8), [#allocation6], 4294963200  ;;  %p6077_p13 = pmov %p6076_p8 }
  0x88   : > { %p6078_p6 = pmov %p6076_p8 }
  0x89   : > { %4228 = dma.done.wait (%p6077_p13), [#allocation9], 2048  }
  0x8a   : > { %4230 = vsyncadd (%p6078_p6), [#allocation9], 4294965248  ;;  %v4261_v0 = vmov 0   ;;  %v3757_v1 = vld [vmem:[#allocation5 + $0x4] ss:$12 sps:$4 sm:$0xff]   ;;  %v3782_v24 = vld [vmem:[%s4503_s8 + $0x8] sm:$0xff]   ;;  %v365_v33 = vlaneseq }
  0x8b   : > { %588 = vmatprep.mubr.bf16.mxu0 %v4261_v0  ;;  %v3759_v2 = vld [vmem:[#allocation5] ss:$12 sps:$4 sm:$0xff]   ;;  %556 = vmatprep.subr.bf16.mxu0 %v3757_v1  ;;  %v3760_v3 = vld [vmem:[#allocation5 + $0x1c] ss:$12 sps:$4 sm:$0xff]   ;;  %v3762_v4 = vld [vmem:[#allocation5 + $0x18] ss:$12 sps:$4 sm:$0xff]  }
  0x8c   : > { %557 = vmatpush1.bf16.msra.mxu0 %v3759_v2  ;;  %v3763_v5 = vld [vmem:[#allocation5 + $0x34] ss:$12 sps:$4 sm:$0xff]   ;;  %v3765_v6 = vld [vmem:[#allocation5 + $0x30] ss:$12 sps:$4 sm:$0xff]   ;;  %v3766_v7 = vld [vmem:[#allocation5 + $0x4c] ss:$12 sps:$4 sm:$0xff]  }
  0x8d   : > { %558 = vmatprep.subr.bf16.mxu0 %v3760_v3  ;;  %v3768_v8 = vld [vmem:[#allocation5 + $0x48] ss:$12 sps:$4 sm:$0xff]   ;;  %v3781_v9 = vld [vmem:[%s4503_s8] sm:$0xff]   ;;  %v3777_v17 = vld [vmem:[#allocation5 + $0x90] ss:$12 sps:$4 sm:$0xff]   ;;  %v4533_v34 = vshrl.u32 %v365_v33, 7 }
  0x8e   : > { %v3769_v10 = vld [vmem:[#allocation5 + $0x64] ss:$12 sps:$4 sm:$0xff]   ;;  %3316 = vmatprep.mubr.bf16.mxu1 %v3781_v9  ;;  %v3771_v11 = vld [vmem:[#allocation5 + $0x60] ss:$12 sps:$4 sm:$0xff]   ;;  %v3772_v12 = vld [vmem:[#allocation5 + $0x7c] ss:$12 sps:$4 sm:$0xff]  }
  0x8f   : > { %v3774_v13 = vld [vmem:[#allocation5 + $0x78] ss:$12 sps:$4 sm:$0xff]   ;;  %v3775_v14 = vld [vmem:[#allocation5 + $0x94] ss:$12 sps:$4 sm:$0xff]   ;;  %v3792_v21 = vld [vmem:[#allocation5 + $0x50] ss:$12 sps:$4 sm:$0xff]  }
  0x90   : > { %559 = vmatpush1.bf16.msra.mxu0 %v3762_v4  ;;  %v3789_v15 = vld [vmem:[#allocation5 + $0x8] ss:$12 sps:$4 sm:$0xff]   ;;  %v3790_v16 = vld [vmem:[#allocation5 + $0x20] ss:$12 sps:$4 sm:$0xff]   ;;  %v3791_v18 = vld [vmem:[#allocation5 + $0x38] ss:$12 sps:$4 sm:$0xff]  }
  0x91   : > { %560 = vmatprep.subr.bf16.mxu0 %v3763_v5  ;;  %3300 = vmatprep.subr.bf16.mxu1 %v3789_v15  ;;  %v3778_v19 = vld [vmem:[#allocation5 + $0xac] ss:$12 sps:$4 sm:$0xff]   ;;  %v3780_v20 = vld [vmem:[#allocation5 + $0xa8] ss:$12 sps:$4 sm:$0xff]   ;;  %v3796_v26 = vld [vmem:[#allocation5 + $0xb0] ss:$12 sps:$4 sm:$0xff]  }
  0x92   : > { %3301 = vmatpush3.bf16.msra.mxu1 %v3789_v15  ;;  %v3793_v22 = vld [vmem:[#allocation5 + $0x68] ss:$12 sps:$4 sm:$0xff]   ;;  %v3794_v23 = vld [vmem:[#allocation5 + $0x80] ss:$12 sps:$4 sm:$0xff]   ;;  %v3795_v25 = vld [vmem:[#allocation5 + $0x98] ss:$12 sps:$4 sm:$0xff]  }
  0x93   : > { %3302 = vmatprep.subr.bf16.mxu1 %v3790_v16  ;;  %v3783_v27 = vld [vmem:[%s4503_s8 + $0x10] sm:$0xff]   ;;  %v3784_v28 = vld [vmem:[%s4503_s8 + $0x18] sm:$0xff]   ;;  %v3785_v29 = vld [vmem:[%s4503_s8 + $0x20] sm:$0xff]   ;;  %v367_v35 = vsub.s32 0, %v4533_v34  ;;  %v371_v37 = vsub.s32 1, %v4533_v34  ;;  %vm998_vm0 = vcmask 261120  }
  0x94   : > { %561 = vmatpush1.bf16.msra.mxu0 %v3765_v6  ;;  %v3786_v30 = vld [vmem:[%s4503_s8 + $0x28] sm:$0xff]   ;;  %v3787_v31 = vld [vmem:[%s4503_s8 + $0x30] sm:$0xff]   ;;  %v3788_v32 = vld [vmem:[%s4503_s8 + $0x38] sm:$0xff]   ;;  %s4262_s19 = smov 96   ;;  %s4263_s20 = smov 64   ;;  %vm2703_vm1 = vcmask 523264  }
  0x95   : > { %562 = vmatprep.subr.bf16.mxu0 %v3766_v7  ;;  %v4539_v36 = vld [vmem:[%s6018_s3] sm:$0x7]  ;;  %s4264_s26 = smov 32   ;;  %vm2720_vm2 = vcmask 785408   ;;  %s3059_s30 = sshll.u32 %s4499_s14, 7 }
  0x96   : > { %3303 = vmatpush3.bf16.msra.mxu1 %v3790_v16  ;;  %v4543_v38 = vrot.slane %v4539_v36, %v367_v35  ;;  %v4546_v40 = vrot.slane %v4539_v36, %v371_v37  ;;  %s5946_s18 = scalar_lea.vmem [#allocation10], %s3059_s30  ;;  %s3139_s11 = sshll.u32 %s4324_s25, 11 }
  0x97   : > { %3304 = vmatprep.subr.bf16.mxu1 %v3791_v18  ;;  %s2943_s10 = sshll.u32 %s5946_s18, 4  ;;  %s5966_s8 = scalar_lea.hbm %s6021_s6, %s3139_s11  ;;  %s5968_s10 = int_to_ptr.vmem [resolvable:$true] %s2943_s10 }
  0x98   : > { %563 = vmatpush1.bf16.msra.mxu0 %v3768_v8  ;;  %s2930_s25 = scalar_lea.sflag [#allocation4], %s4499_s14  ;;  %s4175_s27 = scalar_lea.vmem %s5968_s10, 2048 }
  0x99   : > { %564 = vmatprep.subr.bf16.mxu0 %v3769_v10  ;;  %p4176_p10 = scmp.ne.s32.totalorder %s5968_s10, %s4175_s27  ;;  %s4265_s29 = smov [#allocation10]  }
  0x9a   : > { %3305 = vmatpush3.bf16.msra.mxu1 %v3791_v18 }
  0x9b   : > { %3306 = vmatprep.subr.bf16.mxu1 %v3792_v21  ;;  %p4177_p3 = pnand %p4176_p10, %p4448_p5 }
  0x9c   : > { %565 = vmatpush1.bf16.msra.mxu0 %v3771_v11 }
  0x9d   : > { %566 = vmatprep.subr.bf16.mxu0 %v3772_v12  ;;  %p4178_p7 = pneg %p4177_p3 }
  0x9e   : > { %3307 = vmatpush3.bf16.msra.mxu1 %v3792_v21 }
  0x9f   : > { %3308 = vmatprep.subr.bf16.mxu1 %v3793_v22 }
  0xa0   : > { %567 = vmatpush1.bf16.msra.mxu0 %v3774_v13 }
  0xa1   : > { %568 = vmatprep.subr.bf16.mxu0 %v3775_v14 }
  0xa2   : > { %3309 = vmatpush3.bf16.msra.mxu1 %v3793_v22 }
  0xa3   : > { %3310 = vmatprep.subr.bf16.mxu1 %v3794_v23 }
  0xa4   : > { %569 = vmatpush1.bf16.msra.mxu0 %v3777_v17 }
  0xa5   : > { %570 = vmatprep.subr.bf16.mxu0 %v3778_v19 }
  0xa6   : > { %3311 = vmatpush3.bf16.msra.mxu1 %v3794_v23 }
  0xa7   : > { %3312 = vmatprep.subr.bf16.mxu1 %v3795_v25 }
  0xa8   : > { %571 = vmatpush1.bf16.msra.mxu0 %v3780_v20 }
  0xaa   : > { %3313 = vmatpush3.bf16.msra.mxu1 %v3795_v25 }
  0xab   : > { %589 = vmatmul.mubr.bf16.vlgmr.msra.gmra.mrb[0].mxu0 %v3781_v9  ;;  %3314 = vmatprep.subr.bf16.mxu1 %v3796_v26 }
  0xac   : > { %598 = vmatprep.mubr.bf16.mxu0 %v4261_v0 }
  0xae   : > { %3315 = vmatpush3.bf16.msra.mxu1 %v3796_v26 }
  0xb1   : > { %3317 = vmatmul.mubr.bf16.vlgmr.msra.gmra.mrb[0].mxu1 %v3782_v24 }
  0xb2   : > { %3320 = vmatprep.mubr.bf16.mxu1 %v3783_v27 }
  0xb3   : > { %599 = vmatmul.mubr.bf16.gmra.mrb[4].mxu0 %v3782_v24 }
  0xb4   : > { %608 = vmatprep.mubr.bf16.mxu0 %v4261_v0 }
  0xb9   : > { %3321 = vmatmul.mubr.bf16.gmra.mrb[4].mxu1 %v3784_v28 }
  0xba   : > { %3324 = vmatprep.mubr.bf16.mxu1 %v3785_v29 }
  0xbb   : > { %609 = vmatmul.mubr.bf16.gmra.mrb[8].mxu0 %v3783_v27 }
  0xbc   : > { %618 = vmatprep.mubr.bf16.mxu0 %v4261_v0 }
  0xc1   : > { %3325 = vmatmul.mubr.bf16.gmra.mrb[8].mxu1 %v3786_v30 }
  0xc2   : > { %3328 = vmatprep.mubr.bf16.mxu1 %v3787_v31 }
  0xc3   : > { %619 = vmatmul.mubr.bf16.gmra.mrb[12].mxu0 %v3784_v28 }
  0xc4   : > { %628 = vmatprep.mubr.bf16.mxu0 %v4261_v0 }
  0xc9   : > { %3329 = vmatmul.mubr.bf16.gmra.mrb[12].mxu1 %v3788_v32 }
  0xcb   : > { %629 = vmatmul.mubr.bf16.gmra.mrb[16].mxu0 %v3785_v29 }
  0xcc   : > { %638 = vmatprep.mubr.bf16.mxu0 %v4261_v0 }
  0xd3   : > { %639 = vmatmul.mubr.bf16.gmra.mrb[20].mxu0 %v3786_v30 }
  0xd4   : > { %648 = vmatprep.mubr.bf16.mxu0 %v4261_v0 }
  0xdb   : > { %649 = vmatmul.mubr.bf16.gmra.mrb[24].mxu0 %v3787_v31 }
  0xdc   : > { %658 = vmatprep.mubr.bf16.mxu0 %v4261_v0 }
  0xe3   : > { %659 = vmatmul.mubr.bf16.gmra.mrb[28].mxu0 %v3788_v32 }
 0x17e   : > { %v590_v39 = vpop.f32.mrb[0].mxu0 }
 0x17f   : > { %v592_v41 = vpop.f32.mrb[1].mxu0  ;;  %v591_v43 = vadd.f32 %v590_v39, %v4543_v38 }
 0x180   : > { %v594_v42 = vpop.f32.mrb[2].mxu0  ;;  %v593_v46 = vadd.f32 %v592_v41, %v4546_v40 }
 0x181   : > { %v595_v44 = vadd.f32 %v594_v42, %v4543_v38  ;;  %v596_v45 = vpop.f32.mrb[3].mxu0 }
 0x182   : > { %v597_v47 = vadd.f32 %v596_v45, %v4546_v40 }
 0x183   : > { %v4552_v48 = vpack.c.bf16 %v595_v44, %v591_v43 }
 0x184   : > { %v4554_v49 = vpack.c.bf16 %v597_v47, %v593_v46 }
 0x185   : > { %3348 = vmatprep.mubr.msk.bf16.mxu0 %vm998_vm0, %v4552_v48 }
 0x186   : > { %v600_v50 = vpop.f32.mrb[4].mxu0  ;;  %854 = vrot.lane.b32.xlu0 %v4554_v49, %s4262_s19  ;;  %3636 = vmatprep.subr.msk.bf16.mxu0 %vm998_vm0, %v4554_v49  ;;  %v1024_v51 = vsel %vm998_vm0, %v4554_v49, 0 }
 0x187   : > { %v601_v52 = vadd.f32 %v600_v50, %v4543_v38  ;;  %v602_v53 = vpop.f32.mrb[5].mxu0  ;;  %3333 = vmatpush3.bf16.xpose.msra.mxu0 %v1024_v51 }
 0x188   : > { %v604_v54 = vpop.f32.mrb[6].mxu0  ;;  %v603_v57 = vadd.f32 %v602_v53, %v4546_v40 }
 0x189   : > { %v605_v55 = vadd.f32 %v604_v54, %v4543_v38  ;;  %v606_v56 = vpop.f32.mrb[7].mxu0 }
 0x18a   : > { %v607_v58 = vadd.f32 %v606_v56, %v4546_v40 }
 0x18b   : > { %v4568_v59 = vpack.c.bf16 %v605_v55, %v601_v52 }
 0x18c   : > { %v4570_v60 = vpack.c.bf16 %v607_v58, %v603_v57 }
 0x18e   : > { %v610_v61 = vpop.f32.mrb[8].mxu0  ;;  %856 = vrot.lane.b32.xlu0 %v4570_v60, %s4262_s19  ;;  %3637 = vmatprep.subr.msk.bf16.mxu0 %vm998_vm0, %v4570_v60  ;;  %v1027_v62 = vsel %vm998_vm0, %v4570_v60, 0 }
 0x18f   : > { %v611_v63 = vadd.f32 %v610_v61, %v4543_v38  ;;  %v612_v0 = vpop.f32.mrb[9].mxu0  ;;  %3335 = vmatpush3.bf16.xpose.msra.mxu0 %v1027_v62 }
 0x190   : > { %v614_v1 = vpop.f32.mrb[10].mxu0  ;;  %v613_v4 = vadd.f32 %v612_v0, %v4546_v40 }
 0x191   : > { %v615_v2 = vadd.f32 %v614_v1, %v4543_v38  ;;  %v616_v3 = vpop.f32.mrb[11].mxu0 }
 0x192   : > { %v617_v5 = vadd.f32 %v616_v3, %v4546_v40 }
 0x193   : > { %v4582_v6 = vpack.c.bf16 %v615_v2, %v611_v63 }
 0x194   : > { %v4584_v7 = vpack.c.bf16 %v617_v5, %v613_v4 }
 0x196   : > { %v620_v8 = vpop.f32.mrb[12].mxu0  ;;  %858 = vrot.lane.b32.xlu1 %v4584_v7, %s4262_s19  ;;  %3638 = vmatprep.subr.msk.bf16.mxu0 %vm998_vm0, %v4584_v7  ;;  %v1030_v9 = vsel %vm998_vm0, %v4584_v7, 0 }
 0x197   : > { %v621_v10 = vadd.f32 %v620_v8, %v4543_v38  ;;  %v622_v11 = vpop.f32.mrb[13].mxu0  ;;  %3337 = vmatpush3.bf16.xpose.msra.mxu0 %v1030_v9 }
 0x198   : > { %v624_v12 = vpop.f32.mrb[14].mxu0  ;;  %v623_v15 = vadd.f32 %v622_v11, %v4546_v40 }
 0x199   : > { %v625_v13 = vadd.f32 %v624_v12, %v4543_v38  ;;  %v626_v14 = vpop.f32.mrb[15].mxu0 }
 0x19a   : > { %v627_v16 = vadd.f32 %v626_v14, %v4546_v40 }
 0x19b   : > { %v4596_v17 = vpack.c.bf16 %v625_v13, %v621_v10 }
 0x19c   : > { %v4598_v18 = vpack.c.bf16 %v627_v16, %v623_v15 }
 0x19e   : > { %v630_v19 = vpop.f32.mrb[16].mxu0  ;;  %860 = vrot.lane.b32.xlu1 %v4598_v18, %s4262_s19  ;;  %3639 = vmatprep.subr.msk.bf16.mxu0 %vm998_vm0, %v4598_v18  ;;  %v1033_v20 = vsel %vm998_vm0, %v4598_v18, 0 }
 0x19f   : > { %v631_v21 = vadd.f32 %v630_v19, %v4543_v38  ;;  %v632_v22 = vpop.f32.mrb[17].mxu0  ;;  %3339 = vmatpush3.bf16.xpose.msra.mxu0 %v1033_v20 }
 0x1a0   : > { %v634_v23 = vpop.f32.mrb[18].mxu0  ;;  %v633_v26 = vadd.f32 %v632_v22, %v4546_v40 }
 0x1a1   : > { %v635_v24 = vadd.f32 %v634_v23, %v4543_v38  ;;  %v636_v25 = vpop.f32.mrb[19].mxu0 }
 0x1a2   : > { %v637_v27 = vadd.f32 %v636_v25, %v4546_v40 }
 0x1a3   : > { %v4610_v28 = vpack.c.bf16 %v635_v24, %v631_v21 }
 0x1a4   : > { %v4612_v29 = vpack.c.bf16 %v637_v27, %v633_v26 }
 0x1a6   : > { %v640_v30 = vpop.f32.mrb[20].mxu0  ;;  %862 = vrot.lane.b32.xlu0 %v4612_v29, %s4262_s19  ;;  %3640 = vmatprep.subr.msk.bf16.mxu0 %vm998_vm0, %v4612_v29  ;;  %v1036_v31 = vsel %vm998_vm0, %v4612_v29, 0 }
 0x1a7   : > { %v641_v32 = vadd.f32 %v640_v30, %v4543_v38  ;;  %v642_v33 = vpop.f32.mrb[21].mxu0  ;;  %3341 = vmatpush3.bf16.xpose.msra.mxu0 %v1036_v31 }
 0x1a8   : > { %v644_v35 = vpop.f32.mrb[22].mxu0  ;;  %v643_v41 = vadd.f32 %v642_v33, %v4546_v40 }
 0x1a9   : > { %v645_v37 = vadd.f32 %v644_v35, %v4543_v38  ;;  %v646_v39 = vpop.f32.mrb[23].mxu0 }
 0x1aa   : > { %v647_v42 = vadd.f32 %v646_v39, %v4546_v40 }
 0x1ab   : > { %v4624_v43 = vpack.c.bf16 %v645_v37, %v641_v32 }
 0x1ac   : > { %v4626_v44 = vpack.c.bf16 %v647_v42, %v643_v41 }
 0x1ae   : > { %v650_v45 = vpop.f32.mrb[24].mxu0  ;;  %864 = vrot.lane.b32.xlu1 %v4626_v44, %s4262_s19  ;;  %3641 = vmatprep.subr.msk.bf16.mxu0 %vm998_vm0, %v4626_v44  ;;  %v1039_v46 = vsel %vm998_vm0, %v4626_v44, 0 }
 0x1af   : > { %v651_v47 = vadd.f32 %v650_v45, %v4543_v38  ;;  %v652_v50 = vpop.f32.mrb[25].mxu0  ;;  %3343 = vmatpush3.bf16.xpose.msra.mxu0 %v1039_v46 }
 0x1b0   : > { %v654_v51 = vpop.f32.mrb[26].mxu0  ;;  %v653_v54 = vadd.f32 %v652_v50, %v4546_v40 }
 0x1b1   : > { %v655_v52 = vadd.f32 %v654_v51, %v4543_v38  ;;  %v656_v53 = vpop.f32.mrb[27].mxu0 }
 0x1b2   : > { %v657_v55 = vadd.f32 %v656_v53, %v4546_v40 }
 0x1b3   : > { %v4638_v56 = vpack.c.bf16 %v655_v52, %v651_v47 }
 0x1b4   : > { %v4640_v57 = vpack.c.bf16 %v657_v55, %v653_v54 }
 0x1b6   : > { %v660_v58 = vpop.f32.mrb[28].mxu0  ;;  %866 = vrot.lane.b32.xlu0 %v4640_v57, %s4262_s19  ;;  %3642 = vmatprep.subr.msk.bf16.mxu0 %vm998_vm0, %v4640_v57  ;;  %v1042_v61 = vsel %vm998_vm0, %v4640_v57, 0 }
 0x1b7   : > { %v661_v62 = vadd.f32 %v660_v58, %v4543_v38  ;;  %v662_v63 = vpop.f32.mrb[29].mxu0  ;;  %3345 = vmatpush3.bf16.xpose.msra.mxu0 %v1042_v61 }
 0x1b8   : > { %v663_v0 = vadd.f32 %v662_v63, %v4546_v40  ;;  %v664_v1 = vpop.f32.mrb[30].mxu0 }
 0x1b9   : > { %v665_v2 = vadd.f32 %v664_v1, %v4543_v38  ;;  %v666_v3 = vpop.f32.mrb[31].mxu0 }
 0x1ba   : > { %v667_v4 = vadd.f32 %v666_v3, %v4546_v40  ;;  %870 = vrot.lane.b32.xlu0 %v4554_v49, %s4263_s20  ;;  %v375_v40 = vsub.s32 2, %v4533_v34 }
 0x1bb   : > { %v4654_v5 = vpack.c.bf16 %v665_v2, %v661_v62 }
 0x1bc   : > { %v4656_v8 = vpack.c.bf16 %v667_v4, %v663_v0  ;;  %v376_v10 = vrot.slane %v4539_v36, %v375_v40 }
 0x1be   : > { %868 = vrot.lane.b32.xlu1 %v4656_v8, %s4262_s19  ;;  %886 = vrot.lane.b32.xlu0 %v4554_v49, %s4264_s26  ;;  %v1045_v38 = vsel %vm998_vm0, %v4656_v8, 0  ;;  %v3318_v49 = vpop.f32.mrb[0].mxu1 }
 0x1bf   : > { %3643 = vmatprep.subr.msk.bf16.mxu0 %vm998_vm0, %v4656_v8  ;;  %v703_v9 = vpop.f32.mrb[1].mxu1  ;;  %v712_v13 = vadd.f32 %v3318_v49, %v376_v10 }
 0x1c0   : > { %3347 = vmatpush3.bf16.xpose.msra.mxu0 %v1045_v38  ;;  %v3319_v11 = vpop.f32.mrb[2].mxu1  ;;  %v704_v14 = vadd.f32 %v703_v9, %v376_v10 }
 0x1c1   : > { %v706_v12 = vpop.f32.mrb[3].mxu1  ;;  %v715_v15 = vadd.f32 %v3319_v11, %v376_v10 }
 0x1c2   : > { %872 = vrot.lane.b32.xlu0 %v4570_v60, %s4263_s20  ;;  %798 = vrot.lane.b32.xlu1 %v4552_v48, %s4262_s19  ;;  %v707_v16 = vadd.f32 %v706_v12, %v376_v10  ;;  %v3322_v19 = vpop.f32.mrb[4].mxu1 }
 0x1c3   : > { %v728_v34 = vadd.f32 %v3322_v19, %v376_v10  ;;  %v719_v20 = vpop.f32.mrb[5].mxu1 }
 0x1c4   : > { %v4692_v36 = vpack.c.bf16 %v707_v16, %v704_v14  ;;  %v720_v21 = vadd.f32 %v719_v20, %v376_v10  ;;  %v3323_v22 = vpop.f32.mrb[6].mxu1 }
 0x1c5   : > { %v731_v23 = vadd.f32 %v3323_v22, %v376_v10  ;;  %v722_v24 = vpop.f32.mrb[7].mxu1 }
 0x1c6   : > { %874 = vrot.lane.b32.xlu0 %v4584_v7, %s4263_s20  ;;  %800 = vrot.lane.b32.xlu1 %v4568_v59, %s4262_s19  ;;  %v723_v25 = vadd.f32 %v722_v24, %v376_v10  ;;  %v3326_v26 = vpop.f32.mrb[8].mxu1 }
 0x1c7   : > { %3349 = vmatmul.mubr.msk.bf16.vlgmr.msra.gmra.mrb[32].mxu0 %vm998_vm0, %v4568_v59  ;;  %v744_v27 = vadd.f32 %v3326_v26, %v376_v10  ;;  %v735_v30 = vpop.f32.mrb[9].mxu1 }
 0x1c8   : > { %3352 = vmatprep.mubr.msk.bf16.mxu0 %vm998_vm0, %v4582_v6  ;;  %v4702_v31 = vpack.c.bf16 %v723_v25, %v720_v21  ;;  %v736_v32 = vadd.f32 %v735_v30, %v376_v10  ;;  %v3327_v33 = vpop.f32.mrb[10].mxu1 }
 0x1c9   : > { %v747_v35 = vadd.f32 %v3327_v33, %v376_v10  ;;  %v738_v37 = vpop.f32.mrb[11].mxu1 }
 0x1ca   : > { %876 = vrot.lane.b32.xlu0 %v4598_v18, %s4263_s20  ;;  %888 = vrot.lane.b32.xlu1 %v4570_v60, %s4264_s26  ;;  %v4690_v60 = vpack.c.bf16 %v715_v15, %v712_v13  ;;  %v739_v39 = vadd.f32 %v738_v37, %v376_v10  ;;  %v3330_v41 = vpop.f32.mrb[12].mxu1 }
 0x1cb   : > { %v4708_v42 = vpack.c.bf16 %v747_v35, %v744_v27  ;;  %v751_v45 = vpop.f32.mrb[13].mxu1 }
 0x1cc   : > { %v4712_v46 = vpack.c.bf16 %v739_v39, %v736_v32  ;;  %v752_v47 = vadd.f32 %v751_v45, %v376_v10  ;;  %v3331_v50 = vpop.f32.mrb[14].mxu1 }
 0x1cd   : > { %v763_v51 = vadd.f32 %v3331_v50, %v376_v10  ;;  %v754_v52 = vpop.f32.mrb[15].mxu1 }
 0x1ce   : > { %878 = vrot.lane.b32.xlu0 %v4612_v29, %s4263_s20  ;;  %890 = vrot.lane.b32.xlu1 %v4584_v7, %s4264_s26  ;;  %v4700_v7 = vpack.c.bf16 %v731_v23, %v728_v34  ;;  %v755_v53 = vadd.f32 %v754_v52, %v376_v10 }
 0x1cf   : > { %3353 = vmatmul.mubr.msk.bf16.gmra.mrb[36].mxu0 %vm998_vm0, %v4596_v17 }
 0x1d0   : > { %3356 = vmatprep.mubr.msk.bf16.mxu0 %vm998_vm0, %v4610_v28  ;;  %v4722_v54 = vpack.c.bf16 %v755_v53, %v752_v47 }
 0x1d2   : > { %802 = vrot.lane.b32.xlu0 %v4582_v6, %s4262_s19  ;;  %892 = vrot.lane.b32.xlu1 %v4598_v18, %s4264_s26  ;;  %v760_v18 = vadd.f32 %v3330_v41, %v376_v10 }
 0x1d6   : > { %804 = vrot.lane.b32.xlu0 %v4596_v17, %s4262_s19  ;;  %894 = vrot.lane.b32.xlu1 %v4612_v29, %s4264_s26  ;;  %v4720_v29 = vpack.c.bf16 %v763_v51, %v760_v18 }
 0x1d7   : > { %3357 = vmatmul.mubr.msk.bf16.gmra.mrb[40].mxu0 %vm998_vm0, %v4624_v43 }
 0x1d8   : > { %3360 = vmatprep.mubr.msk.bf16.mxu0 %vm998_vm0, %v4638_v56  ;;  %6079 = vst [vmem:[#allocation15_spill] sm:$0xff] %v4720_v29 }
 0x1da   : > { %806 = vrot.lane.b32.xlu0 %v4610_v28, %s4262_s19  ;;  %880 = vrot.lane.b32.xlu1 %v4626_v44, %s4263_s20 }
 0x1de   : > { %808 = vrot.lane.b32.xlu0 %v4624_v43, %s4262_s19  ;;  %896 = vrot.lane.b32.xlu1 %v4626_v44, %s4264_s26 }
 0x1df   : > { %3361 = vmatmul.mubr.msk.bf16.gmra.mrb[44].mxu0 %vm998_vm0, %v4654_v5 }
 0x1e2   : > { %810 = vrot.lane.b32.xlu0 %v4638_v56, %s4262_s19  ;;  %882 = vrot.lane.b32.xlu1 %v4640_v57, %s4263_s20 }
 0x1e6   : > { %812 = vrot.lane.b32.xlu0 %v4654_v5, %s4262_s19  ;;  %898 = vrot.lane.b32.xlu1 %v4640_v57, %s4264_s26 }
 0x1ea   : > { %814 = vrot.lane.b32.xlu0 %v4552_v48, %s4263_s20  ;;  %884 = vrot.lane.b32.xlu1 %v4656_v8, %s4263_s20 }
 0x1ee   : > { %830 = vrot.lane.b32.xlu0 %v4552_v48, %s4264_s26  ;;  %900 = vrot.lane.b32.xlu1 %v4656_v8, %s4264_s26 }
 0x1f2   : > { %818 = vrot.lane.b32.xlu0 %v4582_v6, %s4263_s20  ;;  %816 = vrot.lane.b32.xlu1 %v4568_v59, %s4263_s20 }
 0x1f6   : > { %834 = vrot.lane.b32.xlu0 %v4582_v6, %s4264_s26  ;;  %832 = vrot.lane.b32.xlu1 %v4568_v59, %s4264_s26 }
 0x1f8   : > { %v855_v44 = vpop.permute.xlu0 %854 }
 0x1f9   : > { %3644 = vmatprep.subr.msk.bf16.mxu1 %vm998_vm0, %v855_v44  ;;  %v1169_v48 = vsel %vm998_vm0, %v855_v44, 0 }
 0x1fa   : > { %3365 = vmatpush3.bf16.xpose.msra.mxu1 %v1169_v48  ;;  %822 = vrot.lane.b32.xlu0 %v4610_v28, %s4263_s20 }
 0x1fb   : > { %820 = vrot.lane.b32.xlu1 %v4596_v17, %s4263_s20 }
 0x1fe   : > { %838 = vrot.lane.b32.xlu0 %v4610_v28, %s4264_s26 }
 0x1ff   : > { %836 = vrot.lane.b32.xlu1 %v4596_v17, %s4264_s26 }
 0x200   : > { %v857_v6 = vpop.permute.xlu0 %856 }
 0x201   : > { %3645 = vmatprep.subr.msk.bf16.mxu1 %vm998_vm0, %v857_v6  ;;  %v1172_v59 = vsel %vm998_vm0, %v857_v6, 0 }
 0x202   : > { %3367 = vmatpush3.bf16.xpose.msra.mxu1 %v1172_v59  ;;  %826 = vrot.lane.b32.xlu0 %v4638_v56, %s4263_s20 }
 0x203   : > { %824 = vrot.lane.b32.xlu1 %v4624_v43, %s4263_s20 }
 0x206   : > { %842 = vrot.lane.b32.xlu0 %v4638_v56, %s4264_s26 }
 0x207   : > { %840 = vrot.lane.b32.xlu1 %v4624_v43, %s4264_s26 }
 0x208   : > { %v859_v28 = vpop.permute.xlu1 %858 }
 0x209   : > { %3646 = vmatprep.subr.msk.bf16.mxu1 %vm998_vm0, %v859_v28  ;;  %v1175_v17 = vsel %vm998_vm0, %v859_v28, 0 }
 0x20a   : > { %3369 = vmatpush3.bf16.xpose.msra.mxu1 %v1175_v17  ;;  %910 = vrot.lane.b32.xlu0 %v4692_v36, %s4262_s19 }
 0x20b   : > { %828 = vrot.lane.b32.xlu1 %v4654_v5, %s4263_s20 }
 0x20e   : > { %914 = vrot.lane.b32.xlu0 %v4702_v31, %s4262_s19 }
 0x20f   : > { %844 = vrot.lane.b32.xlu1 %v4654_v5, %s4264_s26 }
 0x210   : > { %v861_v55 = vpop.permute.xlu1 %860 }
 0x211   : > { %3647 = vmatprep.subr.msk.bf16.mxu1 %vm998_vm0, %v861_v55  ;;  %v1178_v43 = vsel %vm998_vm0, %v861_v55, 0 }
 0x212   : > { %3371 = vmatpush3.bf16.xpose.msra.mxu1 %v1178_v43  ;;  %920 = vrot.lane.b32.xlu0 %v4708_v42, %s4262_s19 }
 0x213   : > { %912 = vrot.lane.b32.xlu1 %v4690_v60, %s4262_s19 }
 0x216   : > { %922 = vrot.lane.b32.xlu0 %v4722_v54, %s4262_s19 }
 0x217   : > { %916 = vrot.lane.b32.xlu1 %v4700_v7, %s4262_s19 }
 0x218   : > { %v863_v56 = vpop.permute.xlu0 %862 }
 0x219   : > { %3648 = vmatprep.subr.msk.bf16.mxu1 %vm998_vm0, %v863_v56  ;;  %v1181_v57 = vsel %vm998_vm0, %v863_v56, 0 }
 0x21a   : > { %3373 = vmatpush3.bf16.xpose.msra.mxu1 %v1181_v57  ;;  %934 = vrot.lane.b32.xlu0 %v4692_v36, %s4263_s20 }
 0x21b   : > { %918 = vrot.lane.b32.xlu1 %v4712_v46, %s4262_s19 }
 0x21e   : > { %936 = vrot.lane.b32.xlu0 %v4690_v60, %s4263_s20 }
 0x21f   : > { %924 = vrot.lane.b32.xlu1 %v4720_v29, %s4262_s19 }
 0x220   : > { %v865_v58 = vpop.permute.xlu1 %864 }
 0x221   : > { %3649 = vmatprep.subr.msk.bf16.mxu1 %vm998_vm0, %v865_v58  ;;  %v1184_v61 = vsel %vm998_vm0, %v865_v58, 0 }
 0x222   : > { %3375 = vmatpush3.bf16.xpose.msra.mxu1 %v1184_v61  ;;  %938 = vrot.lane.b32.xlu0 %v4702_v31, %s4263_s20 }
 0x223   : > { %958 = vrot.lane.b32.xlu1 %v4692_v36, %s4264_s26 }
 0x226   : > { %962 = vrot.lane.b32.xlu0 %v4702_v31, %s4264_s26 }
 0x227   : > { %960 = vrot.lane.b32.xlu1 %v4690_v60, %s4264_s26 }
 0x228   : > { %v867_v62 = vpop.permute.xlu0 %866 }
 0x229   : > { %3650 = vmatprep.subr.msk.bf16.mxu1 %vm998_vm0, %v867_v62  ;;  %v1187_v63 = vsel %vm998_vm0, %v867_v62, 0 }
 0x22a   : > { %3377 = vmatpush3.bf16.xpose.msra.mxu1 %v1187_v63  ;;  %964 = vrot.lane.b32.xlu0 %v4700_v7, %s4264_s26 }
 0x22b   : > { %940 = vrot.lane.b32.xlu1 %v4700_v7, %s4263_s20 }
 0x22c   : > { %v871_v0 = vpop.permute.xlu0 %870 }
 0x22d   : > { %3652 = vmatprep.subr.msk.bf16.mxu0 %vm998_vm0, %v871_v0  ;;  %v1314_v1 = vsel %vm998_vm0, %v871_v0, 0 }
 0x22e   : > { %3397 = vmatpush3.bf16.xpose.msra.mxu0 %v1314_v1  ;;  %944 = vrot.lane.b32.xlu0 %v4708_v42, %s4263_s20 }
 0x22f   : > { %942 = vrot.lane.b32.xlu1 %v4712_v46, %s4263_s20 }
 0x230   : > { %v869_v2 = vpop.permute.xlu1 %868  ;;  %v887_v3 = vpop.permute.xlu0 %886 }
 0x231   : > { %3651 = vmatprep.subr.msk.bf16.mxu1 %vm998_vm0, %v869_v2  ;;  %v1190_v4 = vsel %vm998_vm0, %v869_v2, 0  ;;  %v1459_v9 = vsel %vm998_vm0, %v887_v3, 0 }
 0x232   : > { %3379 = vmatpush3.bf16.xpose.msra.mxu1 %v1190_v4  ;;  %946 = vrot.lane.b32.xlu0 %v4722_v54, %s4263_s20  ;;  %v4911_v4 = vld [vmem:[#allocation8] sm:$0xff] }
 0x233   : > { %3660 = vmatprep.subr.msk.bf16.mxu1 %vm998_vm0, %v887_v3  ;;  %966 = vrot.lane.b32.xlu1 %v4712_v46, %s4264_s26  ;;  %v4909_v3 = vld [vmem:[#allocation8 + $0x10] sm:$0xff] }
 0x234   : > { %v873_v5 = vpop.permute.xlu0 %872  ;;  %v799_v8 = vpop.permute.xlu1 %798 }
 0x235   : > { %3380 = vmatprep.mubr.msk.bf16.mxu1 %vm998_vm0, %v799_v8  ;;  %3653 = vmatprep.subr.msk.bf16.mxu0 %vm998_vm0, %v873_v5  ;;  %v1317_v38 = vsel %vm998_vm0, %v873_v5, 0 }
 0x236   : > { %3399 = vmatpush3.bf16.xpose.msra.mxu0 %v1317_v38  ;;  %970 = vrot.lane.b32.xlu0 %v4722_v54, %s4264_s26 }
 0x237   : > { %968 = vrot.lane.b32.xlu1 %v4708_v42, %s4264_s26 }
 0x238   : > { %v875_v40 = vpop.permute.xlu0 %874  ;;  %v801_v49 = vpop.permute.xlu1 %800 }
 0x239   : > { %3381 = vmatmul.mubr.msk.bf16.vlgmr.msra.gmra.mrb[16].mxu1 %vm998_vm0, %v801_v49  ;;  %3654 = vmatprep.subr.msk.bf16.mxu0 %vm998_vm0, %v875_v40  ;;  %v1320_v12 = vsel %vm998_vm0, %v875_v40, 0 }
 0x23a   : > { %3429 = vmatpush3.bf16.xpose.msra.mxu1 %v1459_v9  ;;  %v4919_v9 = vld [vmem:[#allocation8 + $0x18] sm:$0xff] }
 0x23c   : > { %v877_v10 = vpop.permute.xlu0 %876  ;;  %v889_v11 = vpop.permute.xlu1 %888 }
 0x23d   : > { %3661 = vmatprep.subr.msk.bf16.mxu1 %vm998_vm0, %v889_v11  ;;  %v1462_v15 = vsel %vm998_vm0, %v889_v11, 0  ;;  %v1323_v34 = vsel %vm998_vm0, %v877_v10, 0 }
 0x23e   : > { %3401 = vmatpush3.bf16.xpose.msra.mxu0 %v1320_v12 }
 0x23f   : > { %3655 = vmatprep.subr.msk.bf16.mxu0 %vm998_vm0, %v877_v10 }
 0x240   : > { %v879_v13 = vpop.permute.xlu0 %878  ;;  %v891_v14 = vpop.permute.xlu1 %890 }
 0x241   : > { %v1465_v22 = vsel %vm998_vm0, %v891_v14, 0  ;;  %v1326_v25 = vsel %vm998_vm0, %v879_v13, 0 }
 0x242   : > { %3431 = vmatpush3.bf16.xpose.msra.mxu1 %v1462_v15 }
 0x243   : > { %3662 = vmatprep.subr.msk.bf16.mxu1 %vm998_vm0, %v891_v14  ;;  %v4928_v14 = vld [vmem:[#allocation8 + $0x8] sm:$0xff] }
 0x244   : > { %v803_v16 = vpop.permute.xlu0 %802  ;;  %v893_v19 = vpop.permute.xlu1 %892 }
 0x245   : > { %3384 = vmatprep.mubr.msk.bf16.mxu1 %vm998_vm0, %v803_v16  ;;  %v1468_v30 = vsel %vm998_vm0, %v893_v19, 0  ;;  %v4932_v16 = vld [vmem:[#allocation8 + $0x38] sm:$0xff] }
 0x246   : > { %3403 = vmatpush3.bf16.xpose.msra.mxu0 %v1323_v34 }
 0x247   : > { %3656 = vmatprep.subr.msk.bf16.mxu0 %vm998_vm0, %v879_v13 }
 0x248   : > { %v805_v20 = vpop.permute.xlu0 %804  ;;  %v895_v21 = vpop.permute.xlu1 %894 }
 0x249   : > { %3385 = vmatmul.mubr.msk.bf16.gmra.mrb[20].mxu1 %vm998_vm0, %v805_v20  ;;  %v1471_v41 = vsel %vm998_vm0, %v895_v21, 0  ;;  %v4937_v20 = vld [vmem:[#allocation8 + $0x30] sm:$0xff] }
 0x24a   : > { %3433 = vmatpush3.bf16.xpose.msra.mxu1 %v1465_v22 }
 0x24b   : > { %3663 = vmatprep.subr.msk.bf16.mxu1 %vm998_vm0, %v893_v19 }
 0x24c   : > { %v807_v23 = vpop.permute.xlu0 %806  ;;  %v881_v24 = vpop.permute.xlu1 %880 }
 0x24d   : > { %3388 = vmatprep.mubr.msk.bf16.mxu1 %vm998_vm0, %v807_v23  ;;  %v1329_v35 = vsel %vm998_vm0, %v881_v24, 0 }
 0x24e   : > { %3405 = vmatpush3.bf16.xpose.msra.mxu0 %v1326_v25 }
 0x24f   : > { %3657 = vmatprep.subr.msk.bf16.mxu0 %vm998_vm0, %v881_v24  ;;  %v4943_v24 = vld [vmem:[#allocation8 + $0x28] sm:$0xff] }
 0x250   : > { %v809_v26 = vpop.permute.xlu0 %808  ;;  %v897_v27 = vpop.permute.xlu1 %896 }
 0x251   : > { %3389 = vmatmul.mubr.msk.bf16.gmra.mrb[24].mxu1 %vm998_vm0, %v809_v26  ;;  %v1474_v52 = vsel %vm998_vm0, %v897_v27, 0  ;;  %v4949_v26 = vld [vmem:[#allocation8 + $0x20] sm:$0xff] }
 0x252   : > { %3435 = vmatpush3.bf16.xpose.msra.mxu1 %v1468_v30  ;;  %v4955_v30 = vld [vmem:[#allocation8 + $0x50] sm:$0xff] }
 0x253   : > { %3664 = vmatprep.subr.msk.bf16.mxu1 %vm998_vm0, %v895_v21 }
 0x254   : > { %v811_v32 = vpop.permute.xlu0 %810  ;;  %v883_v33 = vpop.permute.xlu1 %882 }
 0x255   : > { %3392 = vmatprep.mubr.msk.bf16.mxu1 %vm998_vm0, %v811_v32  ;;  %v1332_v47 = vsel %vm998_vm0, %v883_v33, 0 }
 0x256   : > { %3407 = vmatpush3.bf16.xpose.msra.mxu0 %v1329_v35 }
 0x257   : > { %3658 = vmatprep.subr.msk.bf16.mxu0 %vm998_vm0, %v883_v33 }
 0x258   : > { %v813_v37 = vpop.permute.xlu0 %812  ;;  %v899_v39 = vpop.permute.xlu1 %898 }
 0x259   : > { %3393 = vmatmul.mubr.msk.bf16.gmra.mrb[28].mxu1 %vm998_vm0, %v813_v37  ;;  %v1477_v28 = vsel %vm998_vm0, %v899_v39, 0  ;;  %v4961_v37 = vld [vmem:[#allocation8 + $0x58] sm:$0xff] }
 0x25a   : > { %3437 = vmatpush3.bf16.xpose.msra.mxu1 %v1471_v41 }
 0x25b   : > { %3665 = vmatprep.subr.msk.bf16.mxu1 %vm998_vm0, %v897_v27 }
 0x25c   : > { %v815_v18 = vpop.permute.xlu0 %814  ;;  %v885_v45 = vpop.permute.xlu1 %884 }
 0x25d   : > { %3412 = vmatprep.mubr.msk.bf16.mxu0 %vm998_vm0, %v815_v18  ;;  %v1335_v48 = vsel %vm998_vm0, %v885_v45, 0 }
 0x25e   : > { %3409 = vmatpush3.bf16.xpose.msra.mxu0 %v1332_v47 }
 0x25f   : > { %3659 = vmatprep.subr.msk.bf16.mxu0 %vm998_vm0, %v885_v45  ;;  %v4967_v45 = vld [vmem:[#allocation8 + $0x40] sm:$0xff] }
 0x260   : > { %v831_v50 = vpop.permute.xlu0 %830  ;;  %v901_v51 = vpop.permute.xlu1 %900 }
 0x261   : > { %3444 = vmatprep.mubr.msk.bf16.mxu1 %vm998_vm0, %v831_v50  ;;  %v1480_v57 = vsel %vm998_vm0, %v901_v51, 0  ;;  %v4973_v50 = vld [vmem:[#allocation8 + $0x70] sm:$0xff] }
 0x262   : > { %3439 = vmatpush3.bf16.xpose.msra.mxu1 %v1474_v52  ;;  %v4979_v52 = vld [vmem:[#allocation8 + $0x48] sm:$0xff] }
 0x263   : > { %3666 = vmatprep.subr.msk.bf16.mxu1 %vm998_vm0, %v899_v39 }
 0x264   : > { %v819_v53 = vpop.permute.xlu0 %818  ;;  %v817_v44 = vpop.permute.xlu1 %816 }
 0x266   : > { %3411 = vmatpush3.bf16.xpose.msra.mxu0 %v1335_v48 }
 0x267   : > { %3460 = vmatprep.subr.bf16.mxu0 %v4692_v36 }
 0x268   : > { %v835_v6 = vpop.permute.xlu0 %834  ;;  %v833_v59 = vpop.permute.xlu1 %832 }
 0x26a   : > { %3441 = vmatpush3.bf16.xpose.msra.mxu1 %v1477_v28 }
 0x26b   : > { %3667 = vmatprep.subr.msk.bf16.mxu1 %vm998_vm0, %v901_v51 }
 0x26c   : > { %v823_v17 = vpop.permute.xlu0 %822 }
 0x26d   : > { %v821_v55 = vpop.permute.xlu1 %820  ;;  %3413 = vmatmul.mubr.msk.bf16.vlgmr.msra.gmra.mrb[48].mxu0 %vm998_vm0, %v817_v44 }
 0x26e   : > { %3416 = vmatprep.mubr.msk.bf16.mxu0 %vm998_vm0, %v819_v53  ;;  %3461 = vmatpush3.bf16.msra.mxu0 %v4692_v36 }
 0x26f   : > { %3462 = vmatprep.subr.bf16.mxu0 %v4690_v60 }
 0x270   : > { %v839_v43 = vpop.permute.xlu0 %838 }
 0x271   : > { %v837_v56 = vpop.permute.xlu1 %836 }
 0x272   : > { %3443 = vmatpush3.bf16.xpose.msra.mxu1 %v1480_v57  ;;  %3463 = vmatpush3.bf16.msra.mxu0 %v4690_v60 }
 0x273   : > { %3464 = vmatprep.subr.bf16.mxu0 %v4702_v31 }
 0x274   : > { %v827_v58 = vpop.permute.xlu0 %826 }
 0x275   : > { %v825_v61 = vpop.permute.xlu1 %824  ;;  %3417 = vmatmul.mubr.msk.bf16.gmra.mrb[52].mxu0 %vm998_vm0, %v821_v55  ;;  %v4991_v55 = vld [vmem:[#allocation8 + $0x78] sm:$0xff] }
 0x276   : > { %3420 = vmatprep.mubr.msk.bf16.mxu0 %vm998_vm0, %v823_v17  ;;  %3465 = vmatpush3.bf16.msra.mxu0 %v4702_v31 }
 0x277   : > { %3466 = vmatprep.subr.bf16.mxu0 %v4700_v7 }
 0x278   : > { %v843_v36 = vpop.permute.xlu0 %842 }
 0x279   : > { %v841_v62 = vpop.permute.xlu1 %840  ;;  %3445 = vmatmul.mubr.msk.bf16.vlgmr.msra.gmra.mrb[32].mxu1 %vm998_vm0, %v833_v59 }
 0x27a   : > { %3448 = vmatprep.mubr.msk.bf16.mxu1 %vm998_vm0, %v835_v6  ;;  %3467 = vmatpush3.bf16.msra.mxu0 %v4700_v7  ;;  %v4985_v6 = vld [vmem:[#allocation8 + $0x60] sm:$0xff] }
 0x27b   : > { %3468 = vmatprep.subr.bf16.mxu0 %v4712_v46 }
 0x27c   : > { %v911_v60 = vpop.permute.xlu0 %910 }
 0x27d   : > { %v829_v63 = vpop.permute.xlu1 %828  ;;  %3421 = vmatmul.mubr.msk.bf16.gmra.mrb[56].mxu0 %vm998_vm0, %v825_v61  ;;  %3492 = vmatprep.subr.bf16.mxu1 %v911_v60 }
 0x27e   : > { %3424 = vmatprep.mubr.msk.bf16.mxu0 %vm998_vm0, %v827_v58  ;;  %3469 = vmatpush3.bf16.msra.mxu0 %v4712_v46 }
 0x27f   : > { %3470 = vmatprep.subr.bf16.mxu0 %v4708_v42  ;;  %3493 = vmatpush3.bf16.msra.mxu1 %v911_v60 }
 0x280   : > { %v915_v31 = vpop.permute.xlu0 %914 }
 0x281   : > { %v845_v0 = vpop.permute.xlu1 %844  ;;  %3449 = vmatmul.mubr.msk.bf16.gmra.mrb[36].mxu1 %vm998_vm0, %v837_v56  ;;  %v4997_v56 = vld [vmem:[#allocation8 + $0x68] sm:$0xff] }
 0x282   : > { %3452 = vmatprep.mubr.msk.bf16.mxu1 %vm998_vm0, %v839_v43  ;;  %3471 = vmatpush3.bf16.msra.mxu0 %v4708_v42  ;;  %6081 = vst [vmem:[#allocation17_spill] sm:$0xff] %v4997_v56 }
 0x283   : > { %3472 = vmatprep.subr.bf16.mxu0 %v4722_v54 }
 0x284   : > { %v921_v7 = vpop.permute.xlu0 %920 }
 0x285   : > { %3425 = vmatmul.mubr.msk.bf16.gmra.mrb[60].mxu0 %vm998_vm0, %v829_v63  ;;  %v913_v1 = vpop.permute.xlu1 %912 }
 0x286   : > { %3473 = vmatpush3.bf16.msra.mxu0 %v4722_v54  ;;  %3494 = vmatprep.subr.bf16.mxu1 %v913_v1 }
 0x287   : > { %3474 = vmatprep.subr.bf16.mxu0 %v4720_v29  ;;  %3495 = vmatpush3.bf16.msra.mxu1 %v913_v1 }
 0x288   : > { %v923_v46 = vpop.permute.xlu0 %922  ;;  %3496 = vmatprep.subr.bf16.mxu1 %v915_v31 }
 0x289   : > { %3453 = vmatmul.mubr.msk.bf16.gmra.mrb[40].mxu1 %vm998_vm0, %v841_v62  ;;  %v917_v2 = vpop.permute.xlu1 %916 }
 0x28a   : > { %3456 = vmatprep.mubr.msk.bf16.mxu1 %vm998_vm0, %v843_v36  ;;  %3475 = vmatpush3.bf16.msra.mxu0 %v4720_v29 }
 0x28b   : > { %3497 = vmatpush3.bf16.msra.mxu1 %v915_v31 }
 0x28c   : > { %v4905_v42 = vpop.permute.xlu0 %934  ;;  %3498 = vmatprep.subr.bf16.mxu1 %v917_v2 }
 0x28d   : > { %3524 = vmatprep.subr.bf16.mxu0 %v4905_v42  ;;  %v919_v54 = vpop.permute.xlu1 %918 }
 0x28f   : > { %3499 = vmatpush3.bf16.msra.mxu1 %v917_v2 }
 0x290   : > { %3500 = vmatprep.subr.bf16.mxu1 %v919_v54  ;;  %v5008_v61 = vpop.permute.xlu0 %936 }
 0x291   : > { %3457 = vmatmul.mubr.msk.bf16.gmra.mrb[44].mxu1 %vm998_vm0, %v845_v0  ;;  %v925_v5 = vpop.permute.xlu1 %924 }
 0x293   : > { %3501 = vmatpush3.bf16.msra.mxu1 %v919_v54 }
 0x294   : > { %3502 = vmatprep.subr.bf16.mxu1 %v921_v7  ;;  %v5010_v36 = vpop.permute.xlu0 %938 }
 0x295   : > { %v4926_v13 = vpop.permute.xlu1 %958 }
 0x296   : > { %6080 = vst [vmem:[#allocation16_spill] sm:$0xff] %v4926_v13 }
 0x297   : > { %3503 = vmatpush3.bf16.msra.mxu1 %v921_v7 }
 0x298   : > { %3504 = vmatprep.subr.bf16.mxu1 %v923_v46  ;;  %v5017_v0 = vpop.permute.xlu0 %962 }
 0x299   : > { %v5012_v60 = vpop.permute.xlu1 %960  ;;  %6084 = vst [vmem:[#allocation20_spill] sm:$0xff] %v5017_v0 }
 0x29a   : > { %v3350_v8 = vpop.f32.mrb[32].mxu0  ;;  %6082 = vst [vmem:[#allocation18_spill] sm:$0xff] %v5012_v60 }
 0x29b   : > { %v4914_v38 = vadd.f32 %v3350_v8, %v4909_v3  ;;  %v1081_v40 = vpop.f32.mrb[33].mxu0  ;;  %3505 = vmatpush3.bf16.msra.mxu1 %v923_v46 }
 0x29c   : > { %v4917_v49 = vadd.f32 %v1081_v40, %v4911_v4  ;;  %v3351_v10 = vpop.f32.mrb[34].mxu0  ;;  %3506 = vmatprep.subr.bf16.mxu1 %v925_v5  ;;  %v5030_v54 = vpop.permute.xlu0 %964 }
 0x29d   : > { %1583 = vmax.xlane.f32.xlu1 %v4914_v38  ;;  %v1084_v11 = vpop.f32.mrb[35].mxu0  ;;  %v4924_v12 = vadd.f32 %v3351_v10, %v4919_v9  ;;  %v5027_v2 = vpop.permute.xlu1 %940  ;;  %6086 = vst [vmem:[#allocation22_spill] sm:$0xff] %v5030_v54 }
 0x29e   : > { %1579 = vmax.xlane.f32.xlu0 %v4917_v49  ;;  %v4935_v19 = vadd.f32 %v1084_v11, %v4928_v14 }
 0x29f   : > { %3507 = vmatpush3.bf16.msra.mxu1 %v925_v5 }
 0x2a0   : > { %3556 = vmatprep.subr.bf16.mxu1 %v4926_v13  ;;  %v5034_v8 = vpop.permute.xlu0 %944 }
 0x2a1   : > { %1585 = vmax.xlane.f32.xlu1 %v4924_v12  ;;  %v5032_v5 = vpop.permute.xlu1 %942 }
 0x2a2   : > { %v3354_v15 = vpop.f32.mrb[36].mxu0 }
 0x2a3   : > { %v1097_v34 = vpop.f32.mrb[37].mxu0  ;;  %v4946_v25 = vadd.f32 %v3354_v15, %v4937_v20 }
 0x2a4   : > { %v3355_v21 = vpop.f32.mrb[38].mxu0  ;;  %v4958_v33 = vadd.f32 %v1097_v34, %v4949_v26 }
 0x2a5   : > { %v4940_v22 = vadd.f32 %v3355_v21, %v4932_v16  ;;  %v1100_v23 = vpop.f32.mrb[39].mxu0  ;;  %1581 = vmax.xlane.f32.xlu1 %v4935_v19  ;;  %v5042_v15 = vpop.permute.xlu1 %966 }
 0x2a6   : > { %v4952_v27 = vadd.f32 %v1100_v23, %v4943_v24  ;;  %6087 = vst [vmem:[#allocation23_spill] sm:$0xff] %v5042_v15  ;;  %v5046_v21 = vpop.permute.xlu0 %946 }
 0x2a7   : > { %1593 = vmax.xlane.f32.xlu0 %v4940_v22 }
 0x2a9   : > { %1591 = vmax.xlane.f32.xlu1 %v4946_v25 }
 0x2aa   : > { %v3358_v32 = vpop.f32.mrb[40].mxu0 }
 0x2ab   : > { %v1113_v35 = vpop.f32.mrb[41].mxu0  ;;  %1589 = vmax.xlane.f32.xlu0 %v4952_v27  ;;  %v4964_v41 = vadd.f32 %v3358_v32, %v4955_v30  ;;  %v5050_v32 = vpop.permute.xlu1 %968 }
 0x2ac   : > { %v3359_v39 = vpop.f32.mrb[42].mxu0  ;;  %v4976_v51 = vadd.f32 %v1113_v35, %v4967_v45  ;;  %6088 = vst [vmem:[#allocation24_spill] sm:$0xff] %v5050_v32 }
 0x2ad   : > { %v1116_v18 = vpop.f32.mrb[43].mxu0  ;;  %1587 = vmax.xlane.f32.xlu1 %v4958_v33  ;;  %v4970_v47 = vadd.f32 %v3359_v39, %v4961_v37  ;;  %v5054_v39 = vpop.permute.xlu0 %970 }
 0x2ae   : > { %v4988_v28 = vadd.f32 %v1116_v18, %v4979_v52  ;;  %6089 = vst [vmem:[#allocation25_spill] sm:$0xff] %v5054_v39 }
 0x2af   : > { %1599 = vmax.xlane.f32.xlu0 %v4964_v41 }
 0x2b1   : > { %1601 = vmax.xlane.f32.xlu1 %v4970_v47 }
 0x2b2   : > { %v3362_v53 = vpop.f32.mrb[44].mxu0 }
 0x2b3   : > { %v4982_v44 = vadd.f32 %v3362_v53, %v4973_v50  ;;  %v1129_v48 = vpop.f32.mrb[45].mxu0  ;;  %1595 = vmax.xlane.f32.xlu0 %v4976_v51 }
 0x2b4   : > { %v3363_v59 = vpop.f32.mrb[46].mxu0  ;;  %v4994_v43 = vadd.f32 %v1129_v48, %v4985_v6 }
 0x2b5   : > { %v1132_v17 = vpop.f32.mrb[47].mxu0  ;;  %1607 = vmax.xlane.f32.xlu1 %v4982_v44  ;;  %v5000_v57 = vadd.f32 %v3363_v59, %v4991_v55 }
 0x2b6   : > { %v5004_v58 = vadd.f32 %v1132_v17, %v4997_v56 }
 0x2b7   : > { %1597 = vmax.xlane.f32.xlu0 %v4988_v28 }
 0x2b9   : > { %1603 = vmax.xlane.f32.xlu1 %v4994_v43 }
 0x2bb   : > { %1609 = vmax.xlane.f32.xlu0 %v5000_v57 }
 0x2bd   : > { %1605 = vmax.xlane.f32.xlu1 %v5004_v58 }
 0x30c   : > { %v3382_v62 = vpop.f32.mrb[16].mxu1 }
 0x30d   : > { %v5015_v63 = vadd.f32 %v3382_v62, %v4909_v3  ;;  %v1226_v31 = vpop.f32.mrb[17].mxu1 }
 0x30e   : > { %v5019_v7 = vpop.f32.mrb[18].mxu1  ;;  %v5025_v46 = vadd.f32 %v1226_v31, %v4911_v4 }
 0x30f   : > { %6083 = vst [vmem:[#allocation19_spill] sm:$0xff] %v5015_v63  ;;  %v5021_v1 = vpop.f32.mrb[19].mxu1  ;;  %1615 = vmax.xlane.f32.xlu1 %v5015_v63 }
 0x310   : > { %6085 = vst [vmem:[#allocation21_spill] sm:$0xff] %v5025_v46 }
 0x313   : > { %1611 = vmax.xlane.f32.xlu1 %v5025_v46 }
 0x31c   : > { %v5036_v40 = vpop.f32.mrb[20].mxu1 }
 0x31d   : > { %v5038_v10 = vpop.f32.mrb[21].mxu1 }
 0x31e   : > { %v5040_v11 = vpop.f32.mrb[22].mxu1 }
 0x31f   : > { %v5044_v34 = vpop.f32.mrb[23].mxu1 }
 0x324   : > { %v5048_v23 = vpop.f32.mrb[24].mxu1 }
 0x325   : > { %v5052_v35 = vpop.f32.mrb[25].mxu1 }
 0x326   : > { %v5056_v18 = vpop.f32.mrb[26].mxu1 }
 0x327   : > { %v5058_v53 = vpop.f32.mrb[27].mxu1 }
 0x32a   : > { %v1584_v48 = vpop.xlane.xlu1 %1583 }
 0x32b   : > { %v1580_v59 = vpop.xlane.xlu0 %1579  ;;  %v1709_v39 = vsub.f32 %v4914_v38, %v1584_v48 }
 0x32c   : > { %v5060_v17 = vpop.f32.mrb[28].mxu1  ;;  %v1707_v62 = vsub.f32 %v4917_v49, %v1580_v59 }
 0x32d   : > { %v5063_v31 = vpop.f32.mrb[29].mxu1  ;;  %v1775_v29 = vmul.f32 1.442695, %v1709_v39 }
 0x32e   : > { %v1586_v15 = vpop.xlane.xlu1 %1585  ;;  %v5065_v54 = vpop.f32.mrb[30].mxu1  ;;  %v1771_v60 = vmul.f32 1.442695, %v1707_v62 }
 0x32f   : > { %6090 = vst [vmem:[#allocation26_spill] sm:$0xff] %v5065_v54  ;;  %v1710_v32 = vsub.f32 %v4924_v12, %v1586_v15  ;;  %v5068_v0 = vpop.f32.mrb[31].mxu1 }
 0x330   : > { %6091 = vst [vmem:[#allocation27_spill] sm:$0xff] %v5068_v0  ;;  %3805 = vpow2.f32 %v1771_v60 }
 0x331   : > { %v1777_v13 = vmul.f32 1.442695, %v1710_v32 }
 0x332   : > { %v1582_v63 = vpop.xlane.xlu1 %1581 }
 0x333   : > { %v1708_v46 = vsub.f32 %v4935_v19, %v1582_v63  ;;  %3807 = vpow2.f32 %v1777_v13 }
 0x334   : > { %v1594_v56 = vpop.xlane.xlu0 %1593 }
 0x335   : > { %v1773_v49 = vmul.f32 1.442695, %v1708_v46  ;;  %v1714_v12 = vsub.f32 %v4940_v22, %v1594_v56 }
 0x336   : > { %v1592_v59 = vpop.xlane.xlu1 %1591 }
 0x337   : > { %3809 = vpow2.f32 %v1773_v49  ;;  %v1713_v54 = vsub.f32 %v4946_v25, %v1592_v59  ;;  %v1785_v63 = vmul.f32 1.442695, %v1714_v12 }
 0x338   : > { %3811 = vpow2.f32 %v1775_v29  ;;  %v1590_v15 = vpop.xlane.xlu0 %1589 }
 0x339   : > { %v1783_v0 = vmul.f32 1.442695, %v1713_v54  ;;  %v1712_v38 = vsub.f32 %v4952_v27, %v1590_v15 }
 0x33a   : > { %v1588_v32 = vpop.xlane.xlu1 %1587  ;;  %v5076_v46 = vpop.eup %3805 }
 0x33b   : > { %v1781_v48 = vmul.f32 1.442695, %v1712_v38  ;;  %v1711_v19 = vsub.f32 %v4958_v33, %v1588_v32  ;;  %3813 = vpow2.f32 %v1783_v0 }
 0x33c   : > { %v1600_v39 = vpop.xlane.xlu0 %1599 }
 0x33d   : > { %v1779_v60 = vmul.f32 1.442695, %v1711_v19  ;;  %3815 = vpow2.f32 %v1781_v48  ;;  %v5079_v22 = vpop.eup %3807  ;;  %v1717_v49 = vsub.f32 %v4964_v41, %v1600_v39  ;;  %v5101_v41 = vadd.f32 %v5019_v7, %v4919_v9 }
 0x33e   : > { %v1602_v13 = vpop.xlane.xlu1 %1601  ;;  %v5106_v39 = vadd.f32 %v5021_v1, %v4928_v14 }
 0x33f   : > { %3817 = vpow2.f32 %v1779_v60  ;;  %v1718_v29 = vsub.f32 %v4970_v47, %v1602_v13  ;;  %v1791_v60 = vmul.f32 1.442695, %v1717_v49 }
 0x340   : > { %3819 = vpow2.f32 %v1785_v63  ;;  %v1596_v25 = vpop.xlane.xlu0 %1595  ;;  %v3414_v27 = vpop.f32.mrb[48].mxu0 }
 0x341   : > { %v5081_v56 = vpop.eup %3809  ;;  %v1715_v33 = vsub.f32 %v4976_v51, %v1596_v25  ;;  %v5085_v54 = vadd.f32 %v3414_v27, %v4909_v3  ;;  %v1371_v0 = vpop.f32.mrb[49].mxu0  ;;  %v1793_v38 = vmul.f32 1.442695, %v1718_v29 }
 0x342   : > { %v5087_v62 = vpop.eup %3811  ;;  %v5091_v59 = vadd.f32 %v1371_v0, %v4911_v4  ;;  %v1608_v47 = vpop.xlane.xlu1 %1607  ;;  %v2027_v15 = vpack.c.bf16 %v5081_v56, %v5076_v46 }
 0x343   : > { %v3415_v12 = vpop.f32.mrb[50].mxu0  ;;  %1647 = vmax.xlane.f32.xlu0 %v5085_v54  ;;  %v2028_v51 = vpack.c.bf16 %v5079_v22, %v5087_v62  ;;  %v1787_v48 = vmul.f32 1.442695, %v1715_v33  ;;  %3821 = vpow2.f32 %v1793_v38  ;;  %v1721_v38 = vsub.f32 %v4982_v44, %v1608_v47 }
 0x344   : > { %v1374_v32 = vpop.f32.mrb[51].mxu0  ;;  %3476 = vmatprep.mubr.bf16.mxu0 %v2027_v15  ;;  %v1598_v19 = vpop.xlane.xlu0 %1597  ;;  %1643 = vmax.xlane.f32.xlu1 %v5091_v59  ;;  %v5124_v0 = vadd.f32 %v3415_v12, %v4919_v9 }
 0x345   : > { %v1716_v63 = vsub.f32 %v4988_v28, %v1598_v19  ;;  %3477 = vmatmul.mubr.bf16.vlgmr.msra.gmra.mrb[64].mxu0 %v2028_v51  ;;  %v5109_v29 = vpop.eup %3813  ;;  %3823 = vpow2.f32 %v1787_v48 }
 0x346   : > { %3525 = vmatpush3.bf16.msra.mxu0 %v4905_v42  ;;  %v1604_v13 = vpop.xlane.xlu1 %1603  ;;  %6092 = vst [vmem:[#allocation28_spill] sm:$0xff] %v5109_v29  ;;  %v5121_v42 = vadd.f32 %v5036_v40, %v4937_v20 }
 0x347   : > { %v1789_v25 = vmul.f32 1.442695, %v1716_v63  ;;  %v1719_v27 = vsub.f32 %v4994_v43, %v1604_v13  ;;  %3526 = vmatprep.subr.bf16.mxu0 %v5008_v61  ;;  %1617 = vmax.xlane.f32.xlu0 %v5101_v41  ;;  %v5114_v28 = vpop.eup %3815  ;;  %v5146_v63 = vadd.f32 %v1374_v32, %v4928_v14  ;;  %v1799_v13 = vmul.f32 1.442695, %v1721_v38 }
 0x348   : > { %6093 = vst [vmem:[#allocation29_spill] sm:$0xff] %v5114_v28  ;;  %v1610_v7 = vpop.xlane.xlu0 %1609  ;;  %v3418_v1 = vpop.f32.mrb[52].mxu0  ;;  %1613 = vmax.xlane.f32.xlu1 %v5106_v39 }
 0x349   : > { %v5117_v33 = vpop.eup %3817  ;;  %3825 = vpow2.f32 %v1789_v25  ;;  %v1722_v43 = vsub.f32 %v5000_v57, %v1610_v7  ;;  %v1387_v49 = vpop.f32.mrb[53].mxu0  ;;  %v1795_v51 = vmul.f32 1.442695, %v1719_v27  ;;  %v5151_v25 = vadd.f32 %v3418_v1, %v4937_v20 }
 0x34a   : > { %6094 = vst [vmem:[#allocation30_spill] sm:$0xff] %v5117_v33  ;;  %v5127_v15 = vpop.eup %3819  ;;  %3827 = vpow2.f32 %v1791_v60  ;;  %3527 = vmatpush3.bf16.msra.mxu0 %v5008_v61  ;;  %v1606_v48 = vpop.xlane.xlu1 %1605  ;;  %v2029_v40 = vpack.c.bf16 %v5114_v28, %v5117_v33  ;;  %v5164_v1 = vadd.f32 %v1387_v49, %v4949_v26 }
 0x34b   : > { %6095 = vst [vmem:[#allocation31_spill] sm:$0xff] %v5127_v15  ;;  %v5131_v19 = vpop.f32.mrb[54].mxu0  ;;  %v1720_v12 = vsub.f32 %v5004_v58, %v1606_v48  ;;  %3528 = vmatprep.subr.bf16.mxu0 %v5010_v36  ;;  %1649 = vmax.xlane.f32.xlu0 %v5124_v0  ;;  %v2030_v44 = vpack.c.bf16 %v5127_v15, %v5109_v29  ;;  %v1801_v47 = vmul.f32 1.442695, %v1722_v43  ;;  %3829 = vpow2.f32 %v1795_v51 }
 0x34c   : > { %v5137_v57 = vpop.f32.mrb[55].mxu0  ;;  %3480 = vmatprep.mubr.bf16.mxu0 %v2029_v40  ;;  %v5142_v61 = vpop.f32.mrb[32].mxu1  ;;  %1623 = vmax.xlane.f32.xlu1 %v5121_v42  ;;  %6097 = vst [vmem:[#allocation33_spill] sm:$0xff] %v5164_v1  ;;  %v5170_v51 = vadd.f32 %v5038_v10, %v4949_v26 }
 0x34d   : > { %v1797_v60 = vmul.f32 1.442695, %v1720_v12  ;;  %3481 = vmatmul.mubr.bf16.gmra.mrb[68].mxu0 %v2030_v44  ;;  %v5148_v58 = vpop.f32.mrb[33].mxu1  ;;  %v5161_v43 = vpop.eup %3821 }
 0x34e   : > { %3529 = vmatpush3.bf16.msra.mxu0 %v5010_v36  ;;  %v5154_v27 = vpop.f32.mrb[34].mxu1  ;;  %6096 = vst [vmem:[#allocation32_spill] sm:$0xff] %v5161_v43 }
 0x34f   : > { %3831 = vpow2.f32 %v1797_v60  ;;  %3530 = vmatprep.subr.bf16.mxu0 %v5027_v2  ;;  %v5157_v7 = vpop.f32.mrb[35].mxu1  ;;  %1645 = vmax.xlane.f32.xlu0 %v5146_v63  ;;  %v5166_v36 = vpop.eup %3823  ;;  %v5190_v60 = vadd.f32 %v5040_v11, %v4932_v16 }
 0x350   : > { %3833 = vpow2.f32 %v1801_v47  ;;  %v3422_v32 = vpop.f32.mrb[56].mxu0  ;;  %1655 = vmax.xlane.f32.xlu1 %v5151_v25 }
 0x351   : > { %v1403_v38 = vpop.f32.mrb[57].mxu0  ;;  %3835 = vpow2.f32 %v1799_v13  ;;  %6099 = vst [vmem:[#allocation35_spill] sm:$0xff] %v5190_v60  ;;  %v5194_v13 = vadd.f32 %v5048_v23, %v4955_v30 }
 0x352   : > { %3531 = vmatpush3.bf16.msra.mxu0 %v5027_v2  ;;  %v3423_v48 = vpop.f32.mrb[58].mxu0 }
 0x353   : > { %v5173_v40 = vpop.eup %3825  ;;  %3532 = vmatprep.subr.bf16.mxu0 %v5032_v5  ;;  %v1406_v12 = vpop.f32.mrb[59].mxu0  ;;  %1651 = vmax.xlane.f32.xlu0 %v5164_v1  ;;  %6100 = vst [vmem:[#allocation36_spill] sm:$0xff] %v5194_v13  ;;  %v5236_v1 = vadd.f32 %v5044_v34, %v4943_v24 }
 0x354   : > { %v5177_v49 = vpop.eup %3827  ;;  %v5179_v44 = vpop.f32.mrb[36].mxu1  ;;  %1619 = vmax.xlane.f32.xlu1 %v5170_v51  ;;  %v2031_v10 = vpack.c.bf16 %v5173_v40, %v5166_v36 }
 0x355   : > { %6098 = vst [vmem:[#allocation34_spill] sm:$0xff] %v5177_v49  ;;  %v5184_v47 = vpop.f32.mrb[37].mxu1  ;;  %v2032_v2 = vpack.c.bf16 %v5161_v43, %v5177_v49  ;;  %v5202_v28 = vpop.eup %3829  ;;  %v5218_v49 = vadd.f32 %v5131_v19, %v4932_v16  ;;  %v5231_v19 = vadd.f32 %v5052_v35, %v4967_v45  ;;  %6106 = vst [vmem:[#allocation42_spill] sm:$0xff] %v5236_v1 }
 0x356   : > { %3533 = vmatpush3.bf16.msra.mxu0 %v5032_v5  ;;  %3484 = vmatprep.mubr.bf16.mxu0 %v2031_v10  ;;  %v5197_v15 = vpop.f32.mrb[38].mxu1  ;;  %6101 = vst [vmem:[#allocation37_spill] sm:$0xff] %v5202_v28  ;;  %v5211_v5 = vadd.f32 %v3422_v32, %v4955_v30  ;;  %v5246_v35 = vadd.f32 %v5137_v57, %v4943_v24 }
 0x357   : > { %3534 = vmatprep.subr.bf16.mxu0 %v5034_v8  ;;  %3485 = vmatmul.mubr.bf16.gmra.mrb[72].mxu0 %v2032_v2  ;;  %v5200_v29 = vpop.f32.mrb[39].mxu1  ;;  %6105 = vst [vmem:[#allocation41_spill] sm:$0xff] %v5231_v19  ;;  %v5264_v57 = vadd.f32 %v5060_v17, %v4973_v50  ;;  %v5281_v17 = vadd.f32 %v5063_v31, %v4985_v6 }
 0x358   : > { %1631 = vmax.xlane.f32.xlu0 %v5194_v13  ;;  %v3426_v11 = vpop.f32.mrb[60].mxu0  ;;  %1625 = vmax.xlane.f32.xlu1 %v5190_v60  ;;  %v5297_v31 = vadd.f32 %v5154_v27, %v4919_v9  ;;  %v5316_v9 = vadd.f32 %v5184_v47, %v4949_v26  ;;  %v5337_v47 = vadd.f32 %v5179_v44, %v4937_v20 }
 0x359   : > { %v5206_v33 = vpop.eup %3831  ;;  %v1419_v23 = vpop.f32.mrb[61].mxu0  ;;  %v5355_v20 = vadd.f32 %v5200_v29, %v4943_v24 }
 0x35a   : > { %6102 = vst [vmem:[#allocation38_spill] sm:$0xff] %v5206_v33  ;;  %v5208_v43 = vpop.eup %3833  ;;  %3535 = vmatpush3.bf16.msra.mxu0 %v5034_v8  ;;  %v3427_v10 = vpop.f32.mrb[62].mxu0  ;;  %v2033_v2 = vpack.c.bf16 %v5206_v33, %v5202_v28 }
 0x35b   : > { %6103 = vst [vmem:[#allocation39_spill] sm:$0xff] %v5208_v43  ;;  %3536 = vmatprep.subr.bf16.mxu0 %v5046_v21  ;;  %v1422_v13 = vpop.f32.mrb[63].mxu0  ;;  %v5221_v60 = vpop.eup %3835 }
 0x35c   : > { %6104 = vst [vmem:[#allocation40_spill] sm:$0xff] %v5221_v60  ;;  %1663 = vmax.xlane.f32.xlu0 %v5211_v5  ;;  %3488 = vmatprep.mubr.bf16.mxu0 %v2033_v2  ;;  %v3454_v32 = vpop.f32.mrb[40].mxu1  ;;  %v2034_v33 = vpack.c.bf16 %v5208_v43, %v5221_v60  ;;  %v5242_v43 = vadd.f32 %v5056_v18, %v4961_v37 }
 0x35d   : > { %1657 = vmax.xlane.f32.xlu1 %v5218_v49  ;;  %v5225_v8 = vpop.f32.mrb[41].mxu1  ;;  %v5260_v18 = vadd.f32 %v5058_v53, %v4979_v52  ;;  %v5277_v53 = vadd.f32 %v1419_v23, %v4985_v6  ;;  %v5300_v23 = vadd.f32 %v3427_v10, %v4991_v55 }
 0x35e   : > { %3537 = vmatpush3.bf16.msra.mxu0 %v5046_v21  ;;  %v3455_v28 = vpop.f32.mrb[42].mxu1 }
 0x35f   : > { %3489 = vmatmul.mubr.bf16.gmra.mrb[76].mxu0 %v2034_v33  ;;  %v1551_v2 = vpop.f32.mrb[43].mxu1  ;;  %v5251_v33 = vadd.f32 %v3423_v48, %v4961_v37  ;;  %v5272_v48 = vadd.f32 %v3426_v11, %v4973_v50  ;;  %v6109_v11 = vld [vmem:[#allocation26_spill] sm:$0xff]  ;;  %v5333_v26 = vadd.f32 %v3455_v28, %v4961_v37 }
 0x360   : > { %1627 = vmax.xlane.f32.xlu0 %v5231_v19  ;;  %v5254_v19 = vadd.f32 %v1403_v38, %v4967_v45  ;;  %v5269_v38 = vadd.f32 %v1406_v12, %v4979_v52  ;;  %v5287_v12 = vadd.f32 %v5142_v61, %v4909_v3  ;;  %v5306_v3 = vadd.f32 %v5157_v7, %v4928_v14  ;;  %v6110_v61 = vld [vmem:[#allocation17_spill] sm:$0xff] }
 0x361   : > { %1621 = vmax.xlane.f32.xlu1 %v5236_v1  ;;  %v5319_v27 = vadd.f32 %v1422_v13, %v6110_v61  ;;  %v5324_v14 = vadd.f32 %v3454_v32, %v4955_v30  ;;  %v5328_v7 = vadd.f32 %v5148_v58, %v4911_v4  ;;  %v5342_v30 = vadd.f32 %v1551_v2, %v4979_v52 }
 0x362   : > { %6107 = vst [vmem:[#allocation43_spill] sm:$0xff] %v5269_v38  ;;  %6108 = vst [vmem:[#allocation44_spill] sm:$0xff] %v5287_v12  ;;  %v5346_v4 = vadd.f32 %v5197_v15, %v4932_v16  ;;  %v5361_v52 = vadd.f32 %v5225_v8, %v4967_v45  ;;  %v6112_v45 = vld [vmem:[#allocation15_spill] sm:$0xff] }
 0x364   : > { %1633 = vmax.xlane.f32.xlu0 %v5242_v43  ;;  %v3458_v21 = vpop.f32.mrb[44].mxu1 }
 0x365   : > { %1653 = vmax.xlane.f32.xlu1 %v5246_v35  ;;  %v1564_v34 = vpop.f32.mrb[45].mxu1  ;;  %v5365_v16 = vadd.f32 %v3458_v21, %v4973_v50 }
 0x366   : > { %v3459_v60 = vpop.f32.mrb[46].mxu1  ;;  %v5351_v37 = vadd.f32 %v1564_v34, %v4985_v6 }
 0x367   : > { %v1567_v1 = vpop.f32.mrb[47].mxu1  ;;  %v5369_v6 = vadd.f32 %v3459_v60, %v4991_v55  ;;  %v6114_v60 = vld [vmem:[#allocation19_spill] sm:$0xff] }
 0x368   : > { %1665 = vmax.xlane.f32.xlu0 %v5251_v33  ;;  %v5373_v24 = vadd.f32 %v1567_v1, %v6110_v61 }
 0x369   : > { %1659 = vmax.xlane.f32.xlu1 %v5254_v19 }
 0x36c   : > { %1629 = vmax.xlane.f32.xlu0 %v5260_v18 }
 0x36d   : > { %1639 = vmax.xlane.f32.xlu1 %v5264_v57 }
 0x370   : > { %1661 = vmax.xlane.f32.xlu0 %v5269_v38  ;;  %v5291_v38 = vadd.f32 %v6109_v11, %v4991_v55  ;;  %v6111_v11 = vld [vmem:[#allocation27_spill] sm:$0xff]  ;;  %v6113_v55 = vld [vmem:[#allocation21_spill] sm:$0xff] }
 0x371   : > { %1671 = vmax.xlane.f32.xlu1 %v5272_v48 }
 0x374   : > { %1667 = vmax.xlane.f32.xlu0 %v5277_v53 }
 0x375   : > { %1635 = vmax.xlane.f32.xlu1 %v5281_v17 }
 0x378   : > { %1679 = vmax.xlane.f32.xlu0 %v5287_v12  ;;  %v5310_v12 = vadd.f32 %v6111_v11, %v6110_v61 }
 0x379   : > { %1641 = vmax.xlane.f32.xlu1 %v5291_v38 }
 0x37c   : > { %1681 = vmax.xlane.f32.xlu0 %v5297_v31 }
 0x37d   : > { %1673 = vmax.xlane.f32.xlu1 %v5300_v23 }
 0x380   : > { %1677 = vmax.xlane.f32.xlu0 %v5306_v3 }
 0x381   : > { %1637 = vmax.xlane.f32.xlu1 %v5310_v12 }
 0x384   : > { %1683 = vmax.xlane.f32.xlu0 %v5316_v9 }
 0x385   : > { %1669 = vmax.xlane.f32.xlu1 %v5319_v27 }
 0x388   : > { %1695 = vmax.xlane.f32.xlu0 %v5324_v14 }
 0x389   : > { %1675 = vmax.xlane.f32.xlu1 %v5328_v7 }
 0x38c   : > { %1697 = vmax.xlane.f32.xlu0 %v5333_v26 }
 0x38d   : > { %1687 = vmax.xlane.f32.xlu1 %v5337_v47 }
 0x390   : > { %1693 = vmax.xlane.f32.xlu0 %v5342_v30 }
 0x391   : > { %1689 = vmax.xlane.f32.xlu1 %v5346_v4 }
 0x394   : > { %1699 = vmax.xlane.f32.xlu0 %v5351_v37 }
 0x395   : > { %1685 = vmax.xlane.f32.xlu1 %v5355_v20 }
 0x399   : > { %1691 = vmax.xlane.f32.xlu1 %v5361_v52 }
 0x39c   : > { %v1616_v50 = vpop.xlane.xlu1 %1615 }
 0x39d   : > { %1703 = vmax.xlane.f32.xlu1 %v5365_v16  ;;  %v1725_v13 = vsub.f32 %v6114_v60, %v1616_v50 }
 0x39f   : > { %v1807_v34 = vmul.f32 1.442695, %v1725_v13  ;;  %v6115_v13 = vld [vmem:[#allocation33_spill] sm:$0xff] }
 0x3a0   : > { %v1612_v29 = vpop.xlane.xlu1 %1611 }
 0x3a1   : > { %1705 = vmax.xlane.f32.xlu1 %v5369_v6  ;;  %v1723_v28 = vsub.f32 %v6113_v55, %v1612_v29 }
 0x3a3   : > { %v1803_v10 = vmul.f32 1.442695, %v1723_v28 }
 0x3a5   : > { %1701 = vmax.xlane.f32.xlu1 %v5373_v24 }
 0x3aa   : > { %972 = vrot.lane.b32.xlu0 %v6112_v45, %s4264_s26 }
 0x3b6   : > { %948 = vrot.lane.b32.xlu1 %v6112_v45, %s4263_s20 }
 0x3c9   : > { %1899 = vadd.xlane.f32.xlu0 %v5076_v46 }
 0x3cd   : > { %1915 = vadd.xlane.f32.xlu0 %v5166_v36 }
 0x3d0   : > { %v1648_v15 = vpop.xlane.xlu0 %1647 }
 0x3d1   : > { %1903 = vadd.xlane.f32.xlu0 %v5087_v62  ;;  %v1741_v58 = vsub.f32 %v5085_v54, %v1648_v15  ;;  %v1644_v1 = vpop.xlane.xlu1 %1643 }
 0x3d2   : > { %v1739_v44 = vsub.f32 %v5091_v59, %v1644_v1 }
 0x3d3   : > { %v1839_v32 = vmul.f32 1.442695, %v1741_v58 }
 0x3d4   : > { %v1835_v8 = vmul.f32 1.442695, %v1739_v44  ;;  %v1618_v2 = vpop.xlane.xlu0 %1617 }
 0x3d5   : > { %3837 = vpow2.f32 %v1839_v32  ;;  %v1726_v46 = vsub.f32 %v5101_v41, %v1618_v2  ;;  %v1614_v36 = vpop.xlane.xlu1 %1613 }
 0x3d6   : > { %v1724_v21 = vsub.f32 %v5106_v39, %v1614_v36  ;;  %3839 = vpow2.f32 %v1803_v10  ;;  %v6116_v36 = vld [vmem:[#allocation35_spill] sm:$0xff] }
 0x3d7   : > { %v1809_v62 = vmul.f32 1.442695, %v1726_v46  ;;  %3841 = vpow2.f32 %v1835_v8 }
 0x3d8   : > { %v1805_v54 = vmul.f32 1.442695, %v1724_v21  ;;  %v1650_v61 = vpop.xlane.xlu0 %1649 }
 0x3d9   : > { %3843 = vpow2.f32 %v1809_v62  ;;  %v1742_v59 = vsub.f32 %v5124_v0, %v1650_v61  ;;  %v1624_v11 = vpop.xlane.xlu1 %1623 }
 0x3da   : > { %3845 = vpow2.f32 %v1805_v54  ;;  %1901 = vadd.xlane.f32.xlu1 %v5081_v56  ;;  %v1729_v45 = vsub.f32 %v5121_v42, %v1624_v11  ;;  %v6117_v54 = vld [vmem:[#allocation36_spill] sm:$0xff] }
 0x3db   : > { %3847 = vpow2.f32 %v1807_v34  ;;  %v1841_v41 = vmul.f32 1.442695, %v1742_v59  ;;  %v6118_v59 = vld [vmem:[#allocation16_spill] sm:$0xff] }
 0x3dc   : > { %v1815_v50 = vmul.f32 1.442695, %v1729_v45  ;;  %v1646_v29 = vpop.xlane.xlu0 %1645 }
 0x3dd   : > { %3849 = vpow2.f32 %v1841_v41  ;;  %v1740_v39 = vsub.f32 %v5146_v63, %v1646_v29  ;;  %v1656_v55 = vpop.xlane.xlu1 %1655  ;;  %v6119_v29 = vld [vmem:[#allocation18_spill] sm:$0xff] }
 0x3de   : > { %v1745_v28 = vsub.f32 %v5151_v25, %v1656_v55  ;;  %1917 = vadd.xlane.f32.xlu1 %v5173_v40  ;;  %3851 = vpow2.f32 %v1815_v50 }
 0x3df   : > { %v5395_v15 = vpop.eup %3837  ;;  %v1837_v0 = vmul.f32 1.442695, %v1740_v39 }
 0x3e0   : > { %1967 = vadd.xlane.f32.xlu0 %v5395_v15  ;;  %v1652_v56 = vpop.xlane.xlu0 %1651  ;;  %v3840_v42 = vpop.eup %3839  ;;  %v1847_v58 = vmul.f32 1.442695, %v1745_v28 }
 0x3e1   : > { %3853 = vpow2.f32 %v1837_v0  ;;  %v1620_v1 = vpop.xlane.xlu1 %1619  ;;  %v3842_v44 = vpop.eup %3841  ;;  %v1743_v10 = vsub.f32 %v6115_v13, %v1652_v56 }
 0x3e2   : > { %v1727_v60 = vsub.f32 %v5170_v51, %v1620_v1  ;;  %1905 = vadd.xlane.f32.xlu1 %v5079_v22  ;;  %3855 = vpow2.f32 %v1847_v58 }
 0x3e3   : > { %v3844_v63 = vpop.eup %3843  ;;  %v1843_v51 = vmul.f32 1.442695, %v1743_v10 }
 0x3e4   : > { %v3846_v25 = vpop.eup %3845  ;;  %1963 = vadd.xlane.f32.xlu0 %v3842_v44  ;;  %v1811_v32 = vmul.f32 1.442695, %v1727_v60 }
 0x3e5   : > { %v3848_v40 = vpop.eup %3847  ;;  %v1632_v8 = vpop.xlane.xlu0 %1631  ;;  %v2035_v46 = vpack.c.bf16 %v3846_v25, %v3840_v42 }
 0x3e6   : > { %v1626_v2 = vpop.xlane.xlu1 %1625  ;;  %1935 = vadd.xlane.f32.xlu1 %v3848_v40  ;;  %v2036_v34 = vpack.c.bf16 %v3844_v63, %v3848_v40  ;;  %3857 = vpow2.f32 %v1811_v32  ;;  %v1733_v61 = vsub.f32 %v6117_v54, %v1632_v8  ;;  %v6122_v32 = vld [vmem:[#allocation22_spill] sm:$0xff] }
 0x3e7   : > { %v1730_v21 = vsub.f32 %v6116_v36, %v1626_v2  ;;  %v5402_v62 = vpop.eup %3849  ;;  %3508 = vmatprep.mubr.bf16.mxu1 %v2035_v46  ;;  %3859 = vpow2.f32 %v1843_v51  ;;  %v6123_v2 = vld [vmem:[#allocation41_spill] sm:$0xff] }
 0x3e8   : > { %1933 = vadd.xlane.f32.xlu0 %v3846_v25  ;;  %3509 = vmatmul.mubr.bf16.vlgmr.msra.gmra.mrb[48].mxu1 %v2036_v34  ;;  %v2044_v22 = vpack.c.bf16 %v5402_v62, %v5395_v15  ;;  %v5408_v45 = vpop.eup %3851  ;;  %v1823_v0 = vmul.f32 1.442695, %v1733_v61  ;;  %v6124_v61 = vld [vmem:[#allocation23_spill] sm:$0xff] }
 0x3e9   : > { %3557 = vmatpush3.bf16.msra.mxu1 %v6118_v59  ;;  %v1664_v11 = vpop.xlane.xlu0 %1663  ;;  %v1817_v41 = vmul.f32 1.442695, %v1730_v21 }
 0x3ea   : > { %v1658_v50 = vpop.xlane.xlu1 %1657  ;;  %1931 = vadd.xlane.f32.xlu1 %v3840_v42  ;;  %3558 = vmatprep.subr.bf16.mxu1 %v6119_v29  ;;  %v1749_v56 = vsub.f32 %v5211_v5, %v1664_v11  ;;  %v6120_v42 = vld [vmem:[#allocation20_spill] sm:$0xff] }
 0x3eb   : > { %v3854_v39 = vpop.eup %3853  ;;  %v1746_v55 = vsub.f32 %v5218_v49, %v1658_v50  ;;  %3861 = vpow2.f32 %v1817_v41  ;;  %v6121_v49 = vld [vmem:[#allocation42_spill] sm:$0xff] }
 0x3ec   : > { %1943 = vadd.xlane.f32.xlu0 %v5408_v45  ;;  %v2043_v28 = vpack.c.bf16 %v3854_v39, %v3842_v44  ;;  %v5416_v25 = vpop.eup %3855  ;;  %v1855_v44 = vmul.f32 1.442695, %v1749_v56 }
 0x3ed   : > { %v1849_v58 = vmul.f32 1.442695, %v1746_v55  ;;  %3559 = vmatpush3.bf16.msra.mxu1 %v6119_v29  ;;  %v1628_v1 = vpop.xlane.xlu0 %1627 }
 0x3ee   : > { %v1622_v60 = vpop.xlane.xlu1 %1621  ;;  %1937 = vadd.xlane.f32.xlu1 %v3844_v63  ;;  %3560 = vmatprep.subr.bf16.mxu1 %v6120_v42  ;;  %v1731_v46 = vsub.f32 %v6123_v2, %v1628_v1 }
 0x3ef   : > { %3863 = vpow2.f32 %v1849_v58  ;;  %v1728_v40 = vsub.f32 %v6121_v49, %v1622_v60  ;;  %3540 = vmatprep.mubr.bf16.mxu0 %v2043_v28 }
 0x3f0   : > { %1975 = vadd.xlane.f32.xlu0 %v5416_v25  ;;  %3865 = vpow2.f32 %v1823_v0  ;;  %v3858_v63 = vpop.eup %3857  ;;  %v1819_v41 = vmul.f32 1.442695, %v1731_v46  ;;  %v6125_v0 = vld [vmem:[#allocation24_spill] sm:$0xff] }
 0x3f1   : > { %v1813_v5 = vmul.f32 1.442695, %v1728_v40  ;;  %3561 = vmatpush3.bf16.msra.mxu1 %v6120_v42  ;;  %v1634_v13 = vpop.xlane.xlu0 %1633  ;;  %v5429_v59 = vpop.eup %3859  ;;  %v6126_v40 = vld [vmem:[#allocation25_spill] sm:$0xff] }
 0x3f2   : > { %v1654_v10 = vpop.xlane.xlu1 %1653  ;;  %3562 = vmatprep.subr.bf16.mxu1 %v6122_v32  ;;  %1969 = vadd.xlane.f32.xlu1 %v5402_v62  ;;  %v1734_v36 = vsub.f32 %v5242_v43, %v1634_v13  ;;  %v6130_v62 = vld [vmem:[#allocation32_spill] sm:$0xff] }
 0x3f3   : > { %3867 = vpow2.f32 %v1813_v5  ;;  %v1744_v8 = vsub.f32 %v5246_v35, %v1654_v10 }
 0x3f4   : > { %1939 = vadd.xlane.f32.xlu0 %v3858_v63  ;;  %3869 = vpow2.f32 %v1855_v44  ;;  %v1825_v29 = vmul.f32 1.442695, %v1734_v36 }
 0x3f5   : > { %v1845_v21 = vmul.f32 1.442695, %v1744_v8  ;;  %3563 = vmatpush3.bf16.msra.mxu1 %v6122_v32  ;;  %v1666_v34 = vpop.xlane.xlu0 %1665  ;;  %v3862_v11 = vpop.eup %3861 }
 0x3f6   : > { %v1750_v51 = vsub.f32 %v5251_v33, %v1666_v34  ;;  %v1660_v54 = vpop.xlane.xlu1 %1659  ;;  %3564 = vmatprep.subr.bf16.mxu1 %v6124_v61  ;;  %1965 = vadd.xlane.f32.xlu1 %v3854_v39  ;;  %v2038_v13 = vpack.c.bf16 %v3862_v11, %v5408_v45 }
 0x3f7   : > { %v1747_v35 = vsub.f32 %v5254_v19, %v1660_v54  ;;  %3871 = vpow2.f32 %v1845_v21  ;;  %v6127_v54 = vld [vmem:[#allocation43_spill] sm:$0xff] }
 0x3f8   : > { %v1857_v50 = vmul.f32 1.442695, %v1750_v51  ;;  %1971 = vadd.xlane.f32.xlu0 %v5429_v59 }
 0x3f9   : > { %v5433_v43 = vpop.eup %3863  ;;  %v1851_v55 = vmul.f32 1.442695, %v1747_v35  ;;  %3565 = vmatpush3.bf16.msra.mxu1 %v6124_v61  ;;  %v1630_v33 = vpop.xlane.xlu0 %1629 }
 0x3fa   : > { %3873 = vpow2.f32 %v1857_v50  ;;  %v1732_v39 = vsub.f32 %v5260_v18, %v1630_v33  ;;  %v1640_v28 = vpop.xlane.xlu1 %1639  ;;  %3566 = vmatprep.subr.bf16.mxu1 %v6125_v0  ;;  %1945 = vadd.xlane.f32.xlu1 %v3862_v11  ;;  %v2046_v19 = vpack.c.bf16 %v5433_v43, %v5416_v25  ;;  %v3866_v56 = vpop.eup %3865  ;;  %v6134_v25 = vld [vmem:[#allocation38_spill] sm:$0xff] }
 0x3fb   : > { %3875 = vpow2.f32 %v1851_v55  ;;  %v1737_v58 = vsub.f32 %v5264_v57, %v1640_v28 }
 0x3fc   : > { %3877 = vpow2.f32 %v1819_v41  ;;  %v1821_v1 = vmul.f32 1.442695, %v1732_v39  ;;  %1951 = vadd.xlane.f32.xlu0 %v3866_v56 }
 0x3fd   : > { %v3868_v60 = vpop.eup %3867  ;;  %3879 = vpow2.f32 %v1825_v29  ;;  %v1831_v42 = vmul.f32 1.442695, %v1737_v58  ;;  %3567 = vmatpush3.bf16.msra.mxu1 %v6125_v0  ;;  %v1662_v18 = vpop.xlane.xlu0 %1661 }
 0x3fe   : > { %3881 = vpow2.f32 %v1821_v1  ;;  %v1672_v49 = vpop.xlane.xlu1 %1671  ;;  %3568 = vmatprep.subr.bf16.mxu1 %v6126_v40  ;;  %1977 = vadd.xlane.f32.xlu1 %v5433_v43  ;;  %v2037_v44 = vpack.c.bf16 %v3868_v60, %v3858_v63  ;;  %v5444_v5 = vpop.eup %3869  ;;  %v1748_v61 = vsub.f32 %v6127_v54, %v1662_v18  ;;  %v6135_v43 = vld [vmem:[#allocation28_spill] sm:$0xff] }
 0x3ff   : > { %3883 = vpow2.f32 %v1831_v42  ;;  %v1753_v57 = vsub.f32 %v5272_v48, %v1672_v49 }
 0x400   : > { %3512 = vmatprep.mubr.bf16.mxu1 %v2037_v44  ;;  %1983 = vadd.xlane.f32.xlu0 %v5444_v5  ;;  %v1853_v39 = vmul.f32 1.442695, %v1748_v61 }
 0x401   : > { %v1863_v10 = vmul.f32 1.442695, %v1753_v57  ;;  %3513 = vmatmul.mubr.bf16.gmra.mrb[52].mxu1 %v2038_v13  ;;  %v1668_v32 = vpop.xlane.xlu0 %1667  ;;  %v5450_v2 = vpop.eup %3871 }
 0x402   : > { %3569 = vmatpush3.bf16.msra.mxu1 %v6126_v40  ;;  %v1636_v8 = vpop.xlane.xlu1 %1635  ;;  %1941 = vadd.xlane.f32.xlu1 %v3868_v60  ;;  %v1751_v63 = vsub.f32 %v5277_v53, %v1668_v32 }
 0x403   : > { %3885 = vpow2.f32 %v1863_v10  ;;  %v1735_v46 = vsub.f32 %v5281_v17, %v1636_v8  ;;  %v6128_v17 = vld [vmem:[#allocation44_spill] sm:$0xff] }
 0x404   : > { %v5454_v48 = vpop.eup %3873  ;;  %v1859_v11 = vmul.f32 1.442695, %v1751_v63 }
 0x405   : > { %v5456_v45 = vpop.eup %3875  ;;  %v1827_v36 = vmul.f32 1.442695, %v1735_v46  ;;  %v1680_v21 = vpop.xlane.xlu0 %1679  ;;  %v2048_v34 = vpack.c.bf16 %v5454_v48, %v5444_v5  ;;  %v6138_v5 = vld [vmem:[#allocation39_spill] sm:$0xff] }
 0x406   : > { %v3878_v51 = vpop.eup %3877  ;;  %v1642_v35 = vpop.xlane.xlu1 %1641  ;;  %1973 = vadd.xlane.f32.xlu1 %v5450_v2  ;;  %1979 = vadd.xlane.f32.xlu0 %v5456_v45  ;;  %v1757_v41 = vsub.f32 %v6128_v17, %v1680_v21 }
 0x407   : > { %v3880_v53 = vpop.eup %3879  ;;  %3887 = vpow2.f32 %v1827_v36  ;;  %v1738_v28 = vsub.f32 %v5291_v38, %v1642_v35 }
 0x408   : > { %v3882_v50 = vpop.eup %3881  ;;  %v2040_v58 = vpack.c.bf16 %v3880_v53, %v3866_v56  ;;  %3889 = vpow2.f32 %v1859_v11  ;;  %v1871_v1 = vmul.f32 1.442695, %v1757_v41 }
 0x409   : > { %v5464_v29 = vpop.eup %3883  ;;  %v1682_v55 = vpop.xlane.xlu0 %1681  ;;  %v2039_v33 = vpack.c.bf16 %v3882_v50, %v3878_v51  ;;  %3891 = vpow2.f32 %v1853_v39  ;;  %v1833_v18 = vmul.f32 1.442695, %v1738_v28 }
 0x40a   : > { %v1674_v0 = vpop.xlane.xlu1 %1673  ;;  %1959 = vadd.xlane.f32.xlu0 %v5464_v29  ;;  %1947 = vadd.xlane.f32.xlu1 %v3878_v51  ;;  %3893 = vpow2.f32 %v1871_v1  ;;  %v1758_v8 = vsub.f32 %v5297_v31, %v1682_v55 }
 0x40b   : > { %3516 = vmatprep.mubr.bf16.mxu1 %v2039_v33  ;;  %v1754_v38 = vsub.f32 %v5300_v23, %v1674_v0  ;;  %3895 = vpow2.f32 %v1833_v18 }
 0x40c   : > { %3517 = vmatmul.mubr.bf16.gmra.mrb[56].mxu1 %v2040_v58  ;;  %v1873_v51 = vmul.f32 1.442695, %v1758_v8 }
 0x40d   : > { %v5468_v60 = vpop.eup %3885  ;;  %v1678_v42 = vpop.xlane.xlu0 %1677  ;;  %v1865_v32 = vmul.f32 1.442695, %v1754_v38 }
 0x40e   : > { %v1638_v49 = vpop.xlane.xlu1 %1637  ;;  %1991 = vadd.xlane.f32.xlu0 %v5468_v60  ;;  %1953 = vadd.xlane.f32.xlu1 %v3880_v53  ;;  %v1756_v13 = vsub.f32 %v5306_v3, %v1678_v42 }
 0x40f   : > { %v1736_v40 = vsub.f32 %v5310_v12, %v1638_v49 }
 0x410   : > { %v1869_v23 = vmul.f32 1.442695, %v1756_v13 }
 0x411   : > { %v3888_v44 = vpop.eup %3887  ;;  %v1829_v56 = vmul.f32 1.442695, %v1736_v40  ;;  %v1684_v57 = vpop.xlane.xlu0 %1683 }
 0x412   : > { %v1670_v10 = vpop.xlane.xlu1 %1669  ;;  %1955 = vadd.xlane.f32.xlu0 %v3888_v44  ;;  %1985 = vadd.xlane.f32.xlu1 %v5454_v48  ;;  %v5476_v63 = vpop.eup %3889 }
 0x413   : > { %3897 = vpow2.f32 %v1829_v56  ;;  %v1752_v12 = vsub.f32 %v5319_v27, %v1670_v10  ;;  %v5481_v21 = vpop.eup %3891 }
 0x414   : > { %3899 = vpow2.f32 %v1865_v32  ;;  %v5485_v61 = vpop.eup %3893 }
 0x415   : > { %v1696_v46 = vpop.xlane.xlu0 %1695  ;;  %3901 = vpow2.f32 %v1869_v23  ;;  %v1861_v27 = vmul.f32 1.442695, %v1752_v12  ;;  %v3896_v55 = vpop.eup %3895 }
 0x416   : > { %v1676_v36 = vpop.xlane.xlu1 %1675  ;;  %1949 = vadd.xlane.f32.xlu1 %v3882_v50  ;;  %1987 = vadd.xlane.f32.xlu0 %v5476_v63  ;;  %v1765_v39 = vsub.f32 %v5324_v14, %v1696_v46  ;;  %v2042_v18 = vpack.c.bf16 %v3896_v55, %v5464_v29 }
 0x417   : > { %v1755_v3 = vsub.f32 %v5328_v7, %v1676_v36  ;;  %v1759_v7 = vsub.f32 %v5316_v9, %v1684_v57 }
 0x418   : > { %v5483_v54 = vpop.f32.mrb[64].mxu0  ;;  %v1887_v38 = vmul.f32 1.442695, %v1765_v39 }
 0x419   : > { %v1867_v31 = vmul.f32 1.442695, %v1755_v3  ;;  %v5487_v35 = vpop.f32.mrb[65].mxu0  ;;  %v1698_v53 = vpop.xlane.xlu0 %1697  ;;  %v1875_v42 = vmul.f32 1.442695, %v1759_v7 }
 0x41a   : > { %v1688_v11 = vpop.xlane.xlu1 %1687  ;;  %v5489_v17 = vpop.f32.mrb[66].mxu0  ;;  %1981 = vadd.xlane.f32.xlu1 %v5481_v21  ;;  %1999 = vadd.xlane.f32.xlu0 %v5485_v61  ;;  %v1766_v12 = vsub.f32 %v5333_v26, %v1698_v53 }
 0x41b   : > { %3903 = vpow2.f32 %v1867_v31  ;;  %v1761_v41 = vsub.f32 %v5337_v47, %v1688_v11  ;;  %v5495_v50 = vpop.f32.mrb[67].mxu0 }
 0x41c   : > { %3905 = vpow2.f32 %v1873_v51  ;;  %v1889_v7 = vmul.f32 1.442695, %v1766_v12 }
 0x41d   : > { %v3898_v33 = vpop.eup %3897  ;;  %v1879_v28 = vmul.f32 1.442695, %v1761_v41  ;;  %v1694_v0 = vpop.xlane.xlu0 %1693  ;;  %3907 = vpow2.f32 %v1861_v27 }
 0x41e   : > { %v1690_v58 = vpop.xlane.xlu1 %1689  ;;  %1961 = vadd.xlane.f32.xlu1 %v3896_v55  ;;  %v2041_v1 = vpack.c.bf16 %v3898_v33, %v3888_v44  ;;  %v5502_v49 = vpop.eup %3899  ;;  %v1764_v56 = vsub.f32 %v5342_v30, %v1694_v0 }
 0x41f   : > { %3909 = vpow2.f32 %v1879_v28  ;;  %v1762_v9 = vsub.f32 %v5346_v4, %v1690_v58  ;;  %v3902_v10 = vpop.eup %3901 }
 0x420   : > { %v5500_v47 = vpop.f32.mrb[68].mxu0  ;;  %3520 = vmatprep.mubr.bf16.mxu1 %v2041_v1  ;;  %3911 = vpow2.f32 %v1875_v42  ;;  %v1885_v30 = vmul.f32 1.442695, %v1764_v56 }
 0x421   : > { %v5504_v40 = vpop.f32.mrb[69].mxu0  ;;  %3521 = vmatmul.mubr.bf16.gmra.mrb[60].mxu1 %v2042_v18  ;;  %v1700_v14 = vpop.xlane.xlu0 %1699  ;;  %v1881_v57 = vmul.f32 1.442695, %v1762_v9  ;;  %3913 = vpow2.f32 %v1887_v38 }
 0x422   : > { %v1686_v44 = vpop.xlane.xlu1 %1685  ;;  %v5507_v13 = vpop.f32.mrb[70].mxu0  ;;  %1993 = vadd.xlane.f32.xlu1 %v5502_v49  ;;  %v1767_v41 = vsub.f32 %v5351_v37, %v1700_v14 }
 0x423   : > { %v1760_v4 = vsub.f32 %v5355_v20, %v1686_v44  ;;  %v5511_v29 = vpop.f32.mrb[71].mxu0  ;;  %3915 = vpow2.f32 %v1881_v57 }
 0x424   : > { %v1891_v1 = vmul.f32 1.442695, %v1767_v41 }
 0x425   : > { %v3904_v32 = vpop.eup %3903  ;;  %v1877_v8 = vmul.f32 1.442695, %v1760_v4  ;;  %v973_v46 = vpop.permute.xlu0 %972 }
 0x426   : > { %v3906_v23 = vpop.eup %3905  ;;  %v1692_v36 = vpop.xlane.xlu1 %1691  ;;  %1957 = vadd.xlane.f32.xlu1 %v3898_v33  ;;  %1995 = vadd.xlane.f32.xlu0 %v3904_v32  ;;  %v2051_v3 = vpack.c.bf16 %v3902_v10, %v3904_v32 }
 0x427   : > { %3917 = vpow2.f32 %v1877_v8  ;;  %v1763_v51 = vsub.f32 %v5361_v52, %v1692_v36  ;;  %3570 = vmatprep.subr.bf16.mxu1 %v973_v46  ;;  %v5515_v20 = vpop.eup %3907  ;;  %v2052_v11 = vpack.c.bf16 %v3906_v23, %v5485_v61 }
 0x428   : > { %3571 = vmatpush3.bf16.msra.mxu1 %v973_v46  ;;  %3572 = vmatprep.mubr.bf16.mxu1 %v2051_v3  ;;  %3919 = vpow2.f32 %v1885_v30  ;;  %v2045_v30 = vpack.c.bf16 %v5450_v2, %v5429_v59  ;;  %v6132_v59 = vld [vmem:[#allocation29_spill] sm:$0xff] }
 0x429   : > { %v3910_v31 = vpop.eup %3909  ;;  %v1883_v27 = vmul.f32 1.442695, %v1763_v51  ;;  %v6133_v2 = vld [vmem:[#allocation37_spill] sm:$0xff] }
 0x42a   : > { %v1704_v26 = vpop.xlane.xlu1 %1703  ;;  %v5518_v53 = vpop.f32.mrb[72].mxu0  ;;  %1989 = vadd.xlane.f32.xlu1 %v5515_v20  ;;  %2007 = vadd.xlane.f32.xlu0 %v3910_v31 }
 0x42b   : > { %3921 = vpow2.f32 %v1883_v27  ;;  %v1769_v52 = vsub.f32 %v5365_v16, %v1704_v26  ;;  %3573 = vmatmul.mubr.bf16.vlgmr.msra.gmra.mrb[64].mxu1 %v2052_v11  ;;  %v5523_v55 = vpop.f32.mrb[73].mxu0  ;;  %v3912_v39 = vpop.eup %3911  ;;  %v6129_v27 = vld [vmem:[#allocation34_spill] sm:$0xff]  ;;  %v2047_v11 = vpack.c.bf16 %v5481_v21, %v5456_v45  ;;  %v2049_v45 = vpack.c.bf16 %v5515_v20, %v5476_v63  ;;  %v6136_v21 = vld [vmem:[#allocation31_spill] sm:$0xff]  ;;  %v6137_v26 = vld [vmem:[#allocation40_spill] sm:$0xff] }
 0x42c   : > { %v5525_v33 = vpop.f32.mrb[74].mxu0  ;;  %3923 = vpow2.f32 %v1889_v7  ;;  %v3914_v58 = vpop.eup %3913 }
 0x42d   : > { %v1895_v61 = vmul.f32 1.442695, %v1769_v52  ;;  %v5527_v28 = vpop.f32.mrb[75].mxu0  ;;  %v3916_v42 = vpop.eup %3915 }
 0x42e   : > { %v1706_v0 = vpop.xlane.xlu1 %1705  ;;  %2001 = vadd.xlane.f32.xlu1 %v3906_v23  ;;  %2003 = vadd.xlane.f32.xlu0 %v3912_v39  ;;  %v2054_v44 = vpack.c.bf16 %v3916_v42, %v3910_v31 }
 0x42f   : > { %3925 = vpow2.f32 %v1895_v61  ;;  %v1770_v37 = vsub.f32 %v5369_v6, %v1706_v0 }
 0x430   : > { %3927 = vpow2.f32 %v1891_v1 }
 0x431   : > { %v3918_v16 = vpop.eup %3917  ;;  %v1897_v9 = vmul.f32 1.442695, %v1770_v37 }
 0x432   : > { %v1702_v18 = vpop.xlane.xlu1 %1701  ;;  %v5530_v38 = vpop.f32.mrb[76].mxu0  ;;  %1997 = vadd.xlane.f32.xlu1 %v3902_v10  ;;  %2015 = vadd.xlane.f32.xlu0 %v3914_v58  ;;  %v2053_v14 = vpack.c.bf16 %v3918_v16, %v3912_v39 }
 0x433   : > { %v1768_v56 = vsub.f32 %v5373_v24, %v1702_v18  ;;  %v5533_v57 = vpop.f32.mrb[77].mxu0  ;;  %v3920_v4 = vpop.eup %3919  ;;  %3929 = vpow2.f32 %v1897_v9 }
 0x434   : > { %v5535_v32 = vpop.f32.mrb[78].mxu0  ;;  %3576 = vmatprep.mubr.bf16.mxu1 %v2053_v14 }
 0x435   : > { %v3922_v6 = vpop.eup %3921  ;;  %v1893_v8 = vmul.f32 1.442695, %v1768_v56  ;;  %v5537_v46 = vpop.f32.mrb[79].mxu0  ;;  %3577 = vmatmul.mubr.bf16.gmra.mrb[68].mxu1 %v2054_v44 }
 0x436   : > { %v949_v23 = vpop.permute.xlu1 %948  ;;  %2009 = vadd.xlane.f32.xlu1 %v3916_v42  ;;  %2011 = vadd.xlane.f32.xlu0 %v3922_v6  ;;  %v2055_v10 = vpack.c.bf16 %v3920_v4, %v3922_v6  ;;  %v3924_v24 = vpop.eup %3923 }
 0x437   : > { %3931 = vpow2.f32 %v1893_v8  ;;  %3538 = vmatprep.subr.bf16.mxu0 %v949_v23  ;;  %v2056_v36 = vpack.c.bf16 %v3924_v24, %v3914_v58 }
 0x438   : > { %3539 = vmatpush3.bf16.msra.mxu0 %v949_v23  ;;  %3580 = vmatprep.mubr.bf16.mxu1 %v2055_v10 }
 0x439   : > { %v3926_v12 = vpop.eup %3925 }
 0x43a   : > { %2005 = vadd.xlane.f32.xlu1 %v3918_v16  ;;  %2023 = vadd.xlane.f32.xlu0 %v3926_v12  ;;  %v3928_v3 = vpop.eup %3927 }
 0x43b   : > { %3541 = vmatmul.mubr.bf16.vlgmr.msra.gmra.mrb[80].mxu0 %v2044_v22  ;;  %v6131_v22 = vld [vmem:[#allocation30_spill] sm:$0xff] }
 0x43c   : > { %3544 = vmatprep.mubr.bf16.mxu0 %v2045_v30 }
 0x43d   : > { %3581 = vmatmul.mubr.bf16.gmra.mrb[72].mxu1 %v2056_v36  ;;  %v3930_v51 = vpop.eup %3929 }
 0x43e   : > { %2017 = vadd.xlane.f32.xlu1 %v3924_v24  ;;  %2019 = vadd.xlane.f32.xlu0 %v3928_v3  ;;  %v2058_v15 = vpack.c.bf16 %v3930_v51, %v3926_v12 }
 0x441   : > { %v3932_v31 = vpop.eup %3931 }
 0x442   : > { %2013 = vadd.xlane.f32.xlu1 %v3920_v4  ;;  %1919 = vadd.xlane.f32.xlu0 %v6129_v27  ;;  %v2057_v7 = vpack.c.bf16 %v3932_v31, %v3928_v3 }
 0x443   : > { %3545 = vmatmul.mubr.bf16.gmra.mrb[84].mxu0 %v2046_v19  ;;  %v2050_v19 = vpack.c.bf16 %v5502_v49, %v5468_v60 }
 0x444   : > { %3548 = vmatprep.mubr.bf16.mxu0 %v2047_v11  ;;  %3584 = vmatprep.mubr.bf16.mxu1 %v2057_v7 }
 0x445   : > { %3585 = vmatmul.mubr.bf16.gmra.mrb[76].mxu1 %v2058_v15 }
 0x446   : > { %1921 = vadd.xlane.f32.xlu1 %v6130_v62  ;;  %1907 = vadd.xlane.f32.xlu0 %v6131_v22 }
 0x44a   : > { %1909 = vadd.xlane.f32.xlu1 %v6132_v59  ;;  %1923 = vadd.xlane.f32.xlu0 %v6133_v2 }
 0x44b   : > { %3549 = vmatmul.mubr.bf16.gmra.mrb[88].mxu0 %v2048_v34 }
 0x44c   : > { %3552 = vmatprep.mubr.bf16.mxu0 %v2049_v45 }
 0x44e   : > { %1925 = vadd.xlane.f32.xlu1 %v6134_v25  ;;  %1911 = vadd.xlane.f32.xlu0 %v6135_v43 }
 0x452   : > { %1913 = vadd.xlane.f32.xlu1 %v6136_v21  ;;  %1927 = vadd.xlane.f32.xlu0 %v6137_v26 }
 0x453   : > { %3553 = vmatmul.mubr.bf16.gmra.mrb[92].mxu0 %v2050_v19 }
 0x456   : > { %2025 = vadd.xlane.f32.xlu1 %v3930_v51  ;;  %v1900_v41 = vpop.xlane.xlu0 %1899 }
 0x457   : > { %3933 = vrcp.f32 %v1900_v41 }
 0x45a   : > { %2021 = vadd.xlane.f32.xlu1 %v3932_v31  ;;  %v1916_v63 = vpop.xlane.xlu0 %1915 }
 0x45b   : > { %3935 = vrcp.f32 %v1916_v63 }
 0x45e   : > { %1929 = vadd.xlane.f32.xlu1 %v6138_v5  ;;  %v1904_v48 = vpop.xlane.xlu0 %1903 }
 0x45f   : > { %3937 = vrcp.f32 %v1904_v48 }
 0x461   : > { %v3934_v34 = vpop.eup %3933 }
 0x462   : > { %v5567_v20 = vmul.f32 %v3934_v34, %v5487_v35 }
 0x464   : > { %6139 = vst [vmem:[#allocation26_spill] sm:$0xff] %v5567_v20 }
 0x465   : > { %v3936_v60 = vpop.eup %3935 }
 0x466   : > { %v5570_v49 = vmul.f32 %v3936_v60, %v5523_v55 }
 0x467   : > { %v1902_v52 = vpop.xlane.xlu1 %1901 }
 0x468   : > { %6140 = vst [vmem:[#allocation17_spill] sm:$0xff] %v5570_v49  ;;  %3939 = vrcp.f32 %v1902_v52 }
 0x469   : > { %v3938_v39 = vpop.eup %3937 }
 0x46a   : > { %v5573_v61 = vmul.f32 %v3938_v39, %v5483_v54 }
 0x46b   : > { %v1918_v0 = vpop.xlane.xlu1 %1917 }
 0x46c   : > { %6141 = vst [vmem:[#allocation27_spill] sm:$0xff] %v5573_v61  ;;  %3941 = vrcp.f32 %v1918_v0 }
 0x46d   : > { %v5575_v58 = vpop.xlane.xlu0 %1967 }
 0x46f   : > { %v1906_v1 = vpop.xlane.xlu1 %1905 }
 0x470   : > { %3943 = vrcp.f32 %v1906_v1 }
 0x471   : > { %v5577_v37 = vpop.xlane.xlu0 %1963 }
 0x472   : > { %v3940_v35 = vpop.eup %3939 }
 0x473   : > { %v1936_v42 = vpop.xlane.xlu1 %1935  ;;  %v5580_v16 = vmul.f32 %v3940_v35, %v5495_v50 }
 0x474   : > { %3945 = vrcp.f32 %v1936_v42 }
 0x475   : > { %6142 = vst [vmem:[#allocation15_spill] sm:$0xff] %v5580_v16  ;;  %v1934_v55 = vpop.xlane.xlu0 %1933 }
 0x476   : > { %v3942_v18 = vpop.eup %3941 }
 0x477   : > { %v1932_v54 = vpop.xlane.xlu1 %1931  ;;  %v5585_v14 = vmul.f32 %v3942_v18, %v5527_v28 }
 0x478   : > { %3947 = vrcp.f32 %v1932_v54 }
 0x479   : > { %6143 = vst [vmem:[#allocation21_spill] sm:$0xff] %v5585_v14  ;;  %v1944_v56 = vpop.xlane.xlu0 %1943 }
 0x47a   : > { %v3944_v4 = vpop.eup %3943 }
 0x47b   : > { %v1938_v6 = vpop.xlane.xlu1 %1937  ;;  %v5590_v8 = vmul.f32 %v3944_v4, %v5489_v17 }
 0x47c   : > { %3949 = vrcp.f32 %v1938_v6 }
 0x47d   : > { %6144 = vst [vmem:[#allocation19_spill] sm:$0xff] %v5590_v8  ;;  %v5592_v50 = vpop.xlane.xlu0 %1975  ;;  %3951 = vrcp.f32 %v1934_v55 }
 0x47e   : > { %v3946_v60 = vpop.eup %3945  ;;  %3953 = vrcp.f32 %v1944_v56 }
 0x47f   : > { %v5596_v10 = vpop.xlane.xlu1 %1969 }
 0x481   : > { %v1940_v24 = vpop.xlane.xlu0 %1939 }
 0x482   : > { %v3948_v39 = vpop.eup %3947  ;;  %3955 = vrcp.f32 %v1940_v24 }
 0x483   : > { %v5598_v12 = vpop.xlane.xlu1 %1965 }
 0x485   : > { %v5600_v28 = vpop.xlane.xlu0 %1971 }
 0x486   : > { %v3950_v1 = vpop.eup %3949 }
 0x487   : > { %v1946_v30 = vpop.xlane.xlu1 %1945  ;;  %v3952_v18 = vpop.eup %3951 }
 0x488   : > { %3957 = vrcp.f32 %v1946_v30 }
 0x489   : > { %v1952_v36 = vpop.xlane.xlu0 %1951 }
 0x48b   : > { %v5602_v3 = vpop.xlane.xlu1 %1977 }
 0x48d   : > { %v5604_v51 = vpop.xlane.xlu0 %1983 }
 0x48f   : > { %v1942_v17 = vpop.xlane.xlu1 %1941 }
 0x490   : > { %3959 = vrcp.f32 %v1942_v17 }
 0x491   : > { %3961 = vrcp.f32 %v1952_v36 }
 0x493   : > { %v5606_v31 = vpop.xlane.xlu1 %1973  ;;  %v5608_v27 = vpop.xlane.xlu0 %1979 }
 0x497   : > { %v1948_v11 = vpop.xlane.xlu1 %1947  ;;  %v5610_v7 = vpop.xlane.xlu0 %1959 }
 0x49b   : > { %v1954_v15 = vpop.xlane.xlu1 %1953  ;;  %v5612_v62 = vpop.xlane.xlu0 %1991 }
 0x49f   : > { %v5614_v22 = vpop.xlane.xlu1 %1985  ;;  %v5616_v59 = vpop.xlane.xlu0 %1955 }
 0x4a3   : > { %v1950_v2 = vpop.xlane.xlu1 %1949  ;;  %v5620_v25 = vpop.xlane.xlu0 %1987 }
 0x4a7   : > { %v5618_v45 = vpop.xlane.xlu1 %1981  ;;  %v5624_v19 = vpop.xlane.xlu0 %1999 }
 0x4ab   : > { %v5622_v43 = vpop.xlane.xlu1 %1961 }
 0x4af   : > { %v5626_v21 = vpop.xlane.xlu1 %1993 }
 0x4b0   : > { %6145 = vst [vmem:[#allocation33_spill] sm:$0xff] %v5626_v21 }
 0x4b3   : > { %v5628_v26 = vpop.xlane.xlu1 %1957  ;;  %v5630_v41 = vpop.xlane.xlu0 %1995 }
 0x4b7   : > { %v5632_v63 = vpop.xlane.xlu1 %1989  ;;  %v5634_v5 = vpop.xlane.xlu0 %2007 }
 0x4b8   : > { %6146 = vst [vmem:[#allocation35_spill] sm:$0xff] %v5632_v63 }
 0x4bb   : > { %v5636_v48 = vpop.xlane.xlu1 %2001  ;;  %v5638_v34 = vpop.xlane.xlu0 %2003 }
 0x4bc   : > { %v3510_v52 = vpop.f32.mrb[48].mxu1 }
 0x4bd   : > { %v2190_v0 = vpop.f32.mrb[49].mxu1  ;;  %v2529_v54 = vmul.f32 %v3946_v60, %v3510_v52 }
 0x4be   : > { %v5640_v35 = vmul.f32 %v3948_v39, %v2190_v0  ;;  %v3511_v42 = vpop.f32.mrb[50].mxu1 }
 0x4bf   : > { %v2530_v4 = vmul.f32 %v3950_v1, %v3511_v42  ;;  %v2193_v55 = vpop.f32.mrb[51].mxu1  ;;  %v5642_v6 = vpop.xlane.xlu1 %1997 }
 0x4c0   : > { %v5644_v44 = vmul.f32 %v3952_v18, %v2193_v55  ;;  %v5646_v23 = vpop.xlane.xlu0 %2015 }
 0x4c1   : > { %v2584_v9 = vpack.c.bf16 %v2530_v4, %v2529_v54  ;;  %v3954_v54 = vpop.eup %3953 }
 0x4c2   : > { %v3956_v49 = vpop.eup %3955 }
 0x4c3   : > { %v5650_v14 = vpop.xlane.xlu1 %2009  ;;  %2617 = vrot.lane.b32.xlu1 %v2584_v9, %s4264_s26  ;;  %v3958_v30 = vpop.eup %3957 }
 0x4c4   : > { %v5653_v39 = vpop.xlane.xlu0 %2011  ;;  %v3960_v8 = vpop.eup %3959 }
 0x4c7   : > { %v5655_v0 = vpop.xlane.xlu1 %2005 }
 0x4c8   : > { %v5657_v60 = vpop.xlane.xlu0 %2023 }
 0x4cb   : > { %v5659_v52 = vpop.xlane.xlu1 %2017 }
 0x4cc   : > { %v5661_v1 = vpop.xlane.xlu0 %2019 }
 0x4cf   : > { %v5663_v42 = vpop.xlane.xlu1 %2013 }
 0x4d0   : > { %v1920_v18 = vpop.xlane.xlu0 %1919 }
 0x4d1   : > { %3963 = vrcp.f32 %v1920_v18 }
 0x4d2   : > { %3965 = vrcp.f32 %v1948_v11 }
 0x4d3   : > { %v1922_v9 = vpop.xlane.xlu1 %1921 }
 0x4d4   : > { %3967 = vrcp.f32 %v1922_v9  ;;  %v1908_v4 = vpop.xlane.xlu0 %1907  ;;  %v3514_v55 = vpop.f32.mrb[52].mxu1 }
 0x4d5   : > { %3969 = vrcp.f32 %v1954_v15  ;;  %v5665_v56 = vmul.f32 %v3954_v54, %v3514_v55  ;;  %v2206_v24 = vpop.f32.mrb[53].mxu1  ;;  %v3797_v54 = vld [vmem:[#allocation7] sm:$0xff]  }
 0x4d6   : > { %3971 = vrcp.f32 %v1908_v4  ;;  %v5667_v61 = vmul.f32 %v3956_v49, %v2206_v24  ;;  %v3515_v17 = vpop.f32.mrb[54].mxu1  ;;  %v3962_v49 = vpop.eup %3961  ;;  %3588 = vmatprep.subr.bf16.mxu0 %v3797_v54  ;;  %3620 = vmatprep.subr.bf16.mxu1 %v3797_v54 }
 0x4d7   : > { %6147 = vst [vmem:[#allocation36_spill] sm:$0xff] %v5665_v56  ;;  %3973 = vrcp.f32 %v1950_v2  ;;  %v5669_v36 = vmul.f32 %v3958_v30, %v3515_v17  ;;  %v2209_v11 = vpop.f32.mrb[55].mxu1  ;;  %v1910_v18 = vpop.xlane.xlu1 %1909  ;;  %3589 = vmatpush3.bf16.msra.mxu0 %v3797_v54  ;;  %3628 = vmatpush3.bf16.msra.mxu1 %v3797_v54 }
 0x4d8   : > { %6148 = vst [vmem:[#allocation16_spill] sm:$0xff] %v5667_v61  ;;  %v5671_v20 = vmul.f32 %v3960_v8, %v2209_v11  ;;  %3975 = vrcp.f32 %v1910_v18  ;;  %v1924_v9 = vpop.xlane.xlu0 %1923 }
 0x4d9   : > { %6149 = vst [vmem:[#allocation18_spill] sm:$0xff] %v5669_v36  ;;  %3977 = vrcp.f32 %v1924_v9 }
 0x4da   : > { %6150 = vst [vmem:[#allocation20_spill] sm:$0xff] %v5671_v20 }
 0x4db   : > { %v1926_v55 = vpop.xlane.xlu1 %1925  ;;  %v3964_v2 = vpop.eup %3963 }
 0x4dc   : > { %3979 = vrcp.f32 %v1926_v55  ;;  %v1912_v24 = vpop.xlane.xlu0 %1911  ;;  %v3966_v8 = vpop.eup %3965  ;;  %v5681_v9 = vmul.f32 %v3964_v2, %v5518_v53 }
 0x4dd   : > { %3981 = vrcp.f32 %v1912_v24 }
 0x4de   : > { %v3968_v30 = vpop.eup %3967 }
 0x4df   : > { %v3970_v17 = vpop.eup %3969  ;;  %v3518_v11 = vpop.f32.mrb[56].mxu1  ;;  %v5678_v15 = vmul.f32 %v3968_v30, %v5525_v33 }
 0x4e0   : > { %v1914_v18 = vpop.xlane.xlu1 %1913  ;;  %v3972_v4 = vpop.eup %3971  ;;  %v2537_v56 = vmul.f32 %v3962_v49, %v3518_v11 }
 0x4e1   : > { %3983 = vrcp.f32 %v1914_v18  ;;  %v2222_v16 = vpop.f32.mrb[57].mxu1  ;;  %v3974_v61 = vpop.eup %3973  ;;  %v5692_v53 = vmul.f32 %v3972_v4, %v5504_v40  ;;  %v6157_v54 = vld [vmem:[#allocation20_spill] sm:$0xff] }
 0x4e2   : > { %v5683_v55 = vmul.f32 %v3966_v8, %v2222_v16  ;;  %v3519_v20 = vpop.f32.mrb[58].mxu1  ;;  %v3976_v24 = vpop.eup %3975  ;;  %3985 = vrcp.f32 %v5610_v7 }
 0x4e3   : > { %v2538_v36 = vmul.f32 %v3970_v17, %v3519_v20  ;;  %v2225_v63 = vpop.f32.mrb[59].mxu1  ;;  %v5695_v2 = vmul.f32 %v3976_v24, %v5511_v29  ;;  %v3978_v16 = vpop.eup %3977  ;;  %3987 = vrcp.f32 %v5616_v59 }
 0x4e4   : > { %v5687_v21 = vmul.f32 %v3974_v61, %v2225_v63  ;;  %v5689_v33 = vpop.xlane.xlu1 %2025  ;;  %v1928_v61 = vpop.xlane.xlu0 %1927  ;;  %v5708_v29 = vmul.f32 %v3978_v16, %v5533_v57  ;;  %v6158_v57 = vld [vmem:[#allocation16_spill] sm:$0xff] }
 0x4e5   : > { %v2588_v8 = vpack.c.bf16 %v2538_v36, %v2537_v56  ;;  %3989 = vrcp.f32 %v1928_v61  ;;  %v6159_v49 = vpack.c.bf16 %v6157_v54, %v6158_v57 }
 0x4e6   : > { %v2587_v30 = vpack.c.bf16 %v5687_v21, %v5683_v55  ;;  %v3980_v20 = vpop.eup %3979  ;;  %3991 = vrcp.f32 %v5622_v43 }
 0x4e7   : > { %2625 = vrot.lane.b32.xlu1 %v2588_v8, %s4264_s26  ;;  %v5705_v40 = vmul.f32 %v3980_v20, %v5537_v46  ;;  %v3982_v4 = vpop.eup %3981 }
 0x4e8   : > { %v5702_v63 = vpop.xlane.xlu1 %2021  ;;  %v5716_v11 = vmul.f32 %v3982_v4, %v5500_v47 }
 0x4eb   : > { %v3984_v36 = vpop.eup %3983 }
 0x4ec   : > { %v1930_v17 = vpop.xlane.xlu1 %1929  ;;  %v5719_v46 = vmul.f32 %v3984_v36, %v5507_v13  ;;  %v3986_v7 = vpop.eup %3985 }
 0x4ed   : > { %3993 = vrcp.f32 %v1930_v17  ;;  %v3988_v59 = vpop.eup %3987 }
 0x4ee   : > { %3995 = vrcp.f32 %v5628_v26 }
 0x4ef   : > { %3997 = vrcp.f32 %v5624_v19  ;;  %v3990_v18 = vpop.eup %3989 }
 0x4f0   : > { %3999 = vrcp.f32 %v5630_v41  ;;  %v3992_v24 = vpop.eup %3991  ;;  %v5736_v41 = vmul.f32 %v3990_v18, %v5530_v38 }
 0x4f1   : > { %4001 = vrcp.f32 %v5636_v48 }
 0x4f2   : > { %4003 = vrcp.f32 %v5642_v6 }
 0x4f3   : > { %4005 = vrcp.f32 %v5634_v5 }
 0x4f4   : > { %v3522_v43 = vpop.f32.mrb[60].mxu1  ;;  %4007 = vrcp.f32 %v5638_v34 }
 0x4f5   : > { %v2238_v47 = vpop.f32.mrb[61].mxu1  ;;  %v5728_v8 = vmul.f32 %v3986_v7, %v3522_v43  ;;  %4009 = vrcp.f32 %v5650_v14 }
 0x4f6   : > { %v3523_v16 = vpop.f32.mrb[62].mxu1  ;;  %v5738_v4 = vmul.f32 %v3988_v59, %v2238_v47  ;;  %4011 = vrcp.f32 %v5655_v0 }
 0x4f7   : > { %v3994_v13 = vpop.eup %3993  ;;  %v5730_v20 = vmul.f32 %v3992_v24, %v3523_v16  ;;  %v2241_v61 = vpop.f32.mrb[63].mxu1  ;;  %4013 = vrcp.f32 %v5575_v58 }
 0x4f8   : > { %v3996_v26 = vpop.eup %3995  ;;  %v5733_v19 = vmul.f32 %v3994_v13, %v5535_v32  ;;  %4015 = vrcp.f32 %v5577_v37 }
 0x4f9   : > { %v5740_v48 = vmul.f32 %v3996_v26, %v2241_v61  ;;  %v2590_v6 = vpack.c.bf16 %v5730_v20, %v5728_v8  ;;  %v3998_v7 = vpop.eup %3997  ;;  %4017 = vrcp.f32 %v5596_v10  ;;  %v3798_v61 = vld [vmem:[#allocation7 + $0x8] sm:$0xff]  }
 0x4fa   : > { %v4000_v43 = vpop.eup %3999  ;;  %4019 = vrcp.f32 %v5598_v12  ;;  %3590 = vmatprep.subr.bf16.mxu0 %v3798_v61  ;;  %3621 = vmatprep.subr.bf16.mxu1 %v3798_v61 }
 0x4fb   : > { %v2589_v17 = vpack.c.bf16 %v5740_v48, %v5738_v4  ;;  %v4002_v38 = vpop.eup %4001  ;;  %4021 = vrcp.f32 %v5646_v23  ;;  %3591 = vmatpush3.bf16.msra.mxu0 %v3798_v61  ;;  %3629 = vmatpush3.bf16.msra.mxu1 %v3798_v61 }
 0x4fc   : > { %v4004_v18 = vpop.eup %4003  ;;  %4023 = vrcp.f32 %v5653_v39 }
 0x4fd   : > { %v4006_v58 = vpop.eup %4005  ;;  %4025 = vrcp.f32 %v5659_v52 }
 0x4fe   : > { %v3574_v32 = vpop.f32.mrb[64].mxu1  ;;  %v4008_v37 = vpop.eup %4007  ;;  %4027 = vrcp.f32 %v5663_v42 }
 0x4ff   : > { %v2384_v59 = vpop.f32.mrb[65].mxu1  ;;  %v5752_v47 = vmul.f32 %v3998_v7, %v3574_v32  ;;  %4029 = vrcp.f32 %v5592_v50  ;;  %v3799_v50 = vld [vmem:[#allocation7 + $0x10] sm:$0xff]  }
 0x500   : > { %v3575_v24 = vpop.f32.mrb[66].mxu1  ;;  %v5757_v26 = vmul.f32 %v4000_v43, %v2384_v59  ;;  %v4010_v43 = vpop.eup %4009  ;;  %4031 = vrcp.f32 %v5600_v28  ;;  %3592 = vmatprep.subr.bf16.mxu0 %v3799_v50  ;;  %3622 = vmatprep.subr.bf16.mxu1 %v3799_v50 }
 0x501   : > { %v5754_v13 = vmul.f32 %v4002_v38, %v3575_v24  ;;  %v2387_v16 = vpop.f32.mrb[67].mxu1  ;;  %v4012_v12 = vpop.eup %4011  ;;  %4033 = vrcp.f32 %v5602_v3  ;;  %3593 = vmatpush3.bf16.msra.mxu0 %v3799_v50  ;;  %3630 = vmatpush3.bf16.msra.mxu1 %v3799_v50 }
 0x502   : > { %v5759_v5 = vmul.f32 %v4004_v18, %v2387_v16  ;;  %v4014_v32 = vpop.eup %4013  ;;  %4035 = vrcp.f32 %v5606_v31 }
 0x503   : > { %v2600_v34 = vpack.c.bf16 %v5754_v13, %v5752_v47  ;;  %v4016_v59 = vpop.eup %4015  ;;  %4037 = vrcp.f32 %v5657_v60 }
 0x504   : > { %v2599_v14 = vpack.c.bf16 %v5759_v5, %v5757_v26  ;;  %v4018_v18 = vpop.eup %4017  ;;  %4039 = vrcp.f32 %v5661_v1  ;;  %v6160_v26 = vld [vmem:[#allocation15_spill] sm:$0xff]  ;;  %v6161_v5 = vld [vmem:[#allocation26_spill] sm:$0xff] }
 0x505   : > { %v4020_v3 = vpop.eup %4019  ;;  %4041 = vrcp.f32 %v5689_v33 }
 0x506   : > { %v4022_v31 = vpop.eup %4021  ;;  %4043 = vrcp.f32 %v5702_v63 }
 0x507   : > { %4045 = vrcp.f32 %v5604_v51 }
 0x508   : > { %v3578_v0 = vpop.f32.mrb[68].mxu1  ;;  %4047 = vrcp.f32 %v5608_v27 }
 0x509   : > { %v2400_v7 = vpop.f32.mrb[69].mxu1  ;;  %v5774_v23 = vmul.f32 %v4006_v58, %v3578_v0  ;;  %4049 = vrcp.f32 %v5614_v22  ;;  %v3802_v22 = vld [vmem:[#allocation7 + $0x28] sm:$0xff]  }
 0x50a   : > { %v3579_v10 = vpop.f32.mrb[70].mxu1  ;;  %v5779_v42 = vmul.f32 %v4008_v37, %v2400_v7  ;;  %v3800_v7 = vld [vmem:[#allocation7 + $0x18] sm:$0xff]   ;;  %4051 = vrcp.f32 %v5618_v45  ;;  %v6151_v45 = vpack.c.bf16 %v5644_v44, %v5640_v35 }
 0x50b   : > { %v5776_v39 = vmul.f32 %v4010_v43, %v3579_v10  ;;  %v2403_v52 = vpop.f32.mrb[71].mxu1  ;;  %v4024_v43 = vpop.eup %4023  ;;  %3594 = vmatprep.subr.bf16.mxu0 %v3800_v7  ;;  %3623 = vmatprep.subr.bf16.mxu1 %v3800_v7  ;;  %4053 = vrcp.f32 %v5612_v62 }
 0x50c   : > { %v5781_v38 = vmul.f32 %v4012_v12, %v2403_v52  ;;  %v4026_v36 = vpop.eup %4025  ;;  %3595 = vmatpush3.bf16.msra.mxu0 %v3800_v7  ;;  %3631 = vmatpush3.bf16.msra.mxu1 %v3800_v7  ;;  %4055 = vrcp.f32 %v5620_v25 }
 0x50d   : > { %v2602_v28 = vpack.c.bf16 %v5776_v39, %v5774_v23  ;;  %v4028_v50 = vpop.eup %4027  ;;  %v6163_v23 = vld [vmem:[#allocation19_spill] sm:$0xff] }
 0x50e   : > { %v2601_v24 = vpack.c.bf16 %v5781_v38, %v5779_v42  ;;  %v3542_v16 = vpop.f32.mrb[80].mxu0  ;;  %v6164_v39 = vld [vmem:[#allocation27_spill] sm:$0xff] }
 0x50f   : > { %v2545_v58 = vmul.f32 %v4014_v32, %v3542_v16  ;;  %v2287_v0 = vpop.f32.mrb[81].mxu0  ;;  %v6165_v42 = vpack.c.bf16 %v6163_v23, %v6164_v39 }
 0x510   : > { %v5791_v61 = vmul.f32 %v4016_v59, %v2287_v0  ;;  %v3543_v37 = vpop.f32.mrb[82].mxu0  ;;  %v3582_v60 = vpop.f32.mrb[72].mxu1 }
 0x511   : > { %v2546_v10 = vmul.f32 %v4018_v18, %v3543_v37  ;;  %v2290_v12 = vpop.f32.mrb[83].mxu0  ;;  %v2416_v52 = vpop.f32.mrb[73].mxu1  ;;  %v5794_v56 = vmul.f32 %v4022_v31, %v3582_v60  ;;  %v3801_v37 = vld [vmem:[#allocation7 + $0x20] sm:$0xff]  }
 0x512   : > { %v2544_v1 = vmul.f32 %v4020_v3, %v2290_v12  ;;  %v3583_v32 = vpop.f32.mrb[74].mxu1  ;;  %v4030_v0 = vpop.eup %4029  ;;  %v5800_v18 = vmul.f32 %v4024_v43, %v2416_v52  ;;  %3596 = vmatprep.subr.bf16.mxu0 %v3801_v37  ;;  %3624 = vmatprep.subr.bf16.mxu1 %v3801_v37 }
 0x513   : > { %v2592_v16 = vpack.c.bf16 %v2546_v10, %v2545_v58  ;;  %v5796_v33 = vmul.f32 %v4026_v36, %v3583_v32  ;;  %v2419_v59 = vpop.f32.mrb[75].mxu1  ;;  %v4032_v12 = vpop.eup %4031  ;;  %3597 = vmatpush3.bf16.msra.mxu0 %v3801_v37  ;;  %3632 = vmatpush3.bf16.msra.mxu1 %v3801_v37 }
 0x514   : > { %v2591_v63 = vpack.c.bf16 %v2544_v1, %v5791_v61  ;;  %v5802_v3 = vmul.f32 %v4028_v50, %v2419_v59  ;;  %v4034_v58 = vpop.eup %4033  ;;  %3598 = vmatprep.subr.bf16.mxu0 %v3802_v22  ;;  %3625 = vmatprep.subr.bf16.mxu1 %v3802_v22 }
 0x515   : > { %v2604_v36 = vpack.c.bf16 %v5796_v33, %v5794_v56  ;;  %2641 = vrot.lane.b32.xlu0 %v2592_v16, %s4263_s20  ;;  %v4036_v61 = vpop.eup %4035 }
 0x516   : > { %v2603_v51 = vpack.c.bf16 %v5802_v3, %v5800_v18  ;;  %v3546_v31 = vpop.f32.mrb[84].mxu0  ;;  %v4038_v7 = vpop.eup %4037 }
 0x517   : > { %v5812_v60 = vmul.f32 %v4030_v0, %v3546_v31  ;;  %v2303_v27 = vpop.f32.mrb[85].mxu0  ;;  %v4040_v1 = vpop.eup %4039  ;;  %3599 = vmatpush3.bf16.msra.mxu0 %v3802_v22  ;;  %3633 = vmatpush3.bf16.msra.mxu1 %v3802_v22 }
 0x518   : > { %v5814_v43 = vmul.f32 %v4032_v12, %v2303_v27  ;;  %v3547_v10 = vpop.f32.mrb[86].mxu0  ;;  %v3586_v52 = vpop.f32.mrb[76].mxu1 }
 0x519   : > { %v5816_v32 = vmul.f32 %v4034_v58, %v3547_v10  ;;  %v2306_v50 = vpop.f32.mrb[87].mxu0  ;;  %v2432_v16 = vpop.f32.mrb[77].mxu1  ;;  %2615 = vrot.lane.b32.xlu0 %v6151_v45, %s4264_s26  ;;  %v5824_v27 = vmul.f32 %v4038_v7, %v3586_v52  ;;  %v6152_v52 = vld [vmem:[#allocation33_spill] sm:$0xff] }
 0x51a   : > { %v4042_v59 = vpop.eup %4041  ;;  %v2548_v0 = vmul.f32 %v4036_v61, %v2306_v50  ;;  %v3587_v31 = vpop.f32.mrb[78].mxu1  ;;  %v5830_v35 = vmul.f32 %v4040_v1, %v2432_v16  ;;  %v3803_v50 = vld [vmem:[#allocation7 + $0x30] sm:$0xff]   ;;  %4057 = vrcp.f32 %v6152_v52 }
 0x51b   : > { %v4044_v37 = vpop.eup %4043  ;;  %v2594_v12 = vpack.c.bf16 %v5816_v32, %v5812_v60  ;;  %v5826_v58 = vmul.f32 %v4042_v59, %v3587_v31  ;;  %v2435_v10 = vpop.f32.mrb[79].mxu1  ;;  %3600 = vmatprep.subr.bf16.mxu0 %v3803_v50  ;;  %3626 = vmatprep.subr.bf16.mxu1 %v3803_v50  ;;  %v6166_v32 = vpack.c.bf16 %v5695_v2, %v5692_v53  ;;  %v6168_v2 = vld [vmem:[#allocation21_spill] sm:$0xff] }
 0x51c   : > { %v2593_v44 = vpack.c.bf16 %v2548_v0, %v5814_v43  ;;  %v2572_v61 = vmul.f32 %v4044_v37, %v2435_v10  ;;  %v4046_v7 = vpop.eup %4045  ;;  %v6153_v43 = vld [vmem:[#allocation35_spill] sm:$0xff]  ;;  %3601 = vmatpush3.bf16.msra.mxu0 %v3803_v50  ;;  %3634 = vmatpush3.bf16.msra.mxu1 %v3803_v50  ;;  %v3804_v0 = vld [vmem:[#allocation7 + $0x38] sm:$0xff]   ;;  %v6155_v10 = vld [vmem:[#allocation36_spill] sm:$0xff] }
 0x51d   : > { %v2606_v45 = vpack.c.bf16 %v5826_v58, %v5824_v27  ;;  %2639 = vrot.lane.b32.xlu0 %v2591_v63, %s4263_s20  ;;  %v4048_v62 = vpop.eup %4047  ;;  %4059 = vrcp.f32 %v6153_v43  ;;  %v6154_v58 = vld [vmem:[#allocation18_spill] sm:$0xff]  ;;  %3602 = vmatprep.subr.bf16.mxu0 %v3804_v0 }
 0x51e   : > { %v2605_v22 = vpack.c.bf16 %v2572_v61, %v5830_v35  ;;  %v3550_v59 = vpop.f32.mrb[88].mxu0  ;;  %v4050_v25 = vpop.eup %4049  ;;  %v6156_v35 = vpack.c.bf16 %v6154_v58, %v6155_v10  ;;  %3627 = vmatprep.subr.bf16.mxu1 %v3804_v0  ;;  %v6167_v10 = vpack.c.bf16 %v5719_v46, %v5716_v11 }
 0x51f   : > { %v2319_v1 = vpop.f32.mrb[89].mxu0  ;;  %v4052_v31 = vpop.eup %4051  ;;  %v2553_v37 = vmul.f32 %v4046_v7, %v3550_v59 }
 0x520   : > { %v3551_v16 = vpop.f32.mrb[90].mxu0  ;;  %v2551_v61 = vmul.f32 %v4048_v62, %v2319_v1  ;;  %3603 = vmatpush3.bf16.msra.mxu0 %v3804_v0  ;;  %3635 = vmatpush3.bf16.msra.mxu1 %v3804_v0  ;;  %v4054_v7 = vpop.eup %4053 }
 0x521   : > { %v2554_v63 = vmul.f32 %v4050_v25, %v3551_v16  ;;  %v2322_v27 = vpop.f32.mrb[91].mxu0  ;;  %2621 = vrot.lane.b32.xlu0 %v6156_v35, %s4264_s26  ;;  %v4056_v25 = vpop.eup %4055 }
 0x522   : > { %v2552_v52 = vmul.f32 %v4052_v31, %v2322_v27 }
 0x523   : > { %v2596_v43 = vpack.c.bf16 %v2554_v63, %v2553_v37 }
 0x524   : > { %v2595_v50 = vpack.c.bf16 %v2552_v52, %v2551_v61  ;;  %v4058_v58 = vpop.eup %4057 }
 0x525   : > { %2619 = vrot.lane.b32.xlu0 %v6159_v49, %s4264_s26  ;;  %2649 = vrot.lane.b32.xlu1 %v2596_v43, %s4263_s20 }
 0x526   : > { %v3554_v59 = vpop.f32.mrb[92].mxu0 }
 0x527   : > { %v2335_v16 = vpop.f32.mrb[93].mxu0  ;;  %v4060_v1 = vpop.eup %4059  ;;  %v2557_v31 = vmul.f32 %v4054_v7, %v3554_v59 }
 0x528   : > { %v3555_v62 = vpop.f32.mrb[94].mxu0  ;;  %v2555_v54 = vmul.f32 %v4056_v25, %v2335_v16  ;;  %v6171_v25 = vpack.c.bf16 %v5678_v15, %v5681_v9 }
 0x529   : > { %v2558_v27 = vmul.f32 %v4058_v58, %v3555_v62  ;;  %v2338_v37 = vpop.f32.mrb[95].mxu0  ;;  %2643 = vrot.lane.b32.xlu0 %v2593_v44, %s4263_s20  ;;  %2623 = vrot.lane.b32.xlu1 %v2587_v30, %s4264_s26 }
 0x52a   : > { %v2556_v49 = vmul.f32 %v4060_v1, %v2338_v37 }
 0x52b   : > { %v2598_v57 = vpack.c.bf16 %v2558_v27, %v2557_v31  ;;  %v6172_v27 = vpack.c.bf16 %v5705_v40, %v5708_v29  ;;  %v3124_v40 = vld [vmem:[%s6019_s4] ss:$0 sm:$0xff] }
 0x52c   : > { %v2597_v0 = vpack.c.bf16 %v2556_v49, %v2555_v54  ;;  %v6173_v49 = vpack.c.bf16 %v5733_v19, %v5736_v41 }
 0x52d   : > { %2647 = vrot.lane.b32.xlu1 %v2595_v50, %s4263_s20  ;;  %2665 = vrot.lane.b32.xlu0 %v2600_v34, %s4262_s19  ;;  %v6162_v34 = vpack.c.bf16 %v6160_v26, %v6161_v5  ;;  %v6169_v50 = vld [vmem:[#allocation17_spill] sm:$0xff] }
 0x52e   : > { %v6170_v7 = vpack.c.bf16 %v6168_v2, %v6169_v50 }
 0x531   : > { %2629 = vrot.lane.b32.xlu1 %v2590_v6, %s4264_s26  ;;  %2663 = vrot.lane.b32.xlu0 %v2599_v14, %s4262_s19 }
 0x535   : > { %2627 = vrot.lane.b32.xlu1 %v2589_v17, %s4264_s26  ;;  %2645 = vrot.lane.b32.xlu0 %v2594_v12, %s4263_s20  ;;  %v2618_v30 = vpop.permute.xlu1 %2617 }
 0x536   : > { %v2684_v38 = vsel %vm998_vm0, %v6165_v42, %v2618_v30 }
 0x539   : > { %2651 = vrot.lane.b32.xlu1 %v2597_v0, %s4263_s20  ;;  %2667 = vrot.lane.b32.xlu0 %v2601_v24, %s4262_s19 }
 0x53d   : > { %2669 = vrot.lane.b32.xlu0 %v2602_v28, %s4262_s19  ;;  %2673 = vrot.lane.b32.xlu1 %v2604_v36, %s4262_s19 }
 0x541   : > { %2671 = vrot.lane.b32.xlu1 %v2603_v51, %s4262_s19 }
 0x545   : > { %2653 = vrot.lane.b32.xlu1 %v2598_v57, %s4263_s20 }
 0x549   : > { %2675 = vrot.lane.b32.xlu1 %v2605_v22, %s4262_s19 }
 0x54d   : > { %2677 = vrot.lane.b32.xlu1 %v2606_v45, %s4262_s19  ;;  %s4179_s19 = sshll.u32 %s4265_s29, 4  ;;  %s4180_s19 = int_to_ptr.vmem [resolvable:$false] %s4179_s19 }
 0x54e   : > { %s4181_s20 = scalar_lea.vmem %s4180_s19, 4096  ;;  %p4182_p12 = scmp.lt.s32.totalorder %s5968_s10, %s4180_s19 }
 0x54f   : > { %p4183_p2 = scmp.lt.s32.totalorder %s4181_s20, %s4175_s27 }
 0x551   : > { %p4184_p1 = por %p4183_p2, %p4182_p12 }
 0x553   : > { %p4185_p4 = pnand %p4184_p1, %p4178_p7 }
 0x559   : > { %v2626_v20 = vpop.permute.xlu1 %2625 }
 0x55a   : > { %v2696_v16 = vsel %vm998_vm0, %v6171_v25, %v2626_v20 }
 0x587   : > { %v2642_v21 = vpop.permute.xlu0 %2641 }
 0x588   : > { %v2707_v18 = vsel %vm2703_vm1, %v2684_v38, %v2642_v21 }
 0x58b   : > { %v2616_v55 = vpop.permute.xlu0 %2615 }
 0x58c   : > { %v2681_v14 = vsel %vm998_vm0, %v6162_v34, %v2616_v55 }
 0x58f   : > { %v2640_v8 = vpop.permute.xlu0 %2639 }
 0x590   : > { %v2705_v28 = vsel %vm2703_vm1, %v2681_v14, %v2640_v8 }
 0x593   : > { %v2622_v4 = vpop.permute.xlu0 %2621 }
 0x594   : > { %v2690_v35 = vsel %vm998_vm0, %v6167_v10, %v2622_v4 }
 0x597   : > { %v2650_v48 = vpop.permute.xlu1 %2649  ;;  %v2620_v56 = vpop.permute.xlu0 %2619 }
 0x598   : > { %v2687_v12 = vsel %vm998_vm0, %v6166_v32, %v2620_v56  ;;  %v2715_v58 = vsel %vm2703_vm1, %v2696_v16, %v2650_v48 }
 0x59b   : > { %v2624_v6 = vpop.permute.xlu1 %2623  ;;  %v2644_v17 = vpop.permute.xlu0 %2643 }
 0x59c   : > { %v2709_v44 = vsel %vm2703_vm1, %v2687_v12, %v2644_v17  ;;  %v2693_v59 = vsel %vm998_vm0, %v6170_v7, %v2624_v6 }
 0x59f   : > { %v2648_v47 = vpop.permute.xlu1 %2647  ;;  %v2666_v13 = vpop.permute.xlu0 %2665 }
 0x5a0   : > { %v2725_v36 = vsel %vm2720_vm2, %v2707_v18, %v2666_v13  ;;  %v2713_v11 = vsel %vm2703_vm1, %v2693_v59, %v2648_v47 }
 0x5a3   : > { %v2630_v24 = vpop.permute.xlu1 %2629  ;;  %v2664_v33 = vpop.permute.xlu0 %2663 }
 0x5a4   : > { %v2722_v3 = vsel %vm2720_vm2, %v2705_v28, %v2664_v33  ;;  %v2702_v57 = vsel %vm998_vm0, %v6173_v49, %v2630_v24 }
 0x5a5   : > { %3604 = vmatprep.mubr.bf16.mxu0 %v2722_v3 }
 0x5a6   : > { %3605 = vmatmul.mubr.bf16.vlgmr.msra.gmra.mrb[96].mxu0 %v2725_v36 }
 0x5a7   : > { %v2628_v51 = vpop.permute.xlu1 %2627  ;;  %v2646_v60 = vpop.permute.xlu0 %2645 }
 0x5a8   : > { %v2711_v61 = vsel %vm2703_vm1, %v2690_v35, %v2646_v60  ;;  %v2699_v15 = vsel %vm998_vm0, %v6172_v27, %v2628_v51 }
 0x5ab   : > { %v2652_v45 = vpop.permute.xlu1 %2651  ;;  %v2668_v22 = vpop.permute.xlu0 %2667 }
 0x5ac   : > { %v2728_v63 = vsel %vm2720_vm2, %v2709_v44, %v2668_v22  ;;  %v2717_v9 = vsel %vm2703_vm1, %v2699_v15, %v2652_v45 }
 0x5ad   : > { %3608 = vmatprep.mubr.bf16.mxu0 %v2728_v63 }
 0x5af   : > { %v2674_v52 = vpop.permute.xlu1 %2673  ;;  %v2670_v43 = vpop.permute.xlu0 %2669 }
 0x5b0   : > { %v2731_v53 = vsel %vm2720_vm2, %v2711_v61, %v2670_v43  ;;  %v2737_v1 = vsel %vm2720_vm2, %v2715_v58, %v2674_v52 }
 0x5b1   : > { %3609 = vmatmul.mubr.bf16.gmra.mrb[100].mxu0 %v2731_v53 }
 0x5b3   : > { %v2672_v46 = vpop.permute.xlu1 %2671 }
 0x5b4   : > { %v2734_v62 = vsel %vm2720_vm2, %v2713_v11, %v2672_v46 }
 0x5b5   : > { %3612 = vmatprep.mubr.bf16.mxu1 %v2734_v62 }
 0x5b6   : > { %3613 = vmatmul.mubr.bf16.vlgmr.msra.gmra.mrb[80].mxu1 %v2737_v1 }
 0x5b7   : > { %v2654_v31 = vpop.permute.xlu1 %2653 }
 0x5b8   : > { %v2719_v0 = vsel %vm2703_vm1, %v2702_v57, %v2654_v31 }
 0x5bb   : > { %v2676_v37 = vpop.permute.xlu1 %2675 }
 0x5bc   : > { %v2740_v54 = vsel %vm2720_vm2, %v2717_v9, %v2676_v37 }
 0x5bd   : > { %3616 = vmatprep.mubr.bf16.mxu1 %v2740_v54 }
 0x5bf   : > { %v2678_v21 = vpop.permute.xlu1 %2677 }
 0x5c0   : > { %v2743_v55 = vsel %vm2720_vm2, %v2719_v0, %v2678_v21 }
 0x5c1   : > { %3617 = vmatmul.mubr.bf16.gmra.mrb[84].mxu1 %v2743_v55 }
 0x679   : > { %v3606_v29 = vpop.f32.mrb[96].mxu0 }
 0x67a   : > { %v2859_v30 = vadd.f32 %v3606_v29, %v3124_v40  ;;  %v2850_v8 = vpop.f32.mrb[97].mxu0 }
 0x67b   : > { %v2851_v20 = vadd.f32 %v3124_v40, %v2850_v8  ;;  %v3607_v4 = vpop.f32.mrb[98].mxu0 }
 0x67c   : > { %2915 = vst [vmem:[%s5946_s18 + $0x10] sm:$0xff] %v2859_v30  ;;  %v2862_v19 = vadd.f32 %v3607_v4, %v3124_v40  ;;  %v2853_v41 = vpop.f32.mrb[99].mxu0 }
 0x67d   : > { %2913 = vst [vmem:[%s5946_s18] sm:$0xff] %v2851_v20  ;;  %v2854_v48 = vadd.f32 %v3124_v40, %v2853_v41 }
 0x67e   : > { %2916 = vst [vmem:[%s5946_s18 + $0x18] sm:$0xff] %v2862_v19 }
 0x67f   : > { %2914 = vst [vmem:[%s5946_s18 + $0x8] sm:$0xff] %v2854_v48 }
 0x684   : > { %v3610_v56 = vpop.f32.mrb[100].mxu0 }
 0x685   : > { %v2875_v6 = vadd.f32 %v3610_v56, %v3124_v40  ;;  %v2866_v17 = vpop.f32.mrb[101].mxu0 }
 0x686   : > { %v2867_v47 = vadd.f32 %v3124_v40, %v2866_v17  ;;  %v3611_v13 = vpop.f32.mrb[102].mxu0 }
 0x687   : > { %2919 = vst [vmem:[%s5946_s18 + $0x30] sm:$0xff] %v2875_v6  ;;  %v2878_v26 = vadd.f32 %v3611_v13, %v3124_v40  ;;  %v2869_v5 = vpop.f32.mrb[103].mxu0 }
 0x688   : > { %2917 = vst [vmem:[%s5946_s18 + $0x20] sm:$0xff] %v2867_v47  ;;  %v2870_v34 = vadd.f32 %v3124_v40, %v2869_v5 }
 0x689   : > { %2920 = vst [vmem:[%s5946_s18 + $0x38] sm:$0xff] %v2878_v26  ;;  %v3614_v14 = vpop.f32.mrb[80].mxu1 }
 0x68a   : > { %2918 = vst [vmem:[%s5946_s18 + $0x28] sm:$0xff] %v2870_v34  ;;  %v2891_v23 = vadd.f32 %v3614_v14, %v3124_v40  ;;  %v2882_v39 = vpop.f32.mrb[81].mxu1 }
 0x68b   : > { %v2883_v42 = vadd.f32 %v3124_v40, %v2882_v39  ;;  %v3615_v38 = vpop.f32.mrb[82].mxu1 }
 0x68c   : > { %2923 = vst [vmem:[%s5946_s18 + $0x50] sm:$0xff] %v2891_v23  ;;  %v2894_v28 = vadd.f32 %v3615_v38, %v3124_v40  ;;  %v2885_v24 = vpop.f32.mrb[83].mxu1 }
 0x68d   : > { %2921 = vst [vmem:[%s5946_s18 + $0x40] sm:$0xff] %v2883_v42  ;;  %v2886_v33 = vadd.f32 %v3124_v40, %v2885_v24 }
 0x68e   : > { %2924 = vst [vmem:[%s5946_s18 + $0x58] sm:$0xff] %v2894_v28 }
 0x68f   : > { %2922 = vst [vmem:[%s5946_s18 + $0x48] sm:$0xff] %v2886_v33 }
 0x694   : > { %v3618_v18 = vpop.f32.mrb[84].mxu1 }
 0x695   : > { %v2907_v3 = vadd.f32 %v3618_v18, %v3124_v40  ;;  %v2898_v36 = vpop.f32.mrb[85].mxu1 }
 0x696   : > { %v2899_v51 = vadd.f32 %v3124_v40, %v2898_v36  ;;  %v3619_v60 = vpop.f32.mrb[86].mxu1 }
 0x697   : > { %2927 = vst [vmem:[%s5946_s18 + $0x70] sm:$0xff] %v2907_v3  ;;  %v2910_v32 = vadd.f32 %v3619_v60, %v3124_v40  ;;  %v2901_v12 = vpop.f32.mrb[87].mxu1 }
 0x698   : > { %2925 = vst [vmem:[%s5946_s18 + $0x60] sm:$0xff] %v2899_v51  ;;  %v2902_v44 = vadd.f32 %v3124_v40, %v2901_v12 }
 0x699   : > { %2928 = vst [vmem:[%s5946_s18 + $0x78] sm:$0xff] %v2910_v32 }
 0x69a   : > { %2926 = vst [vmem:[%s5946_s18 + $0x68] sm:$0xff] %v2902_v44 }
 0x69b   : > { %4188 = shalt.err (!%p4185_p4)
}
 0x69c   : > { %s4189_s26 = scalar_lea.hbm %s5966_s8, 2048  ;;  %s4193_s13 = scalar_lea.hbm %s6021_s6, 4096 }
 0x69d   : > { %p4190_p9 = scmp.ne.s32.totalorder %s5966_s8, %s4189_s26  ;;  %p4194_p8 = scmp.lt.u32.totalorder %s5966_s8, %s6021_s6 }
 0x69e   : > { %p4195_p13 = scmp.lt.u32.totalorder %s4193_s13, %s4189_s26  ;;  %p4197_p10 = scmp.lt.u32.totalorder %s4189_s26, %s5966_s8 }
 0x69f   : > { %p4191_p0 = pnand %p4190_p9, %p4448_p5 }
 0x6a0   : > { %p4196_p6 = por %p4195_p13, %p4194_p8 }
 0x6a1   : > { %p4192_p11 = pneg %p4191_p0 }
 0x6a2   : > { %p4198_p3 = por %p4197_p10, %p4196_p6 }
 0x6a4   : > { %p4199_p7 = pnand %p4198_p3, %p4192_p11 }
 0x6a6   : > { %4202 = shalt.err (!%p4199_p7)
}
 0x6a7   : > { %s4266_s7 = smov 128   ;;  %s4267_s16 = smov 8  }
 0x6a8   : > { %3682 = dma.vmem_to_hbm [thread:$0]  (%p4448_p5), %s5968_s10, 2048, %s5966_s8, %s2930_s25, %s4266_s7, %s4266_s7, %s4267_s16  }
 0x6a9 PF: > { %s2958_s27 = sand.u32 1, %s4237_s21   ;;  %p6174_p12 = scmp.ne.s32.totalorder %s6066_s28, 0 }
 0x6aa   : > { %p6175_p2 = scmp.ge.s32.totalorder %s4249_s24, 2  ;;  %s2959_s29 = scalar_lea.sflag [#allocation4], %s2958_s27 }
 0x6ac   : > { %p3699_p1 = pnand %p6175_p2, %p6174_p12 }
 0x6ae   : > { %4232 = dma.done.wait (!%p3699_p1), %s2959_s29, 2048  }
 0x6af   : > { %4234 = vsyncadd (!%p3699_p1), %s2959_s29, 4294965248  ;;  %p21_p4 = scmp.ge.s32.totalorder %s4434_s12, 4   ;;  %s6176_s21 = smov %s4241_s22 }
 0x6b0   : > { %s6177_s22 = smov %s4245_s23  ;;  %s6178_s23 = smov %s4444_s15 }
 0x6b1   : > { %s6179_s24 = smov %s4434_s12  ;;  %23 = sbr.rel (!%p21_p4) target bundleno = 7 (0x7), region = 101 }
 0x6b8   :  { %2964 = vsyncpa [#allocation3], 1 }
 0x6b9   :  { %2966 = vsyncpa [#allocation3 + $0x1], 1 }
 0x6ba   :  { %2967 = vsyncpa [#allocation6], 1 }
 0x6bb   :  { %2968 = vsyncpa [#allocation9], 1 }
 0x6bc   :  { %2969 = vsyncpa [#allocation4], 1 }
 0x6bd   :  { %2971 = vsyncpa [#allocation4 + $0x1], 1 }

</bundles_post_ra>
